<compile_context>
chip_gen: v7x
topology: tpu7x:2x2x1
jax: 0.10.0
libtpu: 0.0.40
codegen_flags: <defaults>
</compile_context>

<pallas_src>
import numpy as np
import jax
import jax.numpy as jnp
from jax import lax
from jax.experimental import pallas as pl
from jax.experimental.pallas import tpu as pltpu

PK = 3  # pool kernel / stride (max_pool2d(3, stride=3, padding=1))


# --------------------------- one-time param packing ---------------------------

def _pool_select_matrix(H, W, Ho2, Wo2, Hp, Wp, pk, ps, pp):
    """(H*W, pk*pk*Hp*Wp) 0/1 matrix.  Column t*Hp*Wp + py*Wp + px picks the
    flat-grid element of pooling tap t=(dy,dx) for output window (py,px).
    Out-of-range (padding) taps are all-zero columns — only correct because the
    pool input is post-ReLU (>= 0), so a 0 tap can never beat the real max."""
    S = np.zeros((H * W, pk * pk * Hp * Wp), np.float32)
    for dy in range(pk):
        for dx in range(pk):
            t = dy * pk + dx
            for py in range(Hp):
                for px in range(Wp):
                    yy = ps * py + dy - pp
                    xx = ps * px + dx - pp
                    if 0 <= yy < Ho2 and 0 <= xx < Wo2:
                        S[yy * W + xx, t * Hp * Wp + py * Wp + px] = 1.0
    return S


def pack_params(params, im_size, k1, k2):
    """One-time (outside-jit) repacking of the PyTorch-layout parameters."""
    w1, b1, w2, b2, wf, bf = params
    C, H, W = im_size
    h1, h2, ncls = w1.shape[0], w2.shape[0], wf.shape[0]
    Ho1, Wo1 = H - k1 + 1, W - k1 + 1
    Ho2, Wo2 = Ho1 - k2 + 1, Wo1 - k2 + 1
    Hp = (Ho2 + 2 - PK) // PK + 1
    Wp = (Wo2 + 2 - PK) // PK + 1
    PP = Hp * Wp
    # Guard the latent fragility of the module's output_size formula.
    assert wf.shape[1] == h2 * PP, (wf.shape, h2, Hp, Wp)

    L2 = H * W                               # conv2 flat-grid length per image
    L1 = L2 + (k2 - 1) * (W + 1)             # conv1 output lanes needed per image
    L0 = L1 + (k1 - 1) * (W + 1)             # right-padded flat input length
    S = ((L1 + 127) // 128) * 128            # per-image lane stride (128-aligned)

    dims = dict(C=C, H=H, W=W, h1=h1, h2=h2, k1=k1, k2=k2, ncls=ncls,
                Hp=Hp, Wp=Wp, L0=L0, L1=L1, L2=L2, S=S)

    # Fused-K conv weights: column index = tap*(in_ch) + in_ch (tap-major).
    w1f = jnp.transpose(w1, (0, 2, 3, 1)).reshape(h1, k1 * k1 * C).astype(jnp.float32)
    w2f = jnp.transpose(w2, (0, 2, 3, 1)).reshape(h2, k2 * k2 * h1).astype(jnp.float32)
    b1c = b1.reshape(h1, 1).astype(jnp.float32)
    b2c = b2.reshape(h2, 1).astype(jnp.float32)

    # Pool gather matrix replicated per output channel so the post-max tile is
    # already laid out as (channel, py, px) on 128-aligned lane groups:
    #   column index = tap*(h2*PP) + c*PP + (py*Wp + px)
    sel0 = _pool_select_matrix(H, W, Ho2, Wo2, Hp, Wp, PK, PK, 1)          # (H*W, 9*PP)
    selb = np.repeat(sel0.reshape(H * W, PK * PK, 1, PP), h2, axis=2)
    selb = jnp.asarray(selb.reshape(H * W, PK * PK * h2 * PP))             # (L2, 9*h2*PP)

    # PyTorch flatten order of the pooled maps is (channel, py, px) -> wf.T rows.
    wff = jnp.asarray(wf, jnp.float32).T                                   # (h2*PP, ncls)
    bfr = bf.reshape(1, ncls).astype(jnp.float32)
    return (w1f, b1c, w2f, b2c, selb, wff, bfr), dims


# ------------------------------- fused kernel -------------------------------

def _make_kernel(dims, B):
    W = dims["W"]
    h1, h2, k2 = dims["h1"], dims["h2"], dims["k2"]
    S, L1, L2 = dims["S"], dims["L1"], dims["L2"]
    PP = dims["Hp"] * dims["Wp"]
    F = h2 * PP                                  # per-image flattened FC features
    offs2 = [dy * W + dx for dy in range(k2) for dx in range(k2)]
    Ltap = (B - 1) * S + L2                      # one conv2 tap slice spans all B images
    # Correctness of the padded-lane layout (garbage never reaches a consumed lane):
    assert S >= L1 and max(offs2) == (k2 - 1) * (W + 1)
    assert max(offs2) + Ltap <= B * S

    def kernel(cols_ref, w1_ref, b1_ref, w2_ref, b2_ref,
               sel_ref, msk_ref, gsum_ref, wf_ref, bf_ref, o_ref):
        # ---- conv1 + ReLU: ONE fused-K matmul over all B images (images on lanes) ----
        a1 = jnp.dot(w1_ref[...], cols_ref[...], preferred_element_type=jnp.float32)
        a1 = jnp.maximum(a1 + b1_ref[...], 0.0)                        # (h1, B*S)

        # ---- conv2 + ReLU: im2col = 9 lane-shifted slices (each spans all images),
        #      stacked on sublanes -> ONE fused-K matmul ----
        t2 = jnp.concatenate([a1[:, o:o + Ltap] for o in offs2], axis=0)   # (9*h1, Ltap)
        a2 = jnp.dot(w2_ref[...], t2, preferred_element_type=jnp.float32)
        a2 = jnp.maximum(a2 + b2_ref[...], 0.0)                        # (h2, Ltap), >= 0 (pool pad trick)

        # ---- max_pool2d(3, stride=3, padding=1): restack images onto sublanes
        #      (lane-aligned slices: S, L2 are multiples of 128), ONE 0/1 gather
        #      matmul, unrolled 9-way maximum over 128-aligned lane groups ----
        a2s = jnp.concatenate([a2[:, n * S:n * S + L2] for n in range(B)], axis=0)  # (B*h2, L2)
        taps = jnp.dot(a2s, sel_ref[...], preferred_element_type=jnp.float32)       # (B*h2, 9*F)
        m = taps[:, 0:F]
        for t in range(1, PK * PK):
            m = jnp.maximum(m, taps[:, t * F:(t + 1) * F])             # (B*h2, F)
        # m[n*h2 + c', c*PP + p] == pooled_n[c', p] (replicated over c).  Keep only
        # c' == c via a 0/1 mask, then fold each image's h2 sublanes with a 0/1
        # matmul -> PyTorch-flatten-ordered (B, F) FC input (no in-kernel reshape).
        feat = jnp.dot(gsum_ref[...], m * msk_ref[...],
                       preferred_element_type=jnp.float32)             # (B, F)

        # ---- fc1: ONE lane-dense (B, F) @ (F, ncls) matmul + bias ----
        o_ref[...] = (jnp.dot(feat, wf_ref[...], preferred_element_type=jnp.float32)
                      + bf_ref[...])

    return kernel


def build_forward(packed, dims, block_b=8):
    w1f, b1c, w2f, b2c, selb, wff, bfr = packed
    C, H, W = dims["C"], dims["H"], dims["W"]
    h1, h2, k1, k2 = dims["h1"], dims["h2"], dims["k1"], dims["k2"]
    L0, L1, L2, S = dims["L0"], dims["L1"], dims["L2"], dims["S"]
    ncls = dims["ncls"]
    PP = dims["Hp"] * dims["Wp"]
    F = h2 * PP
    B = block_b
    assert B % 8 == 0, "block_b must be a multiple of 8 (output sublane tiling)"

    # Fold matrices (depend on B only); built once on the host.
    msk = jnp.asarray(np.tile(np.repeat(np.eye(h2, dtype=np.float32), PP, axis=1), (B, 1)))  # (B*h2, F)
    gsum = jnp.asarray(np.kron(np.eye(B, dtype=np.float32), np.ones((1, h2), np.float32)))   # (B, B*h2)

    offs1 = [dy * W + dx for dy in range(k1) for dx in range(k1)]
    kernel = _make_kernel(dims, B)

    def forward(x):
        N = x.shape[0]
        Np = ((N + B - 1) // B) * B
        xf = x.astype(jnp.float32).reshape(N, C, H * W)
        if Np != N:
            xf = jnp.pad(xf, ((0, Np - N), (0, 0), (0, 0)))
        # Host-side im2col for conv1 (tiny: ~55 KB/image, hidden by double-buffered
        # DMA): cols[t*C + c, n*S + q] = x[n, c, q + off_t], zero in the pad lanes.
        xpad = jnp.pad(xf, ((0, 0), (0, 0), (0, L0 - H * W)))              # (Np, C, L0)
        cols = jnp.stack([xpad[:, :, o:o + L1] for o in offs1], axis=1)    # (Np, 9, C, L1)
        cols = jnp.pad(cols, ((0, 0), (0, 0), (0, 0), (0, S - L1)))        # (Np, 9, C, S)
        cols = cols.transpose(1, 2, 0, 3).reshape(k1 * k1 * C, Np * S)     # (36, Np*S)

        out = pl.pallas_call(
            kernel,
            out_shape=jax.ShapeDtypeStruct((Np, ncls), jnp.float32),
            grid=(Np // B,),
            in_specs=[
                pl.BlockSpec((k1 * k1 * C, B * S), lambda i: (0, i)),       # im2col block (B images)
                pl.BlockSpec((h1, k1 * k1 * C), lambda i: (0, 0)),
                pl.BlockSpec((h1, 1), lambda i: (0, 0)),
                pl.BlockSpec((h2, k2 * k2 * h1), lambda i: (0, 0)),
                pl.BlockSpec((h2, 1), lambda i: (0, 0)),
                pl.BlockSpec((L2, PK * PK * F), lambda i: (0, 0)),          # pool gather matrix
                pl.BlockSpec((B * h2, F), lambda i: (0, 0)),                # channel mask
                pl.BlockSpec((B, B * h2), lambda i: (0, 0)),                # sublane-group fold
                pl.BlockSpec((F, ncls), lambda i: (0, 0)),                  # FC weight
                pl.BlockSpec((1, ncls), lambda i: (0, 0)),                  # FC bias
            ],
            out_specs=pl.BlockSpec((B, ncls), lambda i: (i, 0)),
            compiler_params=pltpu.CompilerParams(
                dimension_semantics=("parallel",)),                         # shards steps across v7x TCs
        )(cols, w1f, b1c, w2f, b2c, selb, msk, gsum, wff, bfr)
        return out[:N]

    return forward


# --------------------------- pure-JAX reference -----------------------------

def reference_forward(x, params):
    w1, b1, w2, b2, wf, bf = params
    dn = ("NCHW", "OIHW", "NCHW")
    y = lax.conv_general_dilated(x, w1, (1, 1), "VALID", dimension_numbers=dn)
    y = jnp.maximum(y + b1[None, :, None, None], 0.0)
    y = lax.conv_general_dilated(y, w2, (1, 1), "VALID", dimension_numbers=dn)
    y = jnp.maximum(y + b2[None, :, None, None], 0.0)
    y = lax.reduce_window(y, -jnp.inf, lax.max, (1, 1, 3, 3), (1, 1, 3, 3),
                          [(0, 0), (0, 0), (1, 1), (1, 1)])
    y = y.reshape(y.shape[0], -1)                                # (c, h, w) flatten
    return y @ wf.T + bf


# ---------------------------------- main ------------------------------------

if __name__ == "__main__":
    # Model config (small, consistent with the module's size formula):
    im_size = (4, 16, 16)       # (C, H, W)
    hidden_dim1 = 8
    hidden_dim2 = 8
    kernel_size1 = 3
    kernel_size2 = 3
    n_classes = 10
    batch = 16                  # 2 grid steps of 8 images each

    C, H, W = im_size
    out_hw = 1 + 1 + W - kernel_size1 - kernel_size2             # 12
    output_size = hidden_dim2 * int(out_hw * out_hw / 9)         # 128 (Linear in_features)

    key = jax.random.PRNGKey(0)
    k_x, k_w1, k_b1, k_w2, k_b2, k_wf, k_bf = jax.random.split(key, 7)

    x = jax.random.normal(k_x, (batch, C, H, W), dtype=jnp.float32)

    w1 = 0.1 * jax.random.normal(k_w1, (hidden_dim1, C, kernel_size1, kernel_size1), jnp.float32)
    b1 = 0.1 * jax.random.normal(k_b1, (hidden_dim1,), jnp.float32)
    w2 = 0.1 * jax.random.normal(k_w2, (hidden_dim2, hidden_dim1, kernel_size2, kernel_size2), jnp.float32)
    b2 = 0.1 * jax.random.normal(k_b2, (hidden_dim2,), jnp.float32)
    wf = 0.1 * jax.random.normal(k_wf, (n_classes, output_size), jnp.float32)
    bf = 0.1 * jax.random.normal(k_bf, (n_classes,), jnp.float32)
    params = (w1, b1, w2, b2, wf, bf)

    # Pack weights / selection matrices ONCE outside the per-call path.
    packed, dims = pack_params(params, im_size, kernel_size1, kernel_size2)
    fwd = jax.jit(build_forward(packed, dims, block_b=8))

    out = jax.block_until_ready(fwd(x))

    ref = jax.block_until_ready(reference_forward(x, params))
    assert out.shape == (batch, n_classes), out.shape
    err = float(jnp.max(jnp.abs(out - ref)))
    assert jnp.allclose(out, ref, atol=1e-3, rtol=1e-3), f"mismatch: max abs err {err}"

    print("KERNEL_OK")
</pallas_src>

<mosaic_0001>
module attributes {stable_mosaic.version = 11 : i64} {
  func.func @kernel(%arg0: i32, %arg1: memref<36x3072xf32, #tpu.memory_space<vmem>>, %arg2: memref<8x36xf32, #tpu.memory_space<vmem>>, %arg3: memref<8x1xf32, #tpu.memory_space<vmem>>, %arg4: memref<8x72xf32, #tpu.memory_space<vmem>>, %arg5: memref<8x1xf32, #tpu.memory_space<vmem>>, %arg6: memref<256x1152xf32, #tpu.memory_space<vmem>>, %arg7: memref<64x128xf32, #tpu.memory_space<vmem>>, %arg8: memref<8x64xf32, #tpu.memory_space<vmem>>, %arg9: memref<128x10xf32, #tpu.memory_space<vmem>>, %arg10: memref<1x10xf32, #tpu.memory_space<vmem>>, %arg11: memref<8x10xf32, #tpu.memory_space<vmem>>) attributes {dimension_semantics = [#tpu.dimension_semantics<parallel>], iteration_bounds = array<i64: 2>, scalar_prefetch = 0 : i64, scratch_operands = 0 : i64, tpu.core_type = #tpu.core_type<tc>, window_params = [{transform_indices = @transform_0, window_bounds = array<i64: 36, 3072>}, {pipeline_mode = #tpu.pipeline_mode<synchronous>, transform_indices = @transform_1, window_bounds = array<i64: 8, 36>}, {pipeline_mode = #tpu.pipeline_mode<synchronous>, transform_indices = @transform_2, window_bounds = array<i64: 8, 1>}, {pipeline_mode = #tpu.pipeline_mode<synchronous>, transform_indices = @transform_3, window_bounds = array<i64: 8, 72>}, {pipeline_mode = #tpu.pipeline_mode<synchronous>, transform_indices = @transform_4, window_bounds = array<i64: 8, 1>}, {pipeline_mode = #tpu.pipeline_mode<synchronous>, transform_indices = @transform_5, window_bounds = array<i64: 256, 1152>}, {pipeline_mode = #tpu.pipeline_mode<synchronous>, transform_indices = @transform_6, window_bounds = array<i64: 64, 128>}, {pipeline_mode = #tpu.pipeline_mode<synchronous>, transform_indices = @transform_7, window_bounds = array<i64: 8, 64>}, {pipeline_mode = #tpu.pipeline_mode<synchronous>, transform_indices = @transform_8, window_bounds = array<i64: 128, 10>}, {pipeline_mode = #tpu.pipeline_mode<synchronous>, transform_indices = @transform_9, window_bounds = array<i64: 1, 10>}, {transform_indices = @transform_10, window_bounds = array<i64: 8, 10>}]} {
    %c0 = arith.constant 0 : index
    %c0_0 = arith.constant 0 : index
    %0 = vector.load %arg2[%c0, %c0_0] : memref<8x36xf32, #tpu.memory_space<vmem>>, vector<8x36xf32>
    %c0_1 = arith.constant 0 : index
    %c0_2 = arith.constant 0 : index
    %1 = vector.load %arg1[%c0_1, %c0_2] : memref<36x3072xf32, #tpu.memory_space<vmem>>, vector<36x3072xf32>
    %cst = arith.constant dense<0.000000e+00> : vector<8x3072xf32>
    %2 = tpu.matmul %0, %1, %cst {dimension_numbers = #tpu.dot_dimension_numbers<[1], [0], [0], [1], [0, 0, 1, 1], [], []>} : vector<8x36xf32>, vector<36x3072xf32>, vector<8x3072xf32> -> vector<8x3072xf32>
    %c0_3 = arith.constant 0 : index
    %c0_4 = arith.constant 0 : index
    %3 = vector.load %arg3[%c0_3, %c0_4] : memref<8x1xf32, #tpu.memory_space<vmem>>, vector<8x1xf32>
    %4 = vector.broadcast %3 : vector<8x1xf32> to vector<8x3072xf32>
    %5 = arith.addf %2, %4 : vector<8x3072xf32>
    %cst_5 = arith.constant 0.000000e+00 : f32
    %6 = vector.broadcast %cst_5 : f32 to vector<8x3072xf32>
    %7 = arith.maximumf %5, %6 : vector<8x3072xf32>
    %8 = vector.extract_strided_slice %7 {offsets = [0, 0], sizes = [8, 2944], strides = [1, 1]} : vector<8x3072xf32> to vector<8x2944xf32>
    %9 = vector.extract_strided_slice %7 {offsets = [0, 1], sizes = [8, 2944], strides = [1, 1]} : vector<8x3072xf32> to vector<8x2944xf32>
    %10 = vector.extract_strided_slice %7 {offsets = [0, 2], sizes = [8, 2944], strides = [1, 1]} : vector<8x3072xf32> to vector<8x2944xf32>
    %11 = vector.extract_strided_slice %7 {offsets = [0, 16], sizes = [8, 2944], strides = [1, 1]} : vector<8x3072xf32> to vector<8x2944xf32>
    %12 = vector.extract_strided_slice %7 {offsets = [0, 17], sizes = [8, 2944], strides = [1, 1]} : vector<8x3072xf32> to vector<8x2944xf32>
    %13 = vector.extract_strided_slice %7 {offsets = [0, 18], sizes = [8, 2944], strides = [1, 1]} : vector<8x3072xf32> to vector<8x2944xf32>
    %14 = vector.extract_strided_slice %7 {offsets = [0, 32], sizes = [8, 2944], strides = [1, 1]} : vector<8x3072xf32> to vector<8x2944xf32>
    %15 = vector.extract_strided_slice %7 {offsets = [0, 33], sizes = [8, 2944], strides = [1, 1]} : vector<8x3072xf32> to vector<8x2944xf32>
    %16 = vector.extract_strided_slice %7 {offsets = [0, 34], sizes = [8, 2944], strides = [1, 1]} : vector<8x3072xf32> to vector<8x2944xf32>
    %17 = tpu.concatenate %8, %9, %10, %11, %12, %13, %14, %15, %16 in 0 : vector<8x2944xf32>, vector<8x2944xf32>, vector<8x2944xf32>, vector<8x2944xf32>, vector<8x2944xf32>, vector<8x2944xf32>, vector<8x2944xf32>, vector<8x2944xf32>, vector<8x2944xf32> -> vector<72x2944xf32>
    %c0_6 = arith.constant 0 : index
    %c0_7 = arith.constant 0 : index
    %18 = vector.load %arg4[%c0_6, %c0_7] : memref<8x72xf32, #tpu.memory_space<vmem>>, vector<8x72xf32>
    %cst_8 = arith.constant dense<0.000000e+00> : vector<8x2944xf32>
    %19 = tpu.matmul %18, %17, %cst_8 {dimension_numbers = #tpu.dot_dimension_numbers<[1], [0], [0], [1], [0, 0, 1, 1], [], []>} : vector<8x72xf32>, vector<72x2944xf32>, vector<8x2944xf32> -> vector<8x2944xf32>
    %c0_9 = arith.constant 0 : index
    %c0_10 = arith.constant 0 : index
    %20 = vector.load %arg5[%c0_9, %c0_10] : memref<8x1xf32, #tpu.memory_space<vmem>>, vector<8x1xf32>
    %21 = vector.broadcast %20 : vector<8x1xf32> to vector<8x2944xf32>
    %22 = arith.addf %19, %21 : vector<8x2944xf32>
    %cst_11 = arith.constant 0.000000e+00 : f32
    %23 = vector.broadcast %cst_11 : f32 to vector<8x2944xf32>
    %24 = arith.maximumf %22, %23 : vector<8x2944xf32>
    %25 = vector.extract_strided_slice %24 {offsets = [0, 0], sizes = [8, 256], strides = [1, 1]} : vector<8x2944xf32> to vector<8x256xf32>
    %26 = vector.extract_strided_slice %24 {offsets = [0, 384], sizes = [8, 256], strides = [1, 1]} : vector<8x2944xf32> to vector<8x256xf32>
    %27 = vector.extract_strided_slice %24 {offsets = [0, 768], sizes = [8, 256], strides = [1, 1]} : vector<8x2944xf32> to vector<8x256xf32>
    %28 = vector.extract_strided_slice %24 {offsets = [0, 1152], sizes = [8, 256], strides = [1, 1]} : vector<8x2944xf32> to vector<8x256xf32>
    %29 = vector.extract_strided_slice %24 {offsets = [0, 1536], sizes = [8, 256], strides = [1, 1]} : vector<8x2944xf32> to vector<8x256xf32>
    %30 = vector.extract_strided_slice %24 {offsets = [0, 1920], sizes = [8, 256], strides = [1, 1]} : vector<8x2944xf32> to vector<8x256xf32>
    %31 = vector.extract_strided_slice %24 {offsets = [0, 2304], sizes = [8, 256], strides = [1, 1]} : vector<8x2944xf32> to vector<8x256xf32>
    %32 = vector.extract_strided_slice %24 {offsets = [0, 2688], sizes = [8, 256], strides = [1, 1]} : vector<8x2944xf32> to vector<8x256xf32>
    %33 = tpu.concatenate %25, %26, %27, %28, %29, %30, %31, %32 in 0 : vector<8x256xf32>, vector<8x256xf32>, vector<8x256xf32>, vector<8x256xf32>, vector<8x256xf32>, vector<8x256xf32>, vector<8x256xf32>, vector<8x256xf32> -> vector<64x256xf32>
    %c0_12 = arith.constant 0 : index
    %c0_13 = arith.constant 0 : index
    %34 = vector.load %arg6[%c0_12, %c0_13] : memref<256x1152xf32, #tpu.memory_space<vmem>>, vector<256x1152xf32>
    %cst_14 = arith.constant dense<0.000000e+00> : vector<64x1152xf32>
    %35 = tpu.matmul %33, %34, %cst_14 {dimension_numbers = #tpu.dot_dimension_numbers<[1], [0], [0], [1], [0, 0, 1, 1], [], []>} : vector<64x256xf32>, vector<256x1152xf32>, vector<64x1152xf32> -> vector<64x1152xf32>
    %36 = vector.extract_strided_slice %35 {offsets = [0, 0], sizes = [64, 128], strides = [1, 1]} : vector<64x1152xf32> to vector<64x128xf32>
    %37 = vector.extract_strided_slice %35 {offsets = [0, 128], sizes = [64, 128], strides = [1, 1]} : vector<64x1152xf32> to vector<64x128xf32>
    %38 = arith.maximumf %36, %37 : vector<64x128xf32>
    %39 = vector.extract_strided_slice %35 {offsets = [0, 256], sizes = [64, 128], strides = [1, 1]} : vector<64x1152xf32> to vector<64x128xf32>
    %40 = arith.maximumf %38, %39 : vector<64x128xf32>
    %41 = vector.extract_strided_slice %35 {offsets = [0, 384], sizes = [64, 128], strides = [1, 1]} : vector<64x1152xf32> to vector<64x128xf32>
    %42 = arith.maximumf %40, %41 : vector<64x128xf32>
    %43 = vector.extract_strided_slice %35 {offsets = [0, 512], sizes = [64, 128], strides = [1, 1]} : vector<64x1152xf32> to vector<64x128xf32>
    %44 = arith.maximumf %42, %43 : vector<64x128xf32>
    %45 = vector.extract_strided_slice %35 {offsets = [0, 640], sizes = [64, 128], strides = [1, 1]} : vector<64x1152xf32> to vector<64x128xf32>
    %46 = arith.maximumf %44, %45 : vector<64x128xf32>
    %47 = vector.extract_strided_slice %35 {offsets = [0, 768], sizes = [64, 128], strides = [1, 1]} : vector<64x1152xf32> to vector<64x128xf32>
    %48 = arith.maximumf %46, %47 : vector<64x128xf32>
    %49 = vector.extract_strided_slice %35 {offsets = [0, 896], sizes = [64, 128], strides = [1, 1]} : vector<64x1152xf32> to vector<64x128xf32>
    %50 = arith.maximumf %48, %49 : vector<64x128xf32>
    %51 = vector.extract_strided_slice %35 {offsets = [0, 1024], sizes = [64, 128], strides = [1, 1]} : vector<64x1152xf32> to vector<64x128xf32>
    %52 = arith.maximumf %50, %51 : vector<64x128xf32>
    %c0_15 = arith.constant 0 : index
    %c0_16 = arith.constant 0 : index
    %53 = vector.load %arg8[%c0_15, %c0_16] : memref<8x64xf32, #tpu.memory_space<vmem>>, vector<8x64xf32>
    %c0_17 = arith.constant 0 : index
    %c0_18 = arith.constant 0 : index
    %54 = vector.load %arg7[%c0_17, %c0_18] : memref<64x128xf32, #tpu.memory_space<vmem>>, vector<64x128xf32>
    %55 = arith.mulf %52, %54 : vector<64x128xf32>
    %cst_19 = arith.constant dense<0.000000e+00> : vector<8x128xf32>
    %56 = tpu.matmul %53, %55, %cst_19 {dimension_numbers = #tpu.dot_dimension_numbers<[1], [0], [0], [1], [0, 0, 1, 1], [], []>} : vector<8x64xf32>, vector<64x128xf32>, vector<8x128xf32> -> vector<8x128xf32>
    %c0_20 = arith.constant 0 : index
    %c0_21 = arith.constant 0 : index
    %57 = vector.load %arg9[%c0_20, %c0_21] : memref<128x10xf32, #tpu.memory_space<vmem>>, vector<128x10xf32>
    %cst_22 = arith.constant dense<0.000000e+00> : vector<8x10xf32>
    %58 = tpu.matmul %56, %57, %cst_22 {dimension_numbers = #tpu.dot_dimension_numbers<[1], [0], [0], [1], [0, 0, 1, 1], [], []>} : vector<8x128xf32>, vector<128x10xf32>, vector<8x10xf32> -> vector<8x10xf32>
    %c0_23 = arith.constant 0 : index
    %c0_24 = arith.constant 0 : index
    %59 = vector.load %arg10[%c0_23, %c0_24] : memref<1x10xf32, #tpu.memory_space<vmem>>, vector<1x10xf32>
    %60 = vector.broadcast %59 : vector<1x10xf32> to vector<8x10xf32>
    %61 = arith.addf %58, %60 : vector<8x10xf32>
    %c0_25 = arith.constant 0 : index
    %c0_26 = arith.constant 0 : index
    %62 = vector.load %arg11[%c0_25, %c0_26] : memref<8x10xf32, #tpu.memory_space<vmem>>, vector<8x10xf32>
    tpu.vector_store %arg11[%c0_25, %c0_26], %61 {strides = array<i32>} : memref<8x10xf32, #tpu.memory_space<vmem>>, vector<8x10xf32>,
    return
  }
  func.func @transform_0(%arg0: i32) -> (i32, i32) {
    %c0_i32 = arith.constant 0 : i32
    %c0_i32_0 = arith.constant 0 : i32
    return %c0_i32, %arg0 : i32, i32
  }
  func.func @transform_1(%arg0: i32) -> (i32, i32) {
    %c0_i32 = arith.constant 0 : i32
    %c0_i32_0 = arith.constant 0 : i32
    %c0_i32_1 = arith.constant 0 : i32
    return %c0_i32, %c0_i32_0 : i32, i32
  }
  func.func @transform_2(%arg0: i32) -> (i32, i32) {
    %c0_i32 = arith.constant 0 : i32
    %c0_i32_0 = arith.constant 0 : i32
    %c0_i32_1 = arith.constant 0 : i32
    return %c0_i32, %c0_i32_0 : i32, i32
  }
  func.func @transform_3(%arg0: i32) -> (i32, i32) {
    %c0_i32 = arith.constant 0 : i32
    %c0_i32_0 = arith.constant 0 : i32
    %c0_i32_1 = arith.constant 0 : i32
    return %c0_i32, %c0_i32_0 : i32, i32
  }
  func.func @transform_4(%arg0: i32) -> (i32, i32) {
    %c0_i32 = arith.constant 0 : i32
    %c0_i32_0 = arith.constant 0 : i32
    %c0_i32_1 = arith.constant 0 : i32
    return %c0_i32, %c0_i32_0 : i32, i32
  }
  func.func @transform_5(%arg0: i32) -> (i32, i32) {
    %c0_i32 = arith.constant 0 : i32
    %c0_i32_0 = arith.constant 0 : i32
    %c0_i32_1 = arith.constant 0 : i32
    return %c0_i32, %c0_i32_0 : i32, i32
  }
  func.func @transform_6(%arg0: i32) -> (i32, i32) {
    %c0_i32 = arith.constant 0 : i32
    %c0_i32_0 = arith.constant 0 : i32
    %c0_i32_1 = arith.constant 0 : i32
    return %c0_i32, %c0_i32_0 : i32, i32
  }
  func.func @transform_7(%arg0: i32) -> (i32, i32) {
    %c0_i32 = arith.constant 0 : i32
    %c0_i32_0 = arith.constant 0 : i32
    %c0_i32_1 = arith.constant 0 : i32
    return %c0_i32, %c0_i32_0 : i32, i32
  }
  func.func @transform_8(%arg0: i32) -> (i32, i32) {
    %c0_i32 = arith.constant 0 : i32
    %c0_i32_0 = arith.constant 0 : i32
    %c0_i32_1 = arith.constant 0 : i32
    return %c0_i32, %c0_i32_0 : i32, i32
  }
  func.func @transform_9(%arg0: i32) -> (i32, i32) {
    %c0_i32 = arith.constant 0 : i32
    %c0_i32_0 = arith.constant 0 : i32
    %c0_i32_1 = arith.constant 0 : i32
    return %c0_i32, %c0_i32_0 : i32, i32
  }
  func.func @transform_10(%arg0: i32) -> (i32, i32) {
    %c0_i32 = arith.constant 0 : i32
    %c0_i32_0 = arith.constant 0 : i32
    return %arg0, %c0_i32 : i32, i32
  }
}

</mosaic_0001>

<bundles_post_ra>
// kernel: forward.1
= control target key start
LH: loop header
LB: loop body
LE: loop exit
PB: predicated region body
PF: predicated region fallthrough
CT: control target
= control target key end

     0   :  { %s8639_s0 = inlined_call_operand.vmem [shape: f32[36,6144], index: 0, kind: input, shape index: {}]   ;;  %s8640_s1 = inlined_call_operand.vmem [shape: f32[8,36], index: 1, kind: input, shape index: {}]   ;;  %s8641_s2 = inlined_call_operand.vmem [shape: f32[8,1], index: 2, kind: input, shape index: {}]   ;;  %s8642_s3 = inlined_call_operand.vmem [shape: f32[8,72], index: 3, kind: input, shape index: {}]   ;;  %s8643_s4 = inlined_call_operand.vmem [shape: f32[8,1], index: 4, kind: input, shape index: {}]   ;;  %s8644_s5 = inlined_call_operand.vmem [shape: f32[256,1152], index: 5, kind: input, shape index: {}]   ;;  %s8645_s6 = inlined_call_operand.vmem [shape: f32[64,128], index: 6, kind: input, shape index: {}]   ;;  %s8646_s7 = inlined_call_operand.vmem [shape: f32[8,64], index: 7, kind: input, shape index: {}]   ;;  %s8647_s8 = inlined_call_operand.vmem [shape: f32[128,10], index: 8, kind: input, shape index: {}]   ;;  %s8648_s9 = inlined_call_operand.vmem [shape: f32[1,10], index: 9, kind: input, shape index: {}]   ;;  %s8649_s10 = inlined_call_operand.hbm [shape: f32[16,10], index: 10, kind: output, shape index: {}]  }
   0x1   :  { %8651 = sst [smem:[#allocation6_spill]] %s8639_s0 }
   0x2   :  { %15 = vsyncpa [#allocation4], 0 }
   0x3   :  { %17 = vsyncpa [#allocation4 + $0x1], 0  ;;  %s5954_s13 = smov 0   ;;  %s5956_s14 = smov 0  }
   0x4   :  { %s5958_s15 = smov 0   ;;  %s5960_s16 = smov 0  }
   0x5 LB: > { %s8650_s17 = sadd.s32 4294967295, %s5884_s16   ;;  %s4526_s18 = sadd.s32 4294967294, %s5884_s16   ;;  %s5884_s16 = sphi %s5960_s16, %s8659_s16   ;;  %s5880_s15 = sphi %s5958_s15, %s8658_s15   ;;  %s5876_s14 = sphi %s5956_s14, %s8657_s14   ;;  %s5872_s13 = sphi %s5954_s13, %s8656_s13  }
   0x6   : > { %s5977_s19 = sadd.s32 1, %s5884_s16   ;;  %s30_s20 = sadd.s32 1, %s5880_s15 }
   0x7   : > { %s27_s21 = ssub.s32 %s5884_s16, %s5977_s19  ;;  %p37_p0 = scmp.ne.s32.totalorder %s5880_s15, %s5876_s14 }
   0x8   : > { %p28_p1 = scmp.eq.s32.totalorder %s27_s21, 0  ;;  %p38_p2 = scmp.eq.s32.totalorder %s5884_s16, 0 }
   0x9   : > { %p256_p3 = scmp.eq.s32.totalorder %s8650_s17, 1  ;;  %p261_p4 = scmp.ne.s32.totalorder %s5876_s14, %s5872_s13 }
   0xa   : > { %s5990_s22 = scalar_select %p28_p1, %s5880_s15, %s30_s20  }
   0xb   : > { %p39_p5 = por %p38_p2, %p37_p0  ;;  %p5992_p6 = por %p256_p3, %p37_p0 }
   0xc   : > { %p262_p7 = scmp.eq.s32.totalorder %s4526_s18, 1  ;;  %p4528_p9 = scmp.ge.s32.totalorder %s5884_s16, 2 }
   0xe   : > { %p5996_p8 = por %p262_p7, %p261_p4  ;;  %305 = sbr.rel (%p4528_p9) target bundleno = 90 (0x5a), region = 52 }
  0x15   : > { %308 = sbr.rel (!%p39_p5) target bundleno = 90 (0x5a), region = 56  ;;  %s310_s25 = sand.u32 (%p39_p5), 1, %s5880_s15  }
  0x16   : > { %s4586_s26 = smul.u32 (%p39_p5), 192, %s5884_s16  ;;  %s8654_s0 = sld [smem:[#allocation6_spill]] (%p39_p5) }
  0x17   : > { %s5362_s27 = smul.u32 (%p39_p5), 960, %s310_s25 }
  0x19   : > { %s6013_s11 = scalar_lea.vmem (%p39_p5), [#allocation2], %s5362_s27 }
  0x1c   : > { %s6008_s30 = scalar_lea.vmem %s8654_s0, %s4586_s26 }
  0x1d   : > { %v328_v0 = vld [vmem:[%s6008_s30] sm:$0xff]  ;;  %v330_v1 = vld [vmem:[%s6008_s30 + $0x8] sm:$0xff]  ;;  %v332_v2 = vld [vmem:[%s6008_s30 + $0x10] sm:$0xff] }
  0x1e   : > { %329 = vst [vmem:[%s6013_s11] sm:$0xff] %v328_v0  ;;  %331 = vst [vmem:[%s6013_s11 + $0x8] sm:$0xff] %v330_v1  ;;  %v334_v3 = vld [vmem:[%s6008_s30 + $0x18] sm:$0xff]  ;;  %v336_v4 = vld [vmem:[%s6008_s30 + $0x20] sm:$0xff] }
  0x1f   : > { %333 = vst [vmem:[%s6013_s11 + $0x10] sm:$0xff] %v332_v2  ;;  %v338_v5 = vld [vmem:[%s6008_s30 + $0x28] sm:$0xff]  ;;  %335 = vst [vmem:[%s6013_s11 + $0x18] sm:$0xff] %v334_v3  ;;  %v340_v6 = vld [vmem:[%s6008_s30 + $0x30] sm:$0xff] }
  0x20   : > { %337 = vst [vmem:[%s6013_s11 + $0x20] sm:$0xff] %v336_v4  ;;  %339 = vst [vmem:[%s6013_s11 + $0x28] sm:$0xff] %v338_v5  ;;  %v342_v7 = vld [vmem:[%s6008_s30 + $0x38] sm:$0xff]  ;;  %v344_v8 = vld [vmem:[%s6008_s30 + $0x40] sm:$0xff] }
  0x21   : > { %341 = vst [vmem:[%s6013_s11 + $0x30] sm:$0xff] %v340_v6  ;;  %343 = vst [vmem:[%s6013_s11 + $0x38] sm:$0xff] %v342_v7  ;;  %v346_v9 = vld [vmem:[%s6008_s30 + $0x48] sm:$0xff]  ;;  %v348_v10 = vld [vmem:[%s6008_s30 + $0x50] sm:$0xff] }
  0x22   : > { %345 = vst [vmem:[%s6013_s11 + $0x40] sm:$0xff] %v344_v8  ;;  %v350_v11 = vld [vmem:[%s6008_s30 + $0x58] sm:$0xff]  ;;  %347 = vst [vmem:[%s6013_s11 + $0x48] sm:$0xff] %v346_v9  ;;  %v352_v12 = vld [vmem:[%s6008_s30 + $0x60] sm:$0xff] }
  0x23   : > { %349 = vst [vmem:[%s6013_s11 + $0x50] sm:$0xff] %v348_v10  ;;  %351 = vst [vmem:[%s6013_s11 + $0x58] sm:$0xff] %v350_v11  ;;  %v354_v13 = vld [vmem:[%s6008_s30 + $0x68] sm:$0xff]  ;;  %v356_v14 = vld [vmem:[%s6008_s30 + $0x70] sm:$0xff] }
  0x24   : > { %353 = vst [vmem:[%s6013_s11 + $0x60] sm:$0xff] %v352_v12  ;;  %355 = vst [vmem:[%s6013_s11 + $0x68] sm:$0xff] %v354_v13  ;;  %v358_v15 = vld [vmem:[%s6008_s30 + $0x78] sm:$0xff]  ;;  %v360_v16 = vld [vmem:[%s6008_s30 + $0x80] sm:$0xff] }
  0x25   : > { %357 = vst [vmem:[%s6013_s11 + $0x70] sm:$0xff] %v356_v14  ;;  %v362_v17 = vld [vmem:[%s6008_s30 + $0x88] sm:$0xff]  ;;  %359 = vst [vmem:[%s6013_s11 + $0x78] sm:$0xff] %v358_v15  ;;  %v364_v18 = vld [vmem:[%s6008_s30 + $0x90] sm:$0xff] }
  0x26   : > { %361 = vst [vmem:[%s6013_s11 + $0x80] sm:$0xff] %v360_v16  ;;  %363 = vst [vmem:[%s6013_s11 + $0x88] sm:$0xff] %v362_v17  ;;  %v366_v19 = vld [vmem:[%s6008_s30 + $0x98] sm:$0xff]  ;;  %v368_v20 = vld [vmem:[%s6008_s30 + $0xa0] sm:$0xff] }
  0x27   : > { %365 = vst [vmem:[%s6013_s11 + $0x90] sm:$0xff] %v364_v18  ;;  %367 = vst [vmem:[%s6013_s11 + $0x98] sm:$0xff] %v366_v19  ;;  %v370_v21 = vld [vmem:[%s6008_s30 + $0xa8] sm:$0xff]  ;;  %v372_v22 = vld [vmem:[%s6008_s30 + $0xb0] sm:$0xff] }
  0x28   : > { %369 = vst [vmem:[%s6013_s11 + $0xa0] sm:$0xff] %v368_v20  ;;  %v374_v23 = vld [vmem:[%s6008_s30 + $0xb8] sm:$0xff]  ;;  %371 = vst [vmem:[%s6013_s11 + $0xa8] sm:$0xff] %v370_v21  ;;  %v376_v24 = vld [vmem:[%s6008_s30 + $0x180] sm:$0xff] }
  0x29   : > { %373 = vst [vmem:[%s6013_s11 + $0xb0] sm:$0xff] %v372_v22  ;;  %375 = vst [vmem:[%s6013_s11 + $0xb8] sm:$0xff] %v374_v23  ;;  %v378_v25 = vld [vmem:[%s6008_s30 + $0x188] sm:$0xff]  ;;  %v380_v26 = vld [vmem:[%s6008_s30 + $0x190] sm:$0xff] }
  0x2a   : > { %377 = vst [vmem:[%s6013_s11 + $0xc0] sm:$0xff] %v376_v24  ;;  %379 = vst [vmem:[%s6013_s11 + $0xc8] sm:$0xff] %v378_v25  ;;  %v382_v27 = vld [vmem:[%s6008_s30 + $0x198] sm:$0xff]  ;;  %v384_v28 = vld [vmem:[%s6008_s30 + $0x1a0] sm:$0xff] }
  0x2b   : > { %381 = vst [vmem:[%s6013_s11 + $0xd0] sm:$0xff] %v380_v26  ;;  %v386_v29 = vld [vmem:[%s6008_s30 + $0x1a8] sm:$0xff]  ;;  %383 = vst [vmem:[%s6013_s11 + $0xd8] sm:$0xff] %v382_v27  ;;  %v388_v30 = vld [vmem:[%s6008_s30 + $0x1b0] sm:$0xff] }
  0x2c   : > { %385 = vst [vmem:[%s6013_s11 + $0xe0] sm:$0xff] %v384_v28  ;;  %387 = vst [vmem:[%s6013_s11 + $0xe8] sm:$0xff] %v386_v29  ;;  %v390_v31 = vld [vmem:[%s6008_s30 + $0x1b8] sm:$0xff]  ;;  %v392_v32 = vld [vmem:[%s6008_s30 + $0x1c0] sm:$0xff] }
  0x2d   : > { %389 = vst [vmem:[%s6013_s11 + $0xf0] sm:$0xff] %v388_v30  ;;  %391 = vst [vmem:[%s6013_s11 + $0xf8] sm:$0xff] %v390_v31  ;;  %v394_v33 = vld [vmem:[%s6008_s30 + $0x1c8] sm:$0xff]  ;;  %v396_v34 = vld [vmem:[%s6008_s30 + $0x1d0] sm:$0xff] }
  0x2e   : > { %393 = vst [vmem:[%s6013_s11 + $0x100] sm:$0xff] %v392_v32  ;;  %v398_v35 = vld [vmem:[%s6008_s30 + $0x1d8] sm:$0xff]  ;;  %395 = vst [vmem:[%s6013_s11 + $0x108] sm:$0xff] %v394_v33  ;;  %v400_v36 = vld [vmem:[%s6008_s30 + $0x1e0] sm:$0xff] }
  0x2f   : > { %397 = vst [vmem:[%s6013_s11 + $0x110] sm:$0xff] %v396_v34  ;;  %399 = vst [vmem:[%s6013_s11 + $0x118] sm:$0xff] %v398_v35  ;;  %v402_v37 = vld [vmem:[%s6008_s30 + $0x1e8] sm:$0xff]  ;;  %v404_v38 = vld [vmem:[%s6008_s30 + $0x1f0] sm:$0xff] }
  0x30   : > { %401 = vst [vmem:[%s6013_s11 + $0x120] sm:$0xff] %v400_v36  ;;  %403 = vst [vmem:[%s6013_s11 + $0x128] sm:$0xff] %v402_v37  ;;  %v406_v39 = vld [vmem:[%s6008_s30 + $0x1f8] sm:$0xff]  ;;  %v408_v40 = vld [vmem:[%s6008_s30 + $0x200] sm:$0xff] }
  0x31   : > { %405 = vst [vmem:[%s6013_s11 + $0x130] sm:$0xff] %v404_v38  ;;  %v410_v41 = vld [vmem:[%s6008_s30 + $0x208] sm:$0xff]  ;;  %407 = vst [vmem:[%s6013_s11 + $0x138] sm:$0xff] %v406_v39  ;;  %v412_v42 = vld [vmem:[%s6008_s30 + $0x210] sm:$0xff] }
  0x32   : > { %409 = vst [vmem:[%s6013_s11 + $0x140] sm:$0xff] %v408_v40  ;;  %411 = vst [vmem:[%s6013_s11 + $0x148] sm:$0xff] %v410_v41  ;;  %v414_v43 = vld [vmem:[%s6008_s30 + $0x218] sm:$0xff]  ;;  %v416_v44 = vld [vmem:[%s6008_s30 + $0x220] sm:$0xff] }
  0x33   : > { %413 = vst [vmem:[%s6013_s11 + $0x150] sm:$0xff] %v412_v42  ;;  %415 = vst [vmem:[%s6013_s11 + $0x158] sm:$0xff] %v414_v43  ;;  %v418_v45 = vld [vmem:[%s6008_s30 + $0x228] sm:$0xff]  ;;  %v420_v46 = vld [vmem:[%s6008_s30 + $0x230] sm:$0xff] }
  0x34   : > { %417 = vst [vmem:[%s6013_s11 + $0x160] sm:$0xff] %v416_v44  ;;  %v422_v47 = vld [vmem:[%s6008_s30 + $0x238] sm:$0xff]  ;;  %419 = vst [vmem:[%s6013_s11 + $0x168] sm:$0xff] %v418_v45  ;;  %v424_v48 = vld [vmem:[%s6008_s30 + $0x300] sm:$0xff] }
  0x35   : > { %421 = vst [vmem:[%s6013_s11 + $0x170] sm:$0xff] %v420_v46  ;;  %423 = vst [vmem:[%s6013_s11 + $0x178] sm:$0xff] %v422_v47  ;;  %v426_v49 = vld [vmem:[%s6008_s30 + $0x308] sm:$0xff]  ;;  %v428_v50 = vld [vmem:[%s6008_s30 + $0x310] sm:$0xff] }
  0x36   : > { %425 = vst [vmem:[%s6013_s11 + $0x180] sm:$0xff] %v424_v48  ;;  %427 = vst [vmem:[%s6013_s11 + $0x188] sm:$0xff] %v426_v49  ;;  %v430_v51 = vld [vmem:[%s6008_s30 + $0x318] sm:$0xff]  ;;  %v432_v52 = vld [vmem:[%s6008_s30 + $0x320] sm:$0xff] }
  0x37   : > { %429 = vst [vmem:[%s6013_s11 + $0x190] sm:$0xff] %v428_v50  ;;  %v434_v53 = vld [vmem:[%s6008_s30 + $0x328] sm:$0xff]  ;;  %431 = vst [vmem:[%s6013_s11 + $0x198] sm:$0xff] %v430_v51  ;;  %v436_v54 = vld [vmem:[%s6008_s30 + $0x330] sm:$0xff] }
  0x38   : > { %433 = vst [vmem:[%s6013_s11 + $0x1a0] sm:$0xff] %v432_v52  ;;  %435 = vst [vmem:[%s6013_s11 + $0x1a8] sm:$0xff] %v434_v53  ;;  %v438_v55 = vld [vmem:[%s6008_s30 + $0x338] sm:$0xff]  ;;  %v440_v56 = vld [vmem:[%s6008_s30 + $0x340] sm:$0xff] }
  0x39   : > { %437 = vst [vmem:[%s6013_s11 + $0x1b0] sm:$0xff] %v436_v54  ;;  %439 = vst [vmem:[%s6013_s11 + $0x1b8] sm:$0xff] %v438_v55  ;;  %v442_v57 = vld [vmem:[%s6008_s30 + $0x348] sm:$0xff]  ;;  %v444_v58 = vld [vmem:[%s6008_s30 + $0x350] sm:$0xff] }
  0x3a   : > { %441 = vst [vmem:[%s6013_s11 + $0x1c0] sm:$0xff] %v440_v56  ;;  %v446_v59 = vld [vmem:[%s6008_s30 + $0x358] sm:$0xff]  ;;  %443 = vst [vmem:[%s6013_s11 + $0x1c8] sm:$0xff] %v442_v57  ;;  %v448_v60 = vld [vmem:[%s6008_s30 + $0x360] sm:$0xff] }
  0x3b   : > { %445 = vst [vmem:[%s6013_s11 + $0x1d0] sm:$0xff] %v444_v58  ;;  %447 = vst [vmem:[%s6013_s11 + $0x1d8] sm:$0xff] %v446_v59  ;;  %v450_v61 = vld [vmem:[%s6008_s30 + $0x368] sm:$0xff]  ;;  %v452_v62 = vld [vmem:[%s6008_s30 + $0x370] sm:$0xff] }
  0x3c   : > { %449 = vst [vmem:[%s6013_s11 + $0x1e0] sm:$0xff] %v448_v60  ;;  %451 = vst [vmem:[%s6013_s11 + $0x1e8] sm:$0xff] %v450_v61  ;;  %v454_v63 = vld [vmem:[%s6008_s30 + $0x378] sm:$0xff]  ;;  %v456_v0 = vld [vmem:[%s6008_s30 + $0x380] sm:$0xff] }
  0x3d   : > { %453 = vst [vmem:[%s6013_s11 + $0x1f0] sm:$0xff] %v452_v62  ;;  %v458_v1 = vld [vmem:[%s6008_s30 + $0x388] sm:$0xff]  ;;  %455 = vst [vmem:[%s6013_s11 + $0x1f8] sm:$0xff] %v454_v63  ;;  %v460_v2 = vld [vmem:[%s6008_s30 + $0x390] sm:$0xff] }
  0x3e   : > { %457 = vst [vmem:[%s6013_s11 + $0x200] sm:$0xff] %v456_v0  ;;  %459 = vst [vmem:[%s6013_s11 + $0x208] sm:$0xff] %v458_v1  ;;  %v462_v3 = vld [vmem:[%s6008_s30 + $0x398] sm:$0xff]  ;;  %v464_v4 = vld [vmem:[%s6008_s30 + $0x3a0] sm:$0xff] }
  0x3f   : > { %461 = vst [vmem:[%s6013_s11 + $0x210] sm:$0xff] %v460_v2  ;;  %463 = vst [vmem:[%s6013_s11 + $0x218] sm:$0xff] %v462_v3  ;;  %v466_v5 = vld [vmem:[%s6008_s30 + $0x3a8] sm:$0xff]  ;;  %v468_v6 = vld [vmem:[%s6008_s30 + $0x3b0] sm:$0xff] }
  0x40   : > { %465 = vst [vmem:[%s6013_s11 + $0x220] sm:$0xff] %v464_v4  ;;  %v470_v7 = vld [vmem:[%s6008_s30 + $0x3b8] sm:$0xff]  ;;  %467 = vst [vmem:[%s6013_s11 + $0x228] sm:$0xff] %v466_v5  ;;  %v472_v8 = vld [vmem:[%s6008_s30 + $0x480] sm:$0xff] }
  0x41   : > { %469 = vst [vmem:[%s6013_s11 + $0x230] sm:$0xff] %v468_v6  ;;  %471 = vst [vmem:[%s6013_s11 + $0x238] sm:$0xff] %v470_v7  ;;  %v474_v9 = vld [vmem:[%s6008_s30 + $0x488] sm:$0xff]  ;;  %v476_v10 = vld [vmem:[%s6008_s30 + $0x490] sm:$0xff] }
  0x42   : > { %473 = vst [vmem:[%s6013_s11 + $0x240] sm:$0xff] %v472_v8  ;;  %475 = vst [vmem:[%s6013_s11 + $0x248] sm:$0xff] %v474_v9  ;;  %v478_v11 = vld [vmem:[%s6008_s30 + $0x498] sm:$0xff]  ;;  %v480_v12 = vld [vmem:[%s6008_s30 + $0x4a0] sm:$0xff] }
  0x43   : > { %477 = vst [vmem:[%s6013_s11 + $0x250] sm:$0xff] %v476_v10  ;;  %v482_v13 = vld [vmem:[%s6008_s30 + $0x4a8] sm:$0xff]  ;;  %479 = vst [vmem:[%s6013_s11 + $0x258] sm:$0xff] %v478_v11  ;;  %v484_v14 = vld [vmem:[%s6008_s30 + $0x4b0] sm:$0xff] }
  0x44   : > { %481 = vst [vmem:[%s6013_s11 + $0x260] sm:$0xff] %v480_v12  ;;  %483 = vst [vmem:[%s6013_s11 + $0x268] sm:$0xff] %v482_v13  ;;  %v486_v15 = vld [vmem:[%s6008_s30 + $0x4b8] sm:$0xff]  ;;  %v488_v16 = vld [vmem:[%s6008_s30 + $0x4c0] sm:$0xff] }
  0x45   : > { %485 = vst [vmem:[%s6013_s11 + $0x270] sm:$0xff] %v484_v14  ;;  %487 = vst [vmem:[%s6013_s11 + $0x278] sm:$0xff] %v486_v15  ;;  %v490_v17 = vld [vmem:[%s6008_s30 + $0x4c8] sm:$0xff]  ;;  %v492_v18 = vld [vmem:[%s6008_s30 + $0x4d0] sm:$0xff] }
  0x46   : > { %489 = vst [vmem:[%s6013_s11 + $0x280] sm:$0xff] %v488_v16  ;;  %v494_v19 = vld [vmem:[%s6008_s30 + $0x4d8] sm:$0xff]  ;;  %491 = vst [vmem:[%s6013_s11 + $0x288] sm:$0xff] %v490_v17  ;;  %v496_v20 = vld [vmem:[%s6008_s30 + $0x4e0] sm:$0xff] }
  0x47   : > { %493 = vst [vmem:[%s6013_s11 + $0x290] sm:$0xff] %v492_v18  ;;  %495 = vst [vmem:[%s6013_s11 + $0x298] sm:$0xff] %v494_v19  ;;  %v498_v21 = vld [vmem:[%s6008_s30 + $0x4e8] sm:$0xff]  ;;  %v500_v22 = vld [vmem:[%s6008_s30 + $0x4f0] sm:$0xff] }
  0x48   : > { %497 = vst [vmem:[%s6013_s11 + $0x2a0] sm:$0xff] %v496_v20  ;;  %499 = vst [vmem:[%s6013_s11 + $0x2a8] sm:$0xff] %v498_v21  ;;  %v502_v23 = vld [vmem:[%s6008_s30 + $0x4f8] sm:$0xff]  ;;  %v504_v24 = vld [vmem:[%s6008_s30 + $0x500] sm:$0xff] }
  0x49   : > { %501 = vst [vmem:[%s6013_s11 + $0x2b0] sm:$0xff] %v500_v22  ;;  %v506_v25 = vld [vmem:[%s6008_s30 + $0x508] sm:$0xff]  ;;  %503 = vst [vmem:[%s6013_s11 + $0x2b8] sm:$0xff] %v502_v23  ;;  %v508_v26 = vld [vmem:[%s6008_s30 + $0x510] sm:$0xff] }
  0x4a   : > { %505 = vst [vmem:[%s6013_s11 + $0x2c0] sm:$0xff] %v504_v24  ;;  %507 = vst [vmem:[%s6013_s11 + $0x2c8] sm:$0xff] %v506_v25  ;;  %v510_v27 = vld [vmem:[%s6008_s30 + $0x518] sm:$0xff]  ;;  %v512_v28 = vld [vmem:[%s6008_s30 + $0x520] sm:$0xff] }
  0x4b   : > { %509 = vst [vmem:[%s6013_s11 + $0x2d0] sm:$0xff] %v508_v26  ;;  %511 = vst [vmem:[%s6013_s11 + $0x2d8] sm:$0xff] %v510_v27  ;;  %v514_v29 = vld [vmem:[%s6008_s30 + $0x528] sm:$0xff]  ;;  %v516_v30 = vld [vmem:[%s6008_s30 + $0x530] sm:$0xff] }
  0x4c   : > { %513 = vst [vmem:[%s6013_s11 + $0x2e0] sm:$0xff] %v512_v28  ;;  %v518_v31 = vld [vmem:[%s6008_s30 + $0x538] sm:$0xff]  ;;  %515 = vst [vmem:[%s6013_s11 + $0x2e8] sm:$0xff] %v514_v29  ;;  %v520_v32 = vld [vmem:[%s6008_s30 + $0x600] sm:$0xff] }
  0x4d   : > { %517 = vst [vmem:[%s6013_s11 + $0x2f0] sm:$0xff] %v516_v30  ;;  %519 = vst [vmem:[%s6013_s11 + $0x2f8] sm:$0xff] %v518_v31  ;;  %v522_v33 = vld [vmem:[%s6008_s30 + $0x608] sm:$0xff]  ;;  %v524_v34 = vld [vmem:[%s6008_s30 + $0x610] sm:$0xff] }
  0x4e   : > { %521 = vst [vmem:[%s6013_s11 + $0x300] sm:$0xff] %v520_v32  ;;  %523 = vst [vmem:[%s6013_s11 + $0x308] sm:$0xff] %v522_v33  ;;  %v526_v35 = vld [vmem:[%s6008_s30 + $0x618] sm:$0xff]  ;;  %v528_v36 = vld [vmem:[%s6008_s30 + $0x620] sm:$0xff] }
  0x4f   : > { %525 = vst [vmem:[%s6013_s11 + $0x310] sm:$0xff] %v524_v34  ;;  %v530_v37 = vld [vmem:[%s6008_s30 + $0x628] sm:$0xff]  ;;  %527 = vst [vmem:[%s6013_s11 + $0x318] sm:$0xff] %v526_v35  ;;  %v532_v38 = vld [vmem:[%s6008_s30 + $0x630] sm:$0xff] }
  0x50   : > { %529 = vst [vmem:[%s6013_s11 + $0x320] sm:$0xff] %v528_v36  ;;  %531 = vst [vmem:[%s6013_s11 + $0x328] sm:$0xff] %v530_v37  ;;  %v534_v39 = vld [vmem:[%s6008_s30 + $0x638] sm:$0xff]  ;;  %v536_v40 = vld [vmem:[%s6008_s30 + $0x640] sm:$0xff] }
  0x51   : > { %533 = vst [vmem:[%s6013_s11 + $0x330] sm:$0xff] %v532_v38  ;;  %535 = vst [vmem:[%s6013_s11 + $0x338] sm:$0xff] %v534_v39  ;;  %v538_v41 = vld [vmem:[%s6008_s30 + $0x648] sm:$0xff]  ;;  %v540_v42 = vld [vmem:[%s6008_s30 + $0x650] sm:$0xff] }
  0x52   : > { %537 = vst [vmem:[%s6013_s11 + $0x340] sm:$0xff] %v536_v40  ;;  %v542_v43 = vld [vmem:[%s6008_s30 + $0x658] sm:$0xff]  ;;  %539 = vst [vmem:[%s6013_s11 + $0x348] sm:$0xff] %v538_v41  ;;  %v544_v44 = vld [vmem:[%s6008_s30 + $0x660] sm:$0xff] }
  0x53   : > { %541 = vst [vmem:[%s6013_s11 + $0x350] sm:$0xff] %v540_v42  ;;  %543 = vst [vmem:[%s6013_s11 + $0x358] sm:$0xff] %v542_v43  ;;  %v546_v45 = vld [vmem:[%s6008_s30 + $0x668] sm:$0xff]  ;;  %v548_v46 = vld [vmem:[%s6008_s30 + $0x670] sm:$0xff] }
  0x54   : > { %545 = vst [vmem:[%s6013_s11 + $0x360] sm:$0xff] %v544_v44  ;;  %547 = vst [vmem:[%s6013_s11 + $0x368] sm:$0xff] %v546_v45  ;;  %v550_v47 = vld [vmem:[%s6008_s30 + $0x678] sm:$0xff]  ;;  %v552_v48 = vld [vmem:[%s6008_s30 + $0x680] sm:$0xff] }
  0x55   : > { %549 = vst [vmem:[%s6013_s11 + $0x370] sm:$0xff] %v548_v46  ;;  %v554_v49 = vld [vmem:[%s6008_s30 + $0x688] sm:$0xff]  ;;  %551 = vst [vmem:[%s6013_s11 + $0x378] sm:$0xff] %v550_v47  ;;  %v556_v50 = vld [vmem:[%s6008_s30 + $0x690] sm:$0xff] }
  0x56   : > { %553 = vst [vmem:[%s6013_s11 + $0x380] sm:$0xff] %v552_v48  ;;  %555 = vst [vmem:[%s6013_s11 + $0x388] sm:$0xff] %v554_v49  ;;  %v558_v51 = vld [vmem:[%s6008_s30 + $0x698] sm:$0xff]  ;;  %v560_v52 = vld [vmem:[%s6008_s30 + $0x6a0] sm:$0xff] }
  0x57   : > { %557 = vst [vmem:[%s6013_s11 + $0x390] sm:$0xff] %v556_v50  ;;  %559 = vst [vmem:[%s6013_s11 + $0x398] sm:$0xff] %v558_v51  ;;  %v562_v53 = vld [vmem:[%s6008_s30 + $0x6a8] sm:$0xff]  ;;  %v564_v54 = vld [vmem:[%s6008_s30 + $0x6b0] sm:$0xff] }
  0x58   : > { %561 = vst [vmem:[%s6013_s11 + $0x3a0] sm:$0xff] %v560_v52  ;;  %v566_v55 = vld [vmem:[%s6008_s30 + $0x6b8] sm:$0xff]  ;;  %563 = vst [vmem:[%s6013_s11 + $0x3a8] sm:$0xff] %v562_v53 }
  0x59   : > { %565 = vst [vmem:[%s6013_s11 + $0x3b0] sm:$0xff] %v564_v54  ;;  %567 = vst [vmem:[%s6013_s11 + $0x3b8] sm:$0xff] %v566_v55 }
  0x5a PF: > { %p4530_p10 = scmp.ge.s32.totalorder %s5884_s16, 1  ;;  %p572_p11 = scmp.lt.s32.totalorder %s5884_s16, 3 }
  0x5c   : > { %p573_p12 = pnand %p4530_p10, %p572_p11 }
  0x5d   : > { %s6255_s12 = sand.u32 (!%p573_p12), 1, %s5876_s14   ;;  %v5886_v56 = vmov (!%p573_p12), 0.0   ;;  %v738_v57 = vld [vmem:[%s8641_s2] sm:$0xff] (!%p573_p12)  ;;  %v5887_v58 = vmov (!%p573_p12), 0   ;;  %vm748_vm0 = vcmask (!%p573_p12), 1043456   ;;  %vm744_vm1 = vcmask (!%p573_p12), 293888  }
  0x5e   : > { %576 = sbr.rel (%p573_p12) target bundleno = 1612 (0x64c), region = 79  ;;  %885 = vmatprep.mubr.f32.mxu0 (!%p573_p12), %v5886_v56  ;;  %956 = vmatprep.mubr.f32.mxu1 (!%p573_p12), %v5886_v56  ;;  %v6291_v26 = vld [vmem:[%s8640_s1] sm:$0xff] (!%p573_p12)  ;;  %s5888_s28 = smov (!%p573_p12), 94   ;;  %vm1769_vm2 = vcmask (!%p573_p12), 1039360   ;;  %vm1864_vm3 = vcmask (!%p573_p12), 1031168   ;;  %vm1959_vm4 = vcmask (!%p573_p12), 916480  }
  0x5f   : > { %s5363_s18 = smul.u32 (!%p573_p12), 960, %s6255_s12  ;;  %5415 = vset.pattern.permute.xlu0 (!%p573_p12), %v5887_v58  ;;  %s5889_s29 = smov (!%p573_p12), 127   ;;  %vm2054_vm5 = vcmask (!%p573_p12), 908288   ;;  %vm2149_vm6 = vcmask (!%p573_p12), 900096   ;;  %vm2244_vm7 = vcmask (!%p573_p12), 785408   ;;  %vm2339_vm8 = vcmask (!%p573_p12), 777216  }
  0x60   : > { %741 = vperm.xlu0 (!%p573_p12), %5415, %v738_v57   ;;  %s5890_s30 = smov (!%p573_p12), 112   ;;  %s5891_s11 = smov (!%p573_p12), 126   ;;  %vm2434_vm9 = vcmask (!%p573_p12), 769024   ;;  %vm2488_vm10 = vcmask (!%p573_p12), 588800   ;;  %vm5897_vm11 = vmmov (!%p573_p12), 0   ;;  %vm4278_vm12 = vcmask (!%p573_p12), 523264  }
  0x61   : > { %s6263_s25 = scalar_lea.vmem (!%p573_p12), [#allocation2], %s5363_s18  ;;  %s5892_s18 = smov (!%p573_p12), 110   ;;  %vm4445_vm13 = vcmask (!%p573_p12), 80896  }
  0x62   : > { %v619_v59 = vld [vmem:[%s6263_s25 + $0x8] sm:$0xff] (!%p573_p12)  ;;  %v621_v61 = vld [vmem:[%s6263_s25 + $0x18] sm:$0xff] (!%p573_p12)  ;;  %v618_v0 = vld [vmem:[%s6263_s25] sm:$0xff] (!%p573_p12)  ;;  %s5893_s20 = smov (!%p573_p12), 111   ;;  %s5894_s21 = smov (!%p573_p12), 95  }
  0x63   : > { %v643_v60 = vld [vmem:[%s6263_s25 + $0xc8] sm:$0xff] (!%p573_p12)  ;;  %v645_v63 = vld [vmem:[%s6263_s25 + $0xd8] sm:$0xff] (!%p573_p12)  ;;  %v642_v1 = vld [vmem:[%s6263_s25 + $0xc0] sm:$0xff] (!%p573_p12)  ;;  %s4531_s26 = sshll.u32 (!%p573_p12), %s6255_s12, 3  ;;  %s8655_s17 = sadd.s32 (!%p573_p12), 4294967295, %s5884_s16  }
  0x64   : > { %v4754_v62 = vpack.c.bf16 (!%p573_p12), %v643_v60, %v619_v59  ;;  %v4762_v2 = vpack.c.bf16 (!%p573_p12), %v645_v63, %v621_v61  ;;  %v4756_v3 = vpack.c.bf16 (!%p573_p12), %v642_v1, %v618_v0  ;;  %v620_v4 = vld [vmem:[%s6263_s25 + $0x10] sm:$0xff] (!%p573_p12)  ;;  %v667_v6 = vld [vmem:[%s6263_s25 + $0x188] sm:$0xff] (!%p573_p12)  ;;  %v669_v9 = vld [vmem:[%s6263_s25 + $0x198] sm:$0xff] (!%p573_p12) }
  0x65   : > { %v644_v5 = vld [vmem:[%s6263_s25 + $0xd0] sm:$0xff]  ;;  %v691_v8 = vld [vmem:[%s6263_s25 + $0x248] sm:$0xff]  ;;  %v693_v10 = vld [vmem:[%s6263_s25 + $0x258] sm:$0xff] }
  0x66   : > { %4755 = vmatprep.subr.bf16.mxu0 %v4754_v62  ;;  %v4764_v7 = vpack.c.bf16 %v644_v5, %v620_v4  ;;  %4763 = vmatprep.subr.bf16.mxu1 %v4762_v2  ;;  %v4758_v11 = vpack.c.bf16 %v691_v8, %v667_v6  ;;  %v4766_v12 = vpack.c.bf16 %v693_v10, %v669_v9  ;;  %v666_v13 = vld [vmem:[%s6263_s25 + $0x180] sm:$0xff]  ;;  %v668_v15 = vld [vmem:[%s6263_s25 + $0x190] sm:$0xff]  ;;  %v715_v19 = vld [vmem:[%s6263_s25 + $0x308] sm:$0xf] }
  0x67   : > { %4757 = vmatpush1.bf16.msra.mxu0 %v4756_v3  ;;  %v690_v14 = vld [vmem:[%s6263_s25 + $0x240] sm:$0xff]  ;;  %v692_v17 = vld [vmem:[%s6263_s25 + $0x250] sm:$0xff]  ;;  %v717_v20 = vld [vmem:[%s6263_s25 + $0x318] sm:$0xf] }
  0x68   : > { %4765 = vmatpush1.bf16.msra.mxu1 %v4764_v7  ;;  %v4760_v16 = vpack.c.bf16 %v690_v14, %v666_v13  ;;  %4759 = vmatprep.subr.bf16.mxu0 %v4758_v11  ;;  %v4768_v18 = vpack.c.bf16 %v692_v17, %v668_v15  ;;  %v623_v21 = vld [vmem:[%s6263_s25 + $0x28] sm:$0xff]  ;;  %v714_v22 = vld [vmem:[%s6263_s25 + $0x300] sm:$0xf]  ;;  %v625_v24 = vld [vmem:[%s6263_s25 + $0x38] sm:$0xff] }
  0x69   : > { %4767 = vmatprep.subr.bf16.mxu1 %v4766_v12  ;;  %v647_v23 = vld [vmem:[%s6263_s25 + $0xe8] sm:$0xff]  ;;  %v649_v25 = vld [vmem:[%s6263_s25 + $0xf8] sm:$0xff]  ;;  %v622_v27 = vld [vmem:[%s6263_s25 + $0x20] sm:$0xff] }
  0x6a   : > { %v646_v28 = vld [vmem:[%s6263_s25 + $0xe0] sm:$0xff]  ;;  %v624_v29 = vld [vmem:[%s6263_s25 + $0x30] sm:$0xff]  ;;  %v671_v31 = vld [vmem:[%s6263_s25 + $0x1a8] sm:$0xff]  ;;  %v4770_v34 = vpack.c.bf16 %v647_v23, %v623_v21  ;;  %v4778_v37 = vpack.c.bf16 %v649_v25, %v625_v24 }
  0x6b   : > { %4761 = vmatpush1.bf16.msra.mxu0 %v4760_v16  ;;  %v648_v30 = vld [vmem:[%s6263_s25 + $0xf0] sm:$0xff]  ;;  %v695_v32 = vld [vmem:[%s6263_s25 + $0x268] sm:$0xff]  ;;  %v673_v35 = vld [vmem:[%s6263_s25 + $0x1b8] sm:$0xff]  ;;  %v4772_v38 = vpack.c.bf16 %v646_v28, %v622_v27 }
  0x6c   : > { %4769 = vmatpush1.bf16.msra.mxu1 %v4768_v18  ;;  %4532 = vmatprep.subr.msk.mxu0 %vm748_vm0, %v715_v19  ;;  %v716_v33 = vld [vmem:[%s6263_s25 + $0x310] sm:$0xf]  ;;  %v697_v36 = vld [vmem:[%s6263_s25 + $0x278] sm:$0xff]  ;;  %v4780_v39 = vpack.c.bf16 %v648_v30, %v624_v29  ;;  %v4774_v40 = vpack.c.bf16 %v695_v32, %v671_v31  ;;  %v670_v41 = vld [vmem:[%s6263_s25 + $0x1a0] sm:$0xff] }
  0x6d   : > { %4535 = vmatprep.subr.msk.mxu1 %vm748_vm0, %v717_v20  ;;  %v694_v42 = vld [vmem:[%s6263_s25 + $0x260] sm:$0xff]  ;;  %v4782_v43 = vpack.c.bf16 %v697_v36, %v673_v35  ;;  %v672_v44 = vld [vmem:[%s6263_s25 + $0x1b0] sm:$0xff]  ;;  %v719_v48 = vld [vmem:[%s6263_s25 + $0x328] sm:$0xf] }
  0x6e   : > { %v696_v45 = vld [vmem:[%s6263_s25 + $0x270] sm:$0xff]  ;;  %v4776_v46 = vpack.c.bf16 %v694_v42, %v670_v41  ;;  %v721_v49 = vld [vmem:[%s6263_s25 + $0x338] sm:$0xf]  ;;  %v627_v50 = vld [vmem:[%s6263_s25 + $0x48] sm:$0xff] }
  0x6f   : > { %4533 = vmatpush1.msk.msra.mxu0 %vm748_vm0, %v714_v22  ;;  %v4784_v47 = vpack.c.bf16 %v696_v45, %v672_v44  ;;  %v718_v51 = vld [vmem:[%s6263_s25 + $0x320] sm:$0xf]  ;;  %v651_v52 = vld [vmem:[%s6263_s25 + $0x108] sm:$0xff]  ;;  %v629_v53 = vld [vmem:[%s6263_s25 + $0x58] sm:$0xff] }
  0x70   : > { %4536 = vmatpush1.msk.msra.mxu1 %vm748_vm0, %v716_v33  ;;  %4534 = vmatmul.mubr.msk.f32.vlgmr.msra.gmra.mrb[0].mxu0 %vm744_vm1, %v6291_v26  ;;  %v653_v54 = vld [vmem:[%s6263_s25 + $0x118] sm:$0xff]  ;;  %v626_v55 = vld [vmem:[%s6263_s25 + $0x40] sm:$0xff]  ;;  %v628_v58 = vld [vmem:[%s6263_s25 + $0x50] sm:$0xff]  ;;  %v4786_v63 = vpack.c.bf16 %v651_v52, %v627_v50 }
  0x71   : > { %4537 = vmatmul.mubr.msk.f32.vlgmr.msra.gmra.mrb[0].mxu1 %vm744_vm1, %v6291_v26  ;;  %4771 = vmatprep.subr.bf16.mxu0 %v4770_v34  ;;  %v650_v57 = vld [vmem:[%s6263_s25 + $0x100] sm:$0xff]  ;;  %v652_v59 = vld [vmem:[%s6263_s25 + $0x110] sm:$0xff]  ;;  %v675_v60 = vld [vmem:[%s6263_s25 + $0x1c8] sm:$0xff]  ;;  %v4794_v2 = vpack.c.bf16 %v653_v54, %v629_v53 }
  0x72   : > { %4779 = vmatprep.subr.bf16.mxu1 %v4778_v37  ;;  %4773 = vmatpush1.bf16.msra.mxu0 %v4772_v38  ;;  %v699_v61 = vld [vmem:[%s6263_s25 + $0x288] sm:$0xff]  ;;  %v720_v62 = vld [vmem:[%s6263_s25 + $0x330] sm:$0xf]  ;;  %v677_v0 = vld [vmem:[%s6263_s25 + $0x1d8] sm:$0xff]  ;;  %v4788_v3 = vpack.c.bf16 %v650_v57, %v626_v55  ;;  %v4796_v4 = vpack.c.bf16 %v652_v59, %v628_v58 }
  0x73   : > { %4781 = vmatpush1.bf16.msra.mxu1 %v4780_v39  ;;  %4775 = vmatprep.subr.bf16.mxu0 %v4774_v40  ;;  %v701_v1 = vld [vmem:[%s6263_s25 + $0x298] sm:$0xff]  ;;  %v4790_v5 = vpack.c.bf16 %v699_v61, %v675_v60  ;;  %v674_v6 = vld [vmem:[%s6263_s25 + $0x1c0] sm:$0xff]  ;;  %v676_v9 = vld [vmem:[%s6263_s25 + $0x1d0] sm:$0xff] }
  0x74   : > { %4783 = vmatprep.subr.bf16.mxu1 %v4782_v43  ;;  %1027 = vmatprep.mubr.f32.mxu0 %v5886_v56  ;;  %v698_v7 = vld [vmem:[%s6263_s25 + $0x280] sm:$0xff]  ;;  %v4798_v8 = vpack.c.bf16 %v701_v1, %v677_v0  ;;  %v700_v10 = vld [vmem:[%s6263_s25 + $0x290] sm:$0xff]  ;;  %v723_v13 = vld [vmem:[%s6263_s25 + $0x348] sm:$0xf] }
  0x75   : > { %1098 = vmatprep.mubr.f32.mxu1 %v5886_v56  ;;  %v4792_v11 = vpack.c.bf16 %v698_v7, %v674_v6  ;;  %v4800_v12 = vpack.c.bf16 %v700_v10, %v676_v9  ;;  %v725_v14 = vld [vmem:[%s6263_s25 + $0x358] sm:$0xf]  ;;  %v631_v15 = vld [vmem:[%s6263_s25 + $0x68] sm:$0xff]  ;;  %v722_v16 = vld [vmem:[%s6263_s25 + $0x340] sm:$0xf] }
  0x76   : > { %4777 = vmatpush1.bf16.msra.mxu0 %v4776_v46  ;;  %v655_v17 = vld [vmem:[%s6263_s25 + $0x128] sm:$0xff]  ;;  %v633_v18 = vld [vmem:[%s6263_s25 + $0x78] sm:$0xff]  ;;  %v630_v20 = vld [vmem:[%s6263_s25 + $0x60] sm:$0xff] }
  0x77   : > { %4785 = vmatpush1.bf16.msra.mxu1 %v4784_v47  ;;  %4538 = vmatprep.subr.msk.mxu0 %vm748_vm0, %v719_v48  ;;  %v657_v19 = vld [vmem:[%s6263_s25 + $0x138] sm:$0xff]  ;;  %v654_v21 = vld [vmem:[%s6263_s25 + $0x120] sm:$0xff]  ;;  %v632_v22 = vld [vmem:[%s6263_s25 + $0x70] sm:$0xff]  ;;  %v4802_v28 = vpack.c.bf16 %v655_v17, %v631_v15 }
  0x78   : > { %4541 = vmatprep.subr.msk.mxu1 %vm748_vm0, %v721_v49  ;;  %v656_v23 = vld [vmem:[%s6263_s25 + $0x130] sm:$0xff]  ;;  %v679_v24 = vld [vmem:[%s6263_s25 + $0x1e8] sm:$0xff]  ;;  %v681_v29 = vld [vmem:[%s6263_s25 + $0x1f8] sm:$0xff]  ;;  %v4810_v31 = vpack.c.bf16 %v657_v19, %v633_v18  ;;  %v4804_v32 = vpack.c.bf16 %v654_v21, %v630_v20 }
  0x79   : > { %v703_v25 = vld [vmem:[%s6263_s25 + $0x2a8] sm:$0xff]  ;;  %v724_v27 = vld [vmem:[%s6263_s25 + $0x350] sm:$0xf]  ;;  %v705_v30 = vld [vmem:[%s6263_s25 + $0x2b8] sm:$0xff]  ;;  %v4812_v33 = vpack.c.bf16 %v656_v23, %v632_v22 }
  0x7a   : > { %4539 = vmatpush1.msk.msra.mxu0 %vm748_vm0, %v718_v51  ;;  %v4806_v34 = vpack.c.bf16 %v703_v25, %v679_v24  ;;  %v678_v35 = vld [vmem:[%s6263_s25 + $0x1e0] sm:$0xff]  ;;  %v4814_v37 = vpack.c.bf16 %v705_v30, %v681_v29  ;;  %v680_v38 = vld [vmem:[%s6263_s25 + $0x1f0] sm:$0xff]  ;;  %v727_v42 = vld [vmem:[%s6263_s25 + $0x368] sm:$0xf] }
  0x7b   : > { %4542 = vmatpush1.msk.msra.mxu1 %vm748_vm0, %v720_v62  ;;  %4540 = vmatmul.mubr.msk.f32.vlgmr.msra.gmra.mrb[2].mxu0 %vm744_vm1, %v6291_v26  ;;  %v702_v36 = vld [vmem:[%s6263_s25 + $0x2a0] sm:$0xff]  ;;  %v704_v39 = vld [vmem:[%s6263_s25 + $0x2b0] sm:$0xff]  ;;  %v729_v43 = vld [vmem:[%s6263_s25 + $0x378] sm:$0xf] }
  0x7c   : > { %4543 = vmatmul.mubr.msk.f32.vlgmr.msra.gmra.mrb[2].mxu1 %vm744_vm1, %v6291_v26  ;;  %4787 = vmatprep.subr.bf16.mxu0 %v4786_v63  ;;  %v4808_v40 = vpack.c.bf16 %v702_v36, %v678_v35  ;;  %v4816_v41 = vpack.c.bf16 %v704_v39, %v680_v38  ;;  %v635_v44 = vld [vmem:[%s6263_s25 + $0x88] sm:$0xff]  ;;  %v726_v45 = vld [vmem:[%s6263_s25 + $0x360] sm:$0xf]  ;;  %v637_v47 = vld [vmem:[%s6263_s25 + $0x98] sm:$0xff] }
  0x7d   : > { %4795 = vmatprep.subr.bf16.mxu1 %v4794_v2  ;;  %4789 = vmatpush1.bf16.msra.mxu0 %v4788_v3  ;;  %v659_v46 = vld [vmem:[%s6263_s25 + $0x148] sm:$0xff]  ;;  %v661_v48 = vld [vmem:[%s6263_s25 + $0x158] sm:$0xff]  ;;  %v634_v49 = vld [vmem:[%s6263_s25 + $0x80] sm:$0xff] }
  0x7e   : > { %4797 = vmatpush1.bf16.msra.mxu1 %v4796_v4  ;;  %4791 = vmatprep.subr.bf16.mxu0 %v4790_v5  ;;  %v658_v50 = vld [vmem:[%s6263_s25 + $0x140] sm:$0xff]  ;;  %v636_v51 = vld [vmem:[%s6263_s25 + $0x90] sm:$0xff]  ;;  %v683_v53 = vld [vmem:[%s6263_s25 + $0x208] sm:$0xff]  ;;  %v4818_v57 = vpack.c.bf16 %v659_v46, %v635_v44  ;;  %v4826_v60 = vpack.c.bf16 %v661_v48, %v637_v47 }
  0x7f   : > { %4799 = vmatprep.subr.bf16.mxu1 %v4798_v8  ;;  %1169 = vmatprep.mubr.f32.mxu0 %v5886_v56  ;;  %v660_v52 = vld [vmem:[%s6263_s25 + $0x150] sm:$0xff]  ;;  %v707_v54 = vld [vmem:[%s6263_s25 + $0x2c8] sm:$0xff]  ;;  %v685_v58 = vld [vmem:[%s6263_s25 + $0x218] sm:$0xff]  ;;  %v4820_v61 = vpack.c.bf16 %v658_v50, %v634_v49 }
  0x80   : > { %1240 = vmatprep.mubr.f32.mxu1 %v5886_v56  ;;  %v728_v55 = vld [vmem:[%s6263_s25 + $0x370] sm:$0xf]  ;;  %v709_v59 = vld [vmem:[%s6263_s25 + $0x2d8] sm:$0xff]  ;;  %v4828_v62 = vpack.c.bf16 %v660_v52, %v636_v51  ;;  %v4822_v63 = vpack.c.bf16 %v707_v54, %v683_v53  ;;  %v682_v0 = vld [vmem:[%s6263_s25 + $0x200] sm:$0xff] }
  0x81   : > { %4793 = vmatpush1.bf16.msra.mxu0 %v4792_v11  ;;  %v706_v1 = vld [vmem:[%s6263_s25 + $0x2c0] sm:$0xff]  ;;  %v4830_v2 = vpack.c.bf16 %v709_v59, %v685_v58  ;;  %v684_v3 = vld [vmem:[%s6263_s25 + $0x210] sm:$0xff]  ;;  %v731_v7 = vld [vmem:[%s6263_s25 + $0x388] sm:$0xf] }
  0x82   : > { %4801 = vmatpush1.bf16.msra.mxu1 %v4800_v12  ;;  %4544 = vmatprep.subr.msk.mxu0 %vm748_vm0, %v723_v13  ;;  %v708_v4 = vld [vmem:[%s6263_s25 + $0x2d0] sm:$0xff]  ;;  %v4824_v5 = vpack.c.bf16 %v706_v1, %v682_v0  ;;  %v733_v8 = vld [vmem:[%s6263_s25 + $0x398] sm:$0xf]  ;;  %v639_v9 = vld [vmem:[%s6263_s25 + $0xa8] sm:$0xff] }
  0x83   : > { %4547 = vmatprep.subr.msk.mxu1 %vm748_vm0, %v725_v14  ;;  %v4832_v6 = vpack.c.bf16 %v708_v4, %v684_v3  ;;  %v730_v10 = vld [vmem:[%s6263_s25 + $0x380] sm:$0xf]  ;;  %v663_v11 = vld [vmem:[%s6263_s25 + $0x168] sm:$0xff]  ;;  %v641_v12 = vld [vmem:[%s6263_s25 + $0xb8] sm:$0xff] }
  0x84   : > { %v665_v13 = vld [vmem:[%s6263_s25 + $0x178] sm:$0xff]  ;;  %v638_v14 = vld [vmem:[%s6263_s25 + $0xa0] sm:$0xff]  ;;  %v664_v17 = vld [vmem:[%s6263_s25 + $0x170] sm:$0xff]  ;;  %v4834_v21 = vpack.c.bf16 %v663_v11, %v639_v9 }
  0x85   : > { %4545 = vmatpush1.msk.msra.mxu0 %vm748_vm0, %v722_v16  ;;  %v662_v15 = vld [vmem:[%s6263_s25 + $0x160] sm:$0xff]  ;;  %v640_v16 = vld [vmem:[%s6263_s25 + $0xb0] sm:$0xff]  ;;  %v687_v18 = vld [vmem:[%s6263_s25 + $0x228] sm:$0xff]  ;;  %v4842_v24 = vpack.c.bf16 %v665_v13, %v641_v12 }
  0x86   : > { %4548 = vmatpush1.msk.msra.mxu1 %vm748_vm0, %v724_v27  ;;  %4546 = vmatmul.mubr.msk.f32.vlgmr.msra.gmra.mrb[4].mxu0 %vm744_vm1, %v6291_v26  ;;  %v711_v19 = vld [vmem:[%s6263_s25 + $0x2e8] sm:$0xff]  ;;  %v732_v20 = vld [vmem:[%s6263_s25 + $0x390] sm:$0xf]  ;;  %v689_v22 = vld [vmem:[%s6263_s25 + $0x238] sm:$0xff]  ;;  %v4836_v25 = vpack.c.bf16 %v662_v15, %v638_v14  ;;  %v4844_v27 = vpack.c.bf16 %v664_v17, %v640_v16 }
  0x87   : > { %4549 = vmatmul.mubr.msk.f32.vlgmr.msra.gmra.mrb[4].mxu1 %vm744_vm1, %v6291_v26  ;;  %4803 = vmatprep.subr.bf16.mxu0 %v4802_v28  ;;  %v713_v23 = vld [vmem:[%s6263_s25 + $0x2f8] sm:$0xff]  ;;  %v4838_v28 = vpack.c.bf16 %v711_v19, %v687_v18  ;;  %v686_v29 = vld [vmem:[%s6263_s25 + $0x220] sm:$0xff]  ;;  %v735_v36 = vld [vmem:[%s6263_s25 + $0x3a8] sm:$0xf] }
  0x88   : > { %4811 = vmatprep.subr.bf16.mxu1 %v4810_v31  ;;  %4805 = vmatpush1.bf16.msra.mxu0 %v4804_v32  ;;  %v710_v30 = vld [vmem:[%s6263_s25 + $0x2e0] sm:$0xff]  ;;  %v4846_v31 = vpack.c.bf16 %v713_v23, %v689_v22  ;;  %v688_v32 = vld [vmem:[%s6263_s25 + $0x230] sm:$0xff] }
  0x89   : > { %4813 = vmatpush1.bf16.msra.mxu1 %v4812_v33  ;;  %4807 = vmatprep.subr.bf16.mxu0 %v4806_v34  ;;  %v712_v33 = vld [vmem:[%s6263_s25 + $0x2f0] sm:$0xff]  ;;  %v4840_v34 = vpack.c.bf16 %v710_v30, %v686_v29  ;;  %v734_v38 = vld [vmem:[%s6263_s25 + $0x3a0] sm:$0xf] }
  0x8a   : > { %4815 = vmatprep.subr.bf16.mxu1 %v4814_v37  ;;  %1311 = vmatprep.mubr.f32.mxu0 %v5886_v56  ;;  %v4848_v35 = vpack.c.bf16 %v712_v33, %v688_v32  ;;  %v737_v37 = vld [vmem:[%s6263_s25 + $0x3b8] sm:$0xf]  ;;  %v736_v39 = vld [vmem:[%s6263_s25 + $0x3b0] sm:$0xf]  ;;  %s5895_s25 = smov 96  }
  0x8b   : > { %1382 = vmatprep.mubr.f32.mxu1 %v5886_v56 }
  0x8c   : > { %4809 = vmatpush1.bf16.msra.mxu0 %v4808_v40 }
  0x8d   : > { %4817 = vmatpush1.bf16.msra.mxu1 %v4816_v41  ;;  %4550 = vmatprep.subr.msk.mxu0 %vm748_vm0, %v727_v42 }
  0x8e   : > { %4553 = vmatprep.subr.msk.mxu1 %vm748_vm0, %v729_v43 }
  0x90   : > { %4551 = vmatpush1.msk.msra.mxu0 %vm748_vm0, %v726_v45 }
  0x91   : > { %4554 = vmatpush1.msk.msra.mxu1 %vm748_vm0, %v728_v55  ;;  %4552 = vmatmul.mubr.msk.f32.vlgmr.msra.gmra.mrb[6].mxu0 %vm744_vm1, %v6291_v26 }
  0x92   : > { %4555 = vmatmul.mubr.msk.f32.vlgmr.msra.gmra.mrb[6].mxu1 %vm744_vm1, %v6291_v26  ;;  %4819 = vmatprep.subr.bf16.mxu0 %v4818_v57 }
  0x93   : > { %4827 = vmatprep.subr.bf16.mxu1 %v4826_v60  ;;  %4821 = vmatpush1.bf16.msra.mxu0 %v4820_v61 }
  0x94   : > { %4829 = vmatpush1.bf16.msra.mxu1 %v4828_v62  ;;  %4823 = vmatprep.subr.bf16.mxu0 %v4822_v63 }
  0x95   : > { %4831 = vmatprep.subr.bf16.mxu1 %v4830_v2  ;;  %1453 = vmatprep.mubr.f32.mxu0 %v5886_v56 }
  0x96   : > { %1524 = vmatprep.mubr.f32.mxu1 %v5886_v56 }
  0x97   : > { %4825 = vmatpush1.bf16.msra.mxu0 %v4824_v5 }
  0x98   : > { %4833 = vmatpush1.bf16.msra.mxu1 %v4832_v6  ;;  %4556 = vmatprep.subr.msk.mxu0 %vm748_vm0, %v731_v7 }
  0x99   : > { %4559 = vmatprep.subr.msk.mxu1 %vm748_vm0, %v733_v8 }
  0x9b   : > { %4557 = vmatpush1.msk.msra.mxu0 %vm748_vm0, %v730_v10 }
  0x9c   : > { %4560 = vmatpush1.msk.msra.mxu1 %vm748_vm0, %v732_v20  ;;  %4558 = vmatmul.mubr.msk.f32.vlgmr.msra.gmra.mrb[8].mxu0 %vm744_vm1, %v6291_v26 }
  0x9d   : > { %4561 = vmatmul.mubr.msk.f32.vlgmr.msra.gmra.mrb[8].mxu1 %vm744_vm1, %v6291_v26  ;;  %4835 = vmatprep.subr.bf16.mxu0 %v4834_v21 }
  0x9e   : > { %4843 = vmatprep.subr.bf16.mxu1 %v4842_v24  ;;  %4837 = vmatpush1.bf16.msra.mxu0 %v4836_v25 }
  0x9f   : > { %4845 = vmatpush1.bf16.msra.mxu1 %v4844_v27  ;;  %4839 = vmatprep.subr.bf16.mxu0 %v4838_v28 }
  0xa0   : > { %4847 = vmatprep.subr.bf16.mxu1 %v4846_v31  ;;  %1595 = vmatprep.mubr.f32.mxu0 %v5886_v56 }
  0xa1   : > { %1666 = vmatprep.mubr.f32.mxu1 %v5886_v56 }
  0xa2   : > { %4841 = vmatpush1.bf16.msra.mxu0 %v4840_v34 }
  0xa3   : > { %4849 = vmatpush1.bf16.msra.mxu1 %v4848_v35  ;;  %4562 = vmatprep.subr.msk.mxu0 %vm748_vm0, %v735_v36 }
  0xa4   : > { %4565 = vmatprep.subr.msk.mxu1 %vm748_vm0, %v737_v37 }
  0xa6   : > { %4563 = vmatpush1.msk.msra.mxu0 %vm748_vm0, %v734_v38 }
  0xa7   : > { %4566 = vmatpush1.msk.msra.mxu1 %vm748_vm0, %v736_v39  ;;  %4564 = vmatmul.mubr.msk.f32.vlgmr.msra.gmra.mrb[10].mxu0 %vm744_vm1, %v6291_v26 }
  0xa8   : > { %4567 = vmatmul.mubr.msk.f32.vlgmr.msra.gmra.mrb[10].mxu1 %vm744_vm1, %v6291_v26  ;;  %2697 = vmatprep.mubr.f32.mxu0 %v5886_v56 }
  0xa9   : > { %2556 = vmatprep.mubr.f32.mxu1 %v5886_v56 }
  0xdf   : > { %v6450_v40 = vpop.permute.xlu0 %741 }
 0x143   : > { %v887_v41 = vpop.f32.mrb[0].mxu0 }
 0x144   : > { %v888_v42 = vadd.f32 %v887_v41, %v6450_v40  ;;  %v958_v43 = vpop.f32.mrb[0].mxu1  ;;  %v889_v44 = vpop.f32.mrb[1].mxu0 }
 0x145   : > { %v959_v45 = vadd.f32 %v958_v43, %v6450_v40  ;;  %v890_v46 = vadd.f32 %v889_v44, %v6450_v40  ;;  %v960_v47 = vpop.f32.mrb[1].mxu1 }
 0x146   : > { %v6455_v48 = vmax.f32 %v888_v42, 0.0  ;;  %v961_v26 = vadd.f32 %v960_v47, %v6450_v40 }
 0x147   : > { %v6458_v49 = vmax.f32 %v959_v45, 0.0  ;;  %v6460_v50 = vmax.f32 %v890_v46, 0.0 }
 0x148   : > { %v6462_v51 = vmax.f32 %v961_v26, 0.0  ;;  %2386 = vrot.lane.b32.xlu0 %v6455_v48, %s5888_s28 }
 0x149   : > { %2390 = vrot.lane.b32.xlu1 %v6458_v49, %s5888_s28  ;;  %v5416_v52 = vpack.i.bf16 %v6458_v49, %v6460_v50 }
 0x14a   : > { %v5421_v53 = vpack.i.bf16 %v6462_v51, %v6455_v48 }
 0x14c   : > { %5417 = vrot.lane.b32.xlu0 %v5416_v52, %s5889_s29 }
 0x14d   : > { %5422 = vrot.lane.b32.xlu1 %v5421_v53, %s5889_s29 }
 0x14e   : > { %v1029_v54 = vpop.f32.mrb[2].mxu0 }
 0x14f   : > { %v1100_v55 = vpop.f32.mrb[2].mxu1  ;;  %v1031_v57 = vpop.f32.mrb[3].mxu0  ;;  %v1030_v63 = vadd.f32 %v1029_v54, %v6450_v40 }
 0x150   : > { %v1102_v58 = vpop.f32.mrb[3].mxu1  ;;  %5432 = vrot.lane.b32.xlu0 %v5416_v52, %s5890_s30  ;;  %v1032_v0 = vadd.f32 %v1031_v57, %v6450_v40  ;;  %v1101_v7 = vadd.f32 %v1100_v55, %v6450_v40 }
 0x151   : > { %5427 = vrot.lane.b32.xlu1 %v5416_v52, %s5891_s11  ;;  %v6490_v5 = vmax.f32 %v1030_v63, 0.0  ;;  %v1103_v14 = vadd.f32 %v1102_v58, %v6450_v40 }
 0x152   : > { %v6492_v6 = vmax.f32 %v1032_v0, 0.0  ;;  %v6504_v9 = vmax.f32 %v1101_v7, 0.0 }
 0x153   : > { %v6520_v15 = vmax.f32 %v1103_v14, 0.0 }
 0x154   : > { %5442 = vrot.lane.b32.xlu0 %v5421_v53, %s5890_s30  ;;  %v5486_v8 = vpack.i.bf16 %v6492_v6, %v6490_v5 }
 0x155   : > { %5437 = vrot.lane.b32.xlu1 %v5421_v53, %s5891_s11  ;;  %v5521_v20 = vpack.i.bf16 %v6520_v15, %v6504_v9 }
 0x158   : > { %5452 = vrot.lane.b32.xlu0 %v5416_v52, %s5892_s18 }
 0x159   : > { %v1171_v59 = vpop.f32.mrb[4].mxu0  ;;  %5447 = vrot.lane.b32.xlu1 %v5416_v52, %s5893_s20 }
 0x15a   : > { %v1242_v60 = vpop.f32.mrb[4].mxu1  ;;  %v1173_v61 = vpop.f32.mrb[5].mxu0  ;;  %v1172_v16 = vadd.f32 %v1171_v59, %v6450_v40 }
 0x15b   : > { %v1244_v62 = vpop.f32.mrb[5].mxu1  ;;  %v1243_v23 = vadd.f32 %v1242_v60, %v6450_v40  ;;  %v1174_v24 = vadd.f32 %v1173_v61, %v6450_v40 }
 0x15c   : > { %5462 = vrot.lane.b32.xlu0 %v5421_v53, %s5892_s18  ;;  %v6537_v22 = vmax.f32 %v1172_v16, 0.0  ;;  %v1245_v29 = vadd.f32 %v1244_v62, %v6450_v40 }
 0x15d   : > { %5457 = vrot.lane.b32.xlu1 %v5421_v53, %s5893_s20  ;;  %v6544_v25 = vmax.f32 %v1243_v23, 0.0  ;;  %v6546_v27 = vmax.f32 %v1174_v24, 0.0 }
 0x15e   : > { %v6565_v30 = vmax.f32 %v1245_v29, 0.0 }
 0x15f   : > { %v5556_v28 = vpack.i.bf16 %v6546_v27, %v6537_v22 }
 0x160   : > { %5472 = vrot.lane.b32.xlu0 %v5416_v52, %s5894_s21  ;;  %v5591_v32 = vpack.i.bf16 %v6565_v30, %v6544_v25 }
 0x161   : > { %5467 = vrot.lane.b32.xlu1 %v5416_v52, %s5895_s25 }
 0x164   : > { %v1313_v1 = vpop.f32.mrb[6].mxu0  ;;  %5482 = vrot.lane.b32.xlu0 %v5421_v53, %s5894_s21 }
 0x165   : > { %v1384_v2 = vpop.f32.mrb[6].mxu1  ;;  %v1315_v3 = vpop.f32.mrb[7].mxu0  ;;  %5477 = vrot.lane.b32.xlu1 %v5421_v53, %s5895_s25  ;;  %v1314_v31 = vadd.f32 %v1313_v1, %v6450_v40 }
 0x166   : > { %v6488_v4 = vpop.f32.mrb[7].mxu1  ;;  %v1385_v34 = vadd.f32 %v1384_v2, %v6450_v40  ;;  %v1316_v35 = vadd.f32 %v1315_v3, %v6450_v40 }
 0x167   : > { %v6575_v33 = vmax.f32 %v1314_v31, 0.0  ;;  %v1387_v41 = vadd.f32 %v6488_v4, %v6450_v40 }
 0x168   : > { %2388 = vrot.lane.b32.xlu0 %v6460_v50, %s5888_s28  ;;  %v6582_v36 = vmax.f32 %v1385_v34, 0.0  ;;  %v6584_v37 = vmax.f32 %v1316_v35, 0.0 }
 0x169   : > { %2392 = vrot.lane.b32.xlu1 %v6462_v51, %s5888_s28  ;;  %v6610_v44 = vmax.f32 %v1387_v41, 0.0 }
 0x16a   : > { %v5626_v38 = vpack.i.bf16 %v6584_v37, %v6575_v33 }
 0x16b   : > { %v6637_v62 = vpack.i.bf16 %v6610_v44, %v6582_v36 }
 0x16c   : > { %2394 = vrot.lane.b32.xlu0 %v6490_v5, %s5888_s28 }
 0x16d   : > { %5487 = vrot.lane.b32.xlu1 %v5486_v8, %s5889_s29 }
 0x16f   : > { %v6506_v10 = vpop.f32.mrb[8].mxu0 }
 0x170   : > { %v6508_v11 = vpop.f32.mrb[8].mxu1  ;;  %v6510_v12 = vpop.f32.mrb[9].mxu0  ;;  %2398 = vrot.lane.b32.xlu0 %v6504_v9, %s5888_s28  ;;  %v1456_v53 = vadd.f32 %v6506_v10, %v6450_v40 }
 0x171   : > { %v6514_v13 = vpop.f32.mrb[9].mxu1  ;;  %5492 = vrot.lane.b32.xlu1 %v5486_v8, %s5891_s11  ;;  %v1458_v54 = vadd.f32 %v6510_v12, %v6450_v40 }
 0x172   : > { %v6648_v2 = vmax.f32 %v1456_v53, 0.0 }
 0x173   : > { %v6650_v3 = vmax.f32 %v1458_v54, 0.0 }
 0x174   : > { %5497 = vrot.lane.b32.xlu0 %v5486_v8, %s5890_s30 }
 0x175   : > { %5502 = vrot.lane.b32.xlu1 %v5486_v8, %s5893_s20  ;;  %v6671_v23 = vpack.i.bf16 %v6650_v3, %v6648_v2 }
 0x178   : > { %5507 = vrot.lane.b32.xlu0 %v5486_v8, %s5892_s18 }
 0x179   : > { %5512 = vrot.lane.b32.xlu1 %v5486_v8, %s5895_s25 }
 0x17a   : > { %v6525_v17 = vpop.f32.mrb[10].mxu0 }
 0x17b   : > { %v6527_v18 = vpop.f32.mrb[10].mxu1  ;;  %v6529_v19 = vpop.f32.mrb[11].mxu0 }
 0x17c   : > { %v6533_v21 = vpop.f32.mrb[11].mxu1  ;;  %5517 = vrot.lane.b32.xlu0 %v5486_v8, %s5894_s21 }
 0x17d   : > { %5522 = vrot.lane.b32.xlu1 %v5521_v20, %s5889_s29 }
 0x180   : > { %2402 = vrot.lane.b32.xlu0 %v6537_v22, %s5888_s28 }
 0x181   : > { %5527 = vrot.lane.b32.xlu1 %v5521_v20, %s5891_s11 }
 0x184   : > { %2406 = vrot.lane.b32.xlu0 %v6544_v25, %s5888_s28 }
 0x185   : > { %5532 = vrot.lane.b32.xlu1 %v5521_v20, %s5890_s30 }
 0x188   : > { %5557 = vrot.lane.b32.xlu0 %v5556_v28, %s5889_s29 }
 0x189   : > { %5537 = vrot.lane.b32.xlu1 %v5521_v20, %s5893_s20 }
 0x18c   : > { %5562 = vrot.lane.b32.xlu0 %v5556_v28, %s5891_s11 }
 0x18d   : > { %5542 = vrot.lane.b32.xlu1 %v5521_v20, %s5892_s18 }
 0x190   : > { %5567 = vrot.lane.b32.xlu0 %v5556_v28, %s5890_s30 }
 0x191   : > { %5547 = vrot.lane.b32.xlu1 %v5521_v20, %s5895_s25 }
 0x194   : > { %5572 = vrot.lane.b32.xlu0 %v5556_v28, %s5893_s20 }
 0x195   : > { %5552 = vrot.lane.b32.xlu1 %v5521_v20, %s5894_s21 }
 0x198   : > { %5577 = vrot.lane.b32.xlu0 %v5556_v28, %s5892_s18 }
 0x199   : > { %2396 = vrot.lane.b32.xlu1 %v6492_v6, %s5888_s28 }
 0x19c   : > { %5582 = vrot.lane.b32.xlu0 %v5556_v28, %s5895_s25 }
 0x19d   : > { %2400 = vrot.lane.b32.xlu1 %v6520_v15, %s5888_s28 }
 0x1a0   : > { %5587 = vrot.lane.b32.xlu0 %v5556_v28, %s5894_s21 }
 0x1a1   : > { %5592 = vrot.lane.b32.xlu1 %v5591_v32, %s5889_s29 }
 0x1a4   : > { %2410 = vrot.lane.b32.xlu0 %v6575_v33, %s5888_s28 }
 0x1a5   : > { %5597 = vrot.lane.b32.xlu1 %v5591_v32, %s5891_s11 }
 0x1a8   : > { %2414 = vrot.lane.b32.xlu0 %v6582_v36, %s5888_s28 }
 0x1a9   : > { %5602 = vrot.lane.b32.xlu1 %v5591_v32, %s5890_s30 }
 0x1ac   : > { %5627 = vrot.lane.b32.xlu0 %v5626_v38, %s5889_s29 }
 0x1ad   : > { %5607 = vrot.lane.b32.xlu1 %v5591_v32, %s5893_s20 }
 0x1b0   : > { %5632 = vrot.lane.b32.xlu0 %v5626_v38, %s5891_s11 }
 0x1b1   : > { %5612 = vrot.lane.b32.xlu1 %v5591_v32, %s5892_s18 }
 0x1b4   : > { %5637 = vrot.lane.b32.xlu0 %v5626_v38, %s5890_s30 }
 0x1b5   : > { %5617 = vrot.lane.b32.xlu1 %v5591_v32, %s5895_s25 }
 0x1b8   : > { %5642 = vrot.lane.b32.xlu0 %v5626_v38, %s5893_s20 }
 0x1b9   : > { %5622 = vrot.lane.b32.xlu1 %v5591_v32, %s5894_s21 }
 0x1ba   : > { %v6599_v39 = vpop.permute.xlu0 %2386 }
 0x1bb   : > { %v6603_v42 = vpop.permute.xlu1 %2390 }
 0x1bc   : > { %5647 = vrot.lane.b32.xlu0 %v5626_v38, %s5892_s18 }
 0x1bd   : > { %2404 = vrot.lane.b32.xlu1 %v6546_v27, %s5888_s28 }
 0x1be   : > { %v6608_v43 = vpop.permute.xlu0 %5417 }
 0x1bf   : > { %v6612_v45 = vpop.permute.xlu1 %5422  ;;  %v5420_v46 = vunpack.i.h.bf16 %v6608_v43  ;;  %v5419_v47 = vunpack.i.l.bf16 %v6608_v43  ;;  %v1529_v43 = vadd.f32 %v6514_v13, %v6450_v40 }
 0x1c0   : > { %v5424_v26 = vunpack.i.l.bf16 %v6612_v45  ;;  %5652 = vrot.lane.b32.xlu0 %v5626_v38, %s5895_s25 }
 0x1c1   : > { %2408 = vrot.lane.b32.xlu1 %v6565_v30, %s5888_s28  ;;  %v1771_v52 = vsel %vm1769_vm2, %v5419_v47, %v5420_v46 }
 0x1c2   : > { %v1770_v55 = vsel %vm1769_vm2, %v5424_v26, %v5419_v47  ;;  %v6628_v57 = vpop.permute.xlu0 %5432  ;;  %v4850_v58 = vpack.c.bf16 %v1771_v52, %v6460_v50 }
 0x1c3   : > { %v6631_v59 = vpop.permute.xlu1 %5427  ;;  %v5435_v60 = vunpack.i.h.bf16 %v6628_v57  ;;  %v5434_v61 = vunpack.i.l.bf16 %v6628_v57  ;;  %v4852_v63 = vpack.c.bf16 %v1770_v55, %v6455_v48 }
 0x1c4   : > { %v5430_v0 = vunpack.i.h.bf16 %v6631_v59  ;;  %v5429_v1 = vunpack.i.l.bf16 %v6631_v59  ;;  %5657 = vrot.lane.b32.xlu0 %v5626_v38, %s5894_s21  ;;  %4851 = vmatprep.subr.bf16.mxu1 %v4850_v58 }
 0x1c5   : > { %5662 = vrot.lane.b32.xlu1 %v6637_v62, %s5889_s29  ;;  %4853 = vmatpush1.bf16.msra.mxu1 %v4852_v63  ;;  %v1961_v50 = vsel %vm1959_vm4, %v5434_v61, %v5435_v60 }
 0x1c6   : > { %v6652_v48 = vpop.permute.xlu0 %5442  ;;  %v1866_v4 = vsel %vm1864_vm3, %v5429_v1, %v5430_v0 }
 0x1c7   : > { %v6657_v7 = vpop.permute.xlu1 %5437  ;;  %v5444_v8 = vunpack.i.l.bf16 %v6652_v48  ;;  %v4854_v10 = vpack.c.bf16 %v1961_v50, %v1866_v4 }
 0x1c8   : > { %v5439_v12 = vunpack.i.l.bf16 %v6657_v7  ;;  %2418 = vrot.lane.b32.xlu0 %v6648_v2, %s5888_s28 }
 0x1c9   : > { %v1960_v14 = vsel %vm1959_vm4, %v5444_v8, %v5434_v61  ;;  %5667 = vrot.lane.b32.xlu1 %v6637_v62, %s5891_s11  ;;  %4855 = vmatprep.subr.bf16.mxu1 %v4854_v10 }
 0x1ca   : > { %v1865_v16 = vsel %vm1864_vm3, %v5439_v12, %v5429_v1  ;;  %v6667_v20 = vpop.permute.xlu0 %5452 }
 0x1cb   : > { %v6673_v24 = vpop.permute.xlu1 %5447  ;;  %v5455_v28 = vunpack.i.h.bf16 %v6667_v20  ;;  %v5454_v29 = vunpack.i.l.bf16 %v6667_v20  ;;  %v4856_v31 = vpack.c.bf16 %v1960_v14, %v1865_v16 }
 0x1cc   : > { %v5450_v32 = vunpack.i.h.bf16 %v6673_v24  ;;  %v5449_v34 = vunpack.i.l.bf16 %v6673_v24  ;;  %5697 = vrot.lane.b32.xlu0 %v6671_v23, %s5889_s29 }
 0x1cd   : > { %5672 = vrot.lane.b32.xlu1 %v6637_v62, %s5890_s30  ;;  %4857 = vmatpush1.bf16.msra.mxu1 %v4856_v31  ;;  %v2151_v35 = vsel %vm2149_vm6, %v5454_v29, %v5455_v28 }
 0x1ce   : > { %v6686_v38 = vpop.permute.xlu0 %5462  ;;  %v2056_v41 = vsel %vm2054_vm5, %v5449_v34, %v5450_v32 }
 0x1cf   : > { %v6691_v47 = vpop.permute.xlu1 %5457  ;;  %v5464_v26 = vunpack.i.l.bf16 %v6686_v38  ;;  %v4858_v52 = vpack.c.bf16 %v2151_v35, %v2056_v41 }
 0x1d0   : > { %v5459_v53 = vunpack.i.l.bf16 %v6691_v47  ;;  %5702 = vrot.lane.b32.xlu0 %v6671_v23, %s5891_s11 }
 0x1d1   : > { %v2150_v54 = vsel %vm2149_vm6, %v5464_v26, %v5454_v29  ;;  %5677 = vrot.lane.b32.xlu1 %v6637_v62, %s5893_s20  ;;  %4859 = vmatprep.subr.bf16.mxu1 %v4858_v52 }
 0x1d2   : > { %v2055_v55 = vsel %vm2054_vm5, %v5459_v53, %v5449_v34  ;;  %v6701_v58 = vpop.permute.xlu0 %5472 }
 0x1d3   : > { %v6703_v61 = vpop.permute.xlu1 %5467  ;;  %v5475_v63 = vunpack.i.h.bf16 %v6701_v58  ;;  %v5474_v1 = vunpack.i.l.bf16 %v6701_v58  ;;  %v4860_v50 = vpack.c.bf16 %v2150_v54, %v2055_v55  ;;  %v5425_v55 = vunpack.i.h.bf16 %v6612_v45 }
 0x1d4   : > { %v5470_v4 = vunpack.i.h.bf16 %v6703_v61  ;;  %v5469_v8 = vunpack.i.l.bf16 %v6703_v61  ;;  %5707 = vrot.lane.b32.xlu0 %v6671_v23, %s5890_s30 }
 0x1d5   : > { %5682 = vrot.lane.b32.xlu1 %v6637_v62, %s5892_s18  ;;  %4861 = vmatpush1.bf16.msra.mxu1 %v4860_v50  ;;  %v2341_v10 = vsel %vm2339_vm8, %v5474_v1, %v5475_v63 }
 0x1d6   : > { %v6716_v12 = vpop.permute.xlu0 %5482  ;;  %v2246_v14 = vsel %vm2244_vm7, %v5469_v8, %v5470_v4 }
 0x1d7   : > { %v6721_v16 = vpop.permute.xlu1 %5477  ;;  %v5484_v29 = vunpack.i.l.bf16 %v6716_v12  ;;  %v4862_v31 = vpack.c.bf16 %v2341_v10, %v2246_v14 }
 0x1d8   : > { %v5479_v34 = vunpack.i.l.bf16 %v6721_v16  ;;  %5712 = vrot.lane.b32.xlu0 %v6671_v23, %s5893_s20 }
 0x1d9   : > { %v2340_v35 = vsel %vm2339_vm8, %v5484_v29, %v5474_v1  ;;  %5687 = vrot.lane.b32.xlu1 %v6637_v62, %s5895_s25  ;;  %4863 = vmatprep.subr.bf16.mxu1 %v4862_v31  ;;  %v1527_v29 = vadd.f32 %v6508_v11, %v6450_v40 }
 0x1da   : > { %v2245_v41 = vsel %vm2244_vm7, %v5479_v34, %v5469_v8  ;;  %v2389_v26 = vpop.permute.xlu0 %2388  ;;  %v6747_v8 = vld [vmem:[%s8642_s3] sm:$0xff]  ;;  %v5440_v34 = vunpack.i.h.bf16 %v6657_v7 }
 0x1db   : > { %v4864_v52 = vpack.c.bf16 %v2340_v35, %v2245_v41  ;;  %v6731_v53 = vpop.permute.xlu1 %2392  ;;  %v2436_v54 = vsel %vm2434_vm9, %v2389_v26, %v6603_v42  ;;  %v2435_v10 = vsel %vm2434_vm9, %v6599_v39, %v2389_v26  ;;  %v5445_v35 = vunpack.i.h.bf16 %v6652_v48 }
 0x1dc   : > { %5717 = vrot.lane.b32.xlu0 %v6671_v23, %s5892_s18  ;;  %v6786_v7 = vmax.f32 %v1527_v29, 0.0  ;;  %v6788_v48 = vmax.f32 %v1529_v43, 0.0 }
 0x1dd   : > { %5692 = vrot.lane.b32.xlu1 %v6637_v62, %s5894_s21  ;;  %4865 = vmatpush1.bf16.msra.mxu1 %v4864_v52  ;;  %v1772_v62 = vsel %vm1769_vm2, %v5420_v46, %v5425_v55  ;;  %v1962_v52 = vsel %vm1959_vm4, %v5435_v60, %v5445_v35 }
 0x1de   : > { %2508 = vmatprep.subr.mxu1 %v2436_v54  ;;  %v6740_v1 = vpop.permute.xlu0 %2394  ;;  %v4868_v41 = vpack.c.bf16 %v1772_v62, %v6458_v49  ;;  %v5465_v54 = vunpack.i.h.bf16 %v6686_v38  ;;  %v6821_v62 = vpack.i.bf16 %v6788_v48, %v6786_v7 }
 0x1df   : > { %v6742_v50 = vpop.permute.xlu1 %5487 }
 0x1e0   : > { %v5489_v45 = vunpack.i.l.bf16 %v6742_v50  ;;  %5722 = vrot.lane.b32.xlu0 %v6671_v23, %s5895_s25  ;;  %v2152_v43 = vsel %vm2149_vm6, %v5455_v28, %v5465_v54  ;;  %v1600_v28 = vadd.f32 %v6529_v19, %v6450_v40 }
 0x1e1   : > { %2412 = vrot.lane.b32.xlu1 %v6584_v37, %s5888_s28  ;;  %2509 = vmatpush1.msra.mxu1 %v2435_v10 }
 0x1e2   : > { %4568 = vmatmul.mubr.msk.f32.vlgmr.msra.gmra.mrb[12].mxu1 %vm2488_vm10, %v6747_v8  ;;  %v6761_v14 = vpop.permute.xlu0 %2398  ;;  %v1773_v39 = vsel %vm1769_vm2, %v5425_v55, %v5489_v45 }
 0x1e3   : > { %v6770_v46 = vpop.permute.xlu1 %5492  ;;  %v4866_v31 = vpack.c.bf16 %v1773_v39, %v6462_v51  ;;  %2627 = vmatprep.mubr.f32.mxu1 %v5886_v56  ;;  %v1598_v51 = vadd.f32 %v6525_v17, %v6450_v40  ;;  %v5460_v17 = vunpack.i.h.bf16 %v6691_v47 }
 0x1e4   : > { %5727 = vrot.lane.b32.xlu0 %v6671_v23, %s5894_s21  ;;  %v5494_v11 = vunpack.i.l.bf16 %v6770_v46  ;;  %v1867_v23 = vsel %vm1864_vm3, %v5430_v0, %v5440_v34 }
 0x1e5   : > { %2416 = vrot.lane.b32.xlu1 %v6610_v44, %s5888_s28  ;;  %4867 = vmatprep.subr.bf16.mxu1 %v4866_v31  ;;  %v6812_v60 = vmax.f32 %v1598_v51, 0.0  ;;  %v4872_v39 = vpack.c.bf16 %v1962_v52, %v1867_v23  ;;  %v2057_v29 = vsel %vm2054_vm5, %v5450_v32, %v5460_v17  ;;  %v5480_v31 = vunpack.i.h.bf16 %v6721_v16 }
 0x1e6   : > { %4869 = vmatpush1.bf16.msra.mxu1 %v4868_v41  ;;  %v6784_v13 = vpop.permute.xlu0 %5497  ;;  %v1868_v59 = vsel %vm1864_vm3, %v5440_v34, %v5494_v11  ;;  %v5485_v34 = vunpack.i.h.bf16 %v6716_v12  ;;  %v4876_v23 = vpack.c.bf16 %v2152_v43, %v2057_v29 }
 0x1e7   : > { %v6790_v26 = vpop.permute.xlu1 %5502  ;;  %v5499_v49 = vunpack.i.l.bf16 %v6784_v13  ;;  %v2247_v52 = vsel %vm2244_vm7, %v5470_v4, %v5480_v31  ;;  %v5500_v29 = vunpack.i.h.bf16 %v6784_v13 }
 0x1e8   : > { %2420 = vrot.lane.b32.xlu0 %v6650_v3, %s5888_s28  ;;  %v5504_v55 = vunpack.i.l.bf16 %v6790_v26 }
 0x1e9   : > { %2422 = vrot.lane.b32.xlu1 %v6786_v7, %s5888_s28  ;;  %v1963_v57 = vsel %vm1959_vm4, %v5445_v35, %v5499_v49  ;;  %v5490_v35 = vunpack.i.h.bf16 %v6742_v50 }
 0x1ea   : > { %v6814_v0 = vpop.permute.xlu0 %5507  ;;  %v4870_v38 = vpack.c.bf16 %v1963_v57, %v1868_v59  ;;  %v2058_v20 = vsel %vm2054_vm5, %v5460_v17, %v5504_v55  ;;  %v2342_v17 = vsel %vm2339_vm8, %v5475_v63, %v5485_v34  ;;  %v6867_v63 = vmax.f32 %v1600_v28, 0.0 }
 0x1eb   : > { %v6816_v47 = vpop.permute.xlu1 %5512  ;;  %v5509_v10 = vunpack.i.l.bf16 %v6814_v0  ;;  %v1774_v19 = vsel %vm1769_vm2, %v5489_v45, %v5490_v35  ;;  %v2437_v28 = vsel %vm2434_vm9, %v6603_v42, %v6731_v53 }
 0x1ec   : > { %2141 = vrot.lane.b32.xlu0 %v6812_v60, %s5892_s18  ;;  %4871 = vmatprep.subr.bf16.mxu1 %v4870_v38  ;;  %v5514_v41 = vunpack.i.l.bf16 %v6816_v47  ;;  %v4880_v38 = vpack.c.bf16 %v2342_v17, %v2247_v52 }
 0x1ed   : > { %5732 = vrot.lane.b32.xlu1 %v6821_v62, %s5889_s29  ;;  %4873 = vmatpush1.bf16.msra.mxu1 %v4872_v39  ;;  %v2153_v24 = vsel %vm2149_vm6, %v5465_v54, %v5509_v10  ;;  %v4884_v39 = vpack.c.bf16 %v1774_v19, %v6490_v5  ;;  %v2438_v5 = vsel %vm2434_vm9, %v6731_v53, %v6740_v1 }
 0x1ee   : > { %v6845_v32 = vpop.permute.xlu0 %5517  ;;  %v4874_v12 = vpack.c.bf16 %v2153_v24, %v2058_v20  ;;  %v2248_v61 = vsel %vm2244_vm7, %v5480_v31, %v5514_v41 }
 0x1ef   : > { %v5523_v16 = vpop.permute.xlu1 %5522  ;;  %v5519_v51 = vunpack.i.l.bf16 %v6845_v32 }
 0x1f0   : > { %v5524_v59 = vunpack.i.l.bf16 %v5523_v16  ;;  %2236 = vrot.lane.b32.xlu0 %v6812_v60, %s5895_s25  ;;  %4875 = vmatprep.subr.bf16.mxu1 %v4874_v12  ;;  %v5525_v20 = vunpack.i.h.bf16 %v5523_v16  ;;  %v1964_v12 = vsel %vm1959_vm4, %v5499_v49, %v5500_v29 }
 0x1f1   : > { %5737 = vrot.lane.b32.xlu1 %v6821_v62, %s5891_s11  ;;  %4877 = vmatpush1.bf16.msra.mxu1 %v4876_v23  ;;  %v2343_v58 = vsel %vm2339_vm8, %v5485_v34, %v5519_v51  ;;  %v5495_v34 = vunpack.i.h.bf16 %v6770_v46 }
 0x1f2   : > { %v6869_v4 = vpop.permute.xlu0 %2402  ;;  %v1775_v50 = vsel %vm1769_vm2, %v5490_v35, %v5524_v59  ;;  %v4878_v54 = vpack.c.bf16 %v2343_v58, %v2248_v61  ;;  %v1776_v19 = vsel %vm1769_vm2, %v5524_v59, %v5525_v20  ;;  %v5510_v61 = vunpack.i.h.bf16 %v6814_v0 }
 0x1f3   : > { %v6872_v45 = vpop.permute.xlu1 %5527  ;;  %v4882_v57 = vpack.c.bf16 %v1775_v50, %v6492_v6  ;;  %v5766_v6 = vpack.i.bf16 %v6867_v63, %v6812_v60  ;;  %v1869_v42 = vsel %vm1864_vm3, %v5494_v11, %v5495_v34  ;;  %v5505_v50 = vunpack.i.h.bf16 %v6790_v26 }
 0x1f4   : > { %2331 = vrot.lane.b32.xlu0 %v6812_v60, %s5894_s21  ;;  %4879 = vmatprep.subr.bf16.mxu1 %v4878_v54  ;;  %v5529_v43 = vunpack.i.l.bf16 %v6872_v45  ;;  %v4888_v17 = vpack.c.bf16 %v1964_v12, %v1869_v42  ;;  %v4900_v54 = vpack.c.bf16 %v1776_v19, %v6504_v9  ;;  %v5530_v9 = vunpack.i.h.bf16 %v6872_v45 }
 0x1f5   : > { %5742 = vrot.lane.b32.xlu1 %v6821_v62, %s5890_s30  ;;  %4883 = vmatprep.subr.bf16.mxu0 %v4882_v57 }
 0x1f6   : > { %4881 = vmatpush1.bf16.msra.mxu1 %v4880_v38  ;;  %4885 = vmatpush1.bf16.msra.mxu0 %v4884_v39  ;;  %v6882_v31 = vpop.permute.xlu0 %2406  ;;  %v1870_v16 = vsel %vm1864_vm3, %v5495_v34, %v5529_v43 }
 0x1f7   : > { %v5533_v35 = vpop.permute.xlu1 %5532  ;;  %2579 = vmatprep.subr.mxu1 %v2438_v5  ;;  %v1671_v5 = vadd.f32 %v6533_v21, %v6450_v40  ;;  %v2059_v21 = vsel %vm2054_vm5, %v5504_v55, %v5505_v50 }
 0x1f8   : > { %v5534_v24 = vunpack.i.l.bf16 %v5533_v35  ;;  %5767 = vrot.lane.b32.xlu0 %v5766_v6, %s5889_s29  ;;  %v5535_v38 = vunpack.i.h.bf16 %v5533_v35 }
 0x1f9   : > { %5747 = vrot.lane.b32.xlu1 %v6821_v62, %s5893_s20  ;;  %v6965_v42 = vmax.f32 %v1671_v5, 0.0 }
 0x1fa   : > { %2580 = vmatpush1.msra.mxu1 %v2437_v28  ;;  %v6899_v23 = vpop.permute.xlu0 %5557  ;;  %v1965_v52 = vsel %vm1959_vm4, %v5500_v29, %v5534_v24  ;;  %v1669_v29 = vadd.f32 %v6527_v18, %v6450_v40  ;;  %v1966_v12 = vsel %vm1959_vm4, %v5534_v24, %v5535_v38 }
 0x1fb   : > { %v6908_v53 = vpop.permute.xlu1 %5537  ;;  %v5559_v13 = vunpack.i.l.bf16 %v6899_v23  ;;  %4569 = vmatmul.mubr.msk.f32.vlgmr.msra.gmra.mrb[14].mxu1 %vm2488_vm10, %v6747_v8  ;;  %v4886_v49 = vpack.c.bf16 %v1965_v52, %v1870_v16  ;;  %v5520_v52 = vunpack.i.h.bf16 %v6845_v32 }
 0x1fc   : > { %5772 = vrot.lane.b32.xlu0 %v5766_v6, %s5891_s11  ;;  %2767 = vmatprep.mubr.f32.mxu1 %v5886_v56  ;;  %v5539_v11 = vunpack.i.l.bf16 %v6908_v53  ;;  %v6954_v16 = vmax.f32 %v1669_v29, 0.0 }
 0x1fd   : > { %5752 = vrot.lane.b32.xlu1 %v6821_v62, %s5892_s18  ;;  %4887 = vmatprep.subr.bf16.mxu0 %v4886_v49  ;;  %v1777_v46 = vsel %vm1769_vm2, %v5525_v20, %v5559_v13  ;;  %v2344_v45 = vsel %vm2339_vm8, %v5519_v51, %v5520_v52 }
 0x1fe   : > { %4889 = vmatpush1.bf16.msra.mxu0 %v4888_v17  ;;  %v6923_v58 = vpop.permute.xlu0 %5562  ;;  %v4898_v59 = vpack.c.bf16 %v1777_v46, %v6520_v15  ;;  %v2154_v15 = vsel %vm2149_vm6, %v5509_v10, %v5510_v61  ;;  %v2060_v18 = vsel %vm2054_vm5, %v5505_v50, %v5539_v11  ;;  %v5515_v17 = vunpack.i.h.bf16 %v6816_v47 }
 0x1ff   : > { %v5543_v57 = vpop.permute.xlu1 %5542  ;;  %v5564_v34 = vunpack.i.l.bf16 %v6923_v58  ;;  %v4892_v28 = vpack.c.bf16 %v2154_v15, %v2059_v21  ;;  %v5540_v50 = vunpack.i.h.bf16 %v6908_v53 }
 0x200   : > { %v5544_v39 = vunpack.i.l.bf16 %v5543_v57  ;;  %5777 = vrot.lane.b32.xlu0 %v5766_v6, %s5890_s30  ;;  %4899 = vmatprep.subr.bf16.mxu1 %v4898_v59  ;;  %v5545_v46 = vunpack.i.h.bf16 %v5543_v57  ;;  %v5791_v57 = vpack.i.bf16 %v6965_v42, %v6954_v16  ;;  %v2249_v51 = vsel %vm2244_vm7, %v5514_v41, %v5515_v17 }
 0x201   : > { %5757 = vrot.lane.b32.xlu1 %v6821_v62, %s5895_s25  ;;  %4901 = vmatpush1.bf16.msra.mxu1 %v4900_v54  ;;  %v1872_v26 = vsel %vm1864_vm3, %v5530_v9, %v5564_v34  ;;  %v2061_v41 = vsel %vm2054_vm5, %v5539_v11, %v5540_v50 }
 0x202   : > { %v6940_v35 = vpop.permute.xlu0 %5567  ;;  %v2155_v40 = vsel %vm2149_vm6, %v5510_v61, %v5544_v39 }
 0x203   : > { %v6949_v0 = vpop.permute.xlu1 %5547  ;;  %v5569_v10 = vunpack.i.l.bf16 %v6940_v35  ;;  %v4890_v20 = vpack.c.bf16 %v2155_v40, %v2060_v18  ;;  %v2156_v18 = vsel %vm2149_vm6, %v5544_v39, %v5545_v46 }
 0x204   : > { %5782 = vrot.lane.b32.xlu0 %v5766_v6, %s5893_s20  ;;  %v1871_v6 = vsel %vm1864_vm3, %v5529_v43, %v5530_v9  ;;  %v5549_v24 = vunpack.i.l.bf16 %v6949_v0  ;;  %v4896_v9 = vpack.c.bf16 %v2344_v45, %v2249_v51 }
 0x205   : > { %5762 = vrot.lane.b32.xlu1 %v6821_v62, %s5894_s21  ;;  %4891 = vmatprep.subr.bf16.mxu0 %v4890_v20  ;;  %v1967_v55 = vsel %vm1959_vm4, %v5535_v38, %v5569_v10  ;;  %v4904_v19 = vpack.c.bf16 %v1966_v12, %v1871_v6  ;;  %v5550_v6 = vunpack.i.h.bf16 %v6949_v0 }
 0x206   : > { %4893 = vmatpush1.bf16.msra.mxu0 %v4892_v28  ;;  %v6971_v49 = vpop.permute.xlu0 %5572  ;;  %v4902_v62 = vpack.c.bf16 %v1967_v55, %v1872_v26  ;;  %v2250_v38 = vsel %vm2244_vm7, %v5515_v17, %v5549_v24  ;;  %v4908_v28 = vpack.c.bf16 %v2156_v18, %v2061_v41 }
 0x207   : > { %v5553_v61 = vpop.permute.xlu1 %5552  ;;  %v5574_v43 = vunpack.i.l.bf16 %v6971_v49 }
 0x208   : > { %v5554_v59 = vunpack.i.l.bf16 %v5553_v61  ;;  %2424 = vrot.lane.b32.xlu0 %v6788_v48, %s5888_s28  ;;  %4903 = vmatprep.subr.bf16.mxu1 %v4902_v62  ;;  %v5555_v26 = vunpack.i.h.bf16 %v5553_v61 }
 0x209   : > { %2426 = vrot.lane.b32.xlu1 %v6812_v60, %s5888_s28  ;;  %4905 = vmatpush1.bf16.msra.mxu1 %v4904_v19  ;;  %v2062_v40 = vsel %vm2054_vm5, %v5540_v50, %v5574_v43  ;;  %v5806_v19 = vpack.i.bf16 %v6954_v16, %v6867_v63 }
 0x20a   : > { %v6983_v54 = vpop.permute.xlu0 %5577  ;;  %v2345_v32 = vsel %vm2339_vm8, %v5520_v52, %v5554_v59  ;;  %v5560_v52 = vunpack.i.h.bf16 %v6899_v23  ;;  %v2251_v23 = vsel %vm2244_vm7, %v5549_v24, %v5550_v6 }
 0x20b   : > { %v2397_v29 = vpop.permute.xlu1 %2396  ;;  %v5579_v5 = vunpack.i.l.bf16 %v6983_v54  ;;  %v4894_v15 = vpack.c.bf16 %v2345_v32, %v2250_v38 }
 0x20c   : > { %5792 = vrot.lane.b32.xlu0 %v5791_v57, %s5891_s11  ;;  %v2440_v39 = vsel %vm2434_vm9, %v2397_v29, %v6761_v14  ;;  %v2439_v53 = vsel %vm2434_vm9, %v6740_v1, %v2397_v29  ;;  %v1778_v61 = vsel %vm1769_vm2, %v5559_v13, %v5560_v52 }
 0x20d   : > { %5787 = vrot.lane.b32.xlu1 %v5791_v57, %s5889_s29  ;;  %4895 = vmatprep.subr.bf16.mxu0 %v4894_v15  ;;  %v2157_v47 = vsel %vm2149_vm6, %v5545_v46, %v5579_v5  ;;  %v2346_v46 = vsel %vm2339_vm8, %v5554_v59, %v5555_v26  ;;  %v4916_v51 = vpack.c.bf16 %v1778_v61, %v6537_v22  ;;  %v5570_v15 = vunpack.i.h.bf16 %v6940_v35  ;;  %s4583_s29 = sshll.u32 %s8655_s17, 7 }
 0x20e   : > { %4897 = vmatpush1.bf16.msra.mxu0 %v4896_v9  ;;  %v7007_v21 = vpop.permute.xlu0 %5582  ;;  %v4906_v20 = vpack.c.bf16 %v2157_v47, %v2062_v40  ;;  %v4912_v29 = vpack.c.bf16 %v2346_v46, %v2251_v23  ;;  %v5565_v22 = vunpack.i.h.bf16 %v6923_v58  ;;  %v5580_v58 = vunpack.i.h.bf16 %v6983_v54 }
 0x20f   : > { %v2401_v12 = vpop.permute.xlu1 %2400  ;;  %2649 = vmatprep.subr.mxu0 %v2440_v39  ;;  %v5584_v11 = vunpack.i.l.bf16 %v7007_v21  ;;  %v1968_v47 = vsel %vm1959_vm4, %v5569_v10, %v5570_v15 }
 0x210   : > { %5802 = vrot.lane.b32.xlu0 %v5791_v57, %s5893_s20  ;;  %4907 = vmatprep.subr.bf16.mxu1 %v4906_v20  ;;  %v2441_v41 = vsel %vm2434_vm9, %v6761_v14, %v2401_v12  ;;  %s8595_s20 = scalar_lea.hbm %s8649_s10, %s4583_s29 }
 0x211   : > { %5797 = vrot.lane.b32.xlu1 %v5791_v57, %s5890_s30  ;;  %4909 = vmatpush1.bf16.msra.mxu1 %v4908_v28  ;;  %v2252_v45 = vsel %vm2244_vm7, %v5550_v6, %v5584_v11  ;;  %s615_s30 = scalar_lea.vmem [#allocation3], %s4531_s26  ;;  %s5898_s26 = smov [#allocation3]  }
 0x212   : > { %2650 = vmatpush1.msra.mxu0 %v2439_v53  ;;  %v7017_v55 = vpop.permute.xlu0 %5587  ;;  %s5826_s27 = sshll.u32 %s5898_s26, 4  ;;  %s5827_s27 = int_to_ptr.vmem [resolvable:$false] %s5826_s27 }
 0x213   : > { %v5593_v62 = vpop.permute.xlu1 %5592  ;;  %v5589_v17 = vunpack.i.l.bf16 %v7017_v55  ;;  %4570 = vmatmul.mubr.msk.f32.vlgmr.msra.gmra.mrb[12].mxu0 %vm2488_vm10, %v6747_v8  ;;  %s5828_s0 = scalar_lea.vmem %s5827_s27, 256 }
 0x214   : > { %v5594_v1 = vunpack.i.l.bf16 %v5593_v62  ;;  %2147 = vrot.lane.b32.xlu0 %v6965_v42, %s5892_s18  ;;  %2838 = vmatprep.mubr.f32.mxu0 %v5886_v56  ;;  %v5595_v18 = vunpack.i.h.bf16 %v5593_v62 }
 0x215   : > { %5807 = vrot.lane.b32.xlu1 %v5806_v19, %s5892_s18  ;;  %v2347_v50 = vsel %vm2339_vm8, %v5555_v26, %v5589_v17 }
 0x216   : > { %v7039_v57 = vpop.permute.xlu0 %2410  ;;  %v4910_v38 = vpack.c.bf16 %v2347_v50, %v2252_v45  ;;  %v1779_v32 = vsel %vm1769_vm2, %v5560_v52, %v5594_v1  ;;  %v1873_v52 = vsel %vm1864_vm3, %v5564_v34, %v5565_v22  ;;  %v1780_v26 = vsel %vm1769_vm2, %v5594_v1, %v5595_v18  ;;  %v2482_v34 = vld [vmem:[%s8643_s4] sm:$0xff] }
 0x217   : > { %v7045_v13 = vpop.permute.xlu1 %5597  ;;  %v4914_v59 = vpack.c.bf16 %v1779_v32, %v6546_v27  ;;  %v2442_v27 = vsel %vm2434_vm9, %v2401_v12, %v6869_v4  ;;  %v4920_v12 = vpack.c.bf16 %v1968_v47, %v1873_v52  ;;  %v5575_v1 = vunpack.i.h.bf16 %v6971_v49 }
 0x218   : > { %5817 = vrot.lane.b32.xlu0 %v5806_v19, %s5894_s21  ;;  %4911 = vmatprep.subr.bf16.mxu1 %v4910_v38  ;;  %v5599_v9 = vunpack.i.l.bf16 %v7045_v13  ;;  %v4932_v61 = vpack.c.bf16 %v1780_v26, %v6544_v25  ;;  %v2158_v38 = vsel %vm2149_vm6, %v5579_v5, %v5580_v58 }
 0x219   : > { %5812 = vrot.lane.b32.xlu1 %v5806_v19, %s5895_s25  ;;  %4915 = vmatprep.subr.bf16.mxu0 %v4914_v59  ;;  %v2063_v54 = vsel %vm2054_vm5, %v5574_v43, %v5575_v1 }
 0x21a   : > { %4913 = vmatpush1.bf16.msra.mxu1 %v4912_v29  ;;  %4917 = vmatpush1.bf16.msra.mxu0 %v4916_v51  ;;  %v7053_v0 = vpop.permute.xlu0 %2414  ;;  %v1874_v20 = vsel %vm1864_vm3, %v5565_v22, %v5599_v9 }
 0x21b   : > { %v5603_v24 = vpop.permute.xlu1 %5602  ;;  %2719 = vmatprep.subr.mxu1 %v2442_v27 }
 0x21c   : > { %v5604_v40 = vunpack.i.l.bf16 %v5603_v24  ;;  %2337 = vrot.lane.b32.xlu0 %v6965_v42, %s5894_s21  ;;  %v5605_v45 = vunpack.i.h.bf16 %v5603_v24  ;;  %s4448_s21 = scalar_lea.sflag [#allocation4], %s6255_s12 }
 0x21d   : > { %2242 = vrot.lane.b32.xlu1 %v6965_v42, %s5895_s25 }
 0x21e   : > { %2720 = vmatpush1.msra.mxu1 %v2441_v41  ;;  %v7067_v39 = vpop.permute.xlu0 %5627  ;;  %v1969_v28 = vsel %vm1959_vm4, %v5570_v15, %v5604_v40  ;;  %v4924_v15 = vpack.c.bf16 %v2158_v38, %v2063_v54 }
 0x21f   : > { %v7074_v35 = vpop.permute.xlu1 %5607  ;;  %v5629_v10 = vunpack.i.l.bf16 %v7067_v39  ;;  %4571 = vmatmul.mubr.msk.f32.vlgmr.msra.gmra.mrb[16].mxu1 %vm2488_vm10, %v6747_v8  ;;  %v4918_v14 = vpack.c.bf16 %v1969_v28, %v1874_v20 }
 0x220   : > { %2430 = vrot.lane.b32.xlu0 %v6954_v16, %s5888_s28  ;;  %2908 = vmatprep.mubr.f32.mxu1 %v5886_v56  ;;  %v5609_v6 = vunpack.i.l.bf16 %v7074_v35 }
 0x221   : > { %2428 = vrot.lane.b32.xlu1 %v6867_v63, %s5888_s28  ;;  %4919 = vmatprep.subr.bf16.mxu0 %v4918_v14  ;;  %v1781_v53 = vsel %vm1769_vm2, %v5595_v18, %v5629_v10 }
 0x222   : > { %4921 = vmatpush1.bf16.msra.mxu0 %v4920_v12  ;;  %v7093_v62 = vpop.permute.xlu0 %5632  ;;  %v4930_v19 = vpack.c.bf16 %v1781_v53, %v6565_v30  ;;  %v5600_v30 = vunpack.i.h.bf16 %v7045_v13  ;;  %v2064_v25 = vsel %vm2054_vm5, %v5575_v1, %v5609_v6  ;;  %v5590_v13 = vunpack.i.h.bf16 %v7017_v55 }
 0x223   : > { %v5613_v46 = vpop.permute.xlu1 %5612  ;;  %v5634_v32 = vunpack.i.l.bf16 %v7093_v62 }
 0x224   : > { %v5614_v50 = vunpack.i.l.bf16 %v5613_v46  ;;  %2485 = vperm.xlu0 %5415, %v2482_v34   ;;  %4931 = vmatprep.subr.bf16.mxu1 %v4930_v19  ;;  %v1875_v43 = vsel %vm1864_vm3, %v5599_v9, %v5600_v30  ;;  %v5615_v20 = vunpack.i.h.bf16 %v5613_v46  ;;  %v2348_v52 = vsel %vm2339_vm8, %v5589_v17, %v5590_v13 }
 0x225   : > { %2432 = vrot.lane.b32.xlu1 %v6965_v42, %s5888_s28  ;;  %4933 = vmatpush1.bf16.msra.mxu1 %v4932_v61  ;;  %v1970_v42 = vsel %vm1959_vm4, %v5604_v40, %v5605_v45  ;;  %v1876_v27 = vsel %vm1864_vm3, %v5600_v30, %v5634_v32  ;;  %v5585_v40 = vunpack.i.h.bf16 %v7007_v21  ;;  %v5610_v9 = vunpack.i.h.bf16 %v7074_v35  ;;  %s4461_s28 = sshll.u32 %s615_s30, 4  ;;  %s8597_s28 = int_to_ptr.vmem [resolvable:$true] %s4461_s28 }
 0x226   : > { %v7105_v23 = vpop.permute.xlu0 %5637  ;;  %v2159_v59 = vsel %vm2149_vm6, %v5580_v58, %v5614_v50  ;;  %v4936_v47 = vpack.c.bf16 %v1970_v42, %v1875_v43  ;;  %v2160_v1 = vsel %vm2149_vm6, %v5614_v50, %v5615_v20  ;;  %s5822_s25 = scalar_lea.vmem %s8597_s28, 128  ;;  %p5829_p2 = scmp.lt.s32.totalorder %s8597_s28, %s5827_s27 }
 0x227   : > { %v7112_v51 = vpop.permute.xlu1 %5617  ;;  %v5639_v5 = vunpack.i.l.bf16 %v7105_v23  ;;  %v4922_v29 = vpack.c.bf16 %v2159_v59, %v2064_v25  ;;  %v2253_v34 = vsel %vm2244_vm7, %v5584_v11, %v5585_v40  ;;  %v2065_v21 = vsel %vm2054_vm5, %v5609_v6, %v5610_v9  ;;  %p5823_p13 = scmp.ne.s32.totalorder %s8597_s28, %s5822_s25  ;;  %p5830_p3 = scmp.lt.s32.totalorder %s5828_s0, %s5822_s25 }
 0x228   : > { %v5619_v22 = vunpack.i.l.bf16 %v7112_v51  ;;  %v4928_v17 = vpack.c.bf16 %v2348_v52, %v2253_v34  ;;  %v4940_v38 = vpack.c.bf16 %v2160_v1, %v2065_v21  ;;  %v5630_v25 = vunpack.i.h.bf16 %v7067_v39 }
 0x229   : > { %4923 = vmatprep.subr.bf16.mxu0 %v4922_v29  ;;  %v1971_v49 = vsel %vm1959_vm4, %v5605_v45, %v5639_v5  ;;  %v5620_v6 = vunpack.i.h.bf16 %v7112_v51  ;;  %v5640_v52 = vunpack.i.h.bf16 %v7105_v23  ;;  %p5824_p0 = pnand %p5823_p13, %p5992_p6  ;;  %p5831_p4 = por %p5830_p3, %p5829_p2 }
 0x22a   : > { %4925 = vmatpush1.bf16.msra.mxu0 %v4924_v15  ;;  %v7125_v24 = vpop.permute.xlu0 %5642  ;;  %v4934_v18 = vpack.c.bf16 %v1971_v49, %v1876_v27  ;;  %v2254_v26 = vsel %vm2244_vm7, %v5585_v40, %v5619_v22 }
 0x22b   : > { %v5623_v41 = vpop.permute.xlu1 %5622  ;;  %v5644_v14 = vunpack.i.l.bf16 %v7125_v24  ;;  %v2255_v43 = vsel %vm2244_vm7, %v5619_v22, %v5620_v6  ;;  %p5825_p1 = pneg %p5824_p0 }
 0x22c   : > { %v5624_v28 = vunpack.i.l.bf16 %v5623_v41  ;;  %4935 = vmatprep.subr.bf16.mxu1 %v4934_v18  ;;  %v5625_v30 = vunpack.i.h.bf16 %v5623_v41 }
 0x22d   : > { %4937 = vmatpush1.bf16.msra.mxu1 %v4936_v47  ;;  %v2066_v35 = vsel %vm2054_vm5, %v5610_v9, %v5644_v14  ;;  %p5832_p5 = pnand %p5831_p4, %p5825_p1 }
 0x22e   : > { %v7133_v12 = vpop.permute.xlu0 %5647  ;;  %v2349_v58 = vsel %vm2339_vm8, %v5590_v13, %v5624_v28  ;;  %v2350_v13 = vsel %vm2339_vm8, %v5624_v28, %v5625_v30 }
 0x22f   : > { %v2405_v53 = vpop.permute.xlu1 %2404  ;;  %v5649_v55 = vunpack.i.l.bf16 %v7133_v12  ;;  %v4926_v19 = vpack.c.bf16 %v2349_v58, %v2254_v26  ;;  %v4944_v41 = vpack.c.bf16 %v2350_v13, %v2255_v43  ;;  %v5635_v58 = vunpack.i.h.bf16 %v7093_v62 }
 0x230   : > { %v2444_v46 = vsel %vm2434_vm9, %v2405_v53, %v6882_v31  ;;  %v2443_v59 = vsel %vm2434_vm9, %v6869_v4, %v2405_v53  ;;  %v1782_v4 = vsel %vm1769_vm2, %v5629_v10, %v5630_v25 }
 0x231   : > { %4927 = vmatprep.subr.bf16.mxu0 %v4926_v19  ;;  %v2161_v61 = vsel %vm2149_vm6, %v5615_v20, %v5649_v55  ;;  %v4948_v10 = vpack.c.bf16 %v1782_v4, %v6575_v33  ;;  %v1877_v23 = vsel %vm1864_vm3, %v5634_v32, %v5635_v58 }
 0x232   : > { %4929 = vmatpush1.bf16.msra.mxu0 %v4928_v17  ;;  %v7149_v11 = vpop.permute.xlu0 %5652  ;;  %v4938_v45 = vpack.c.bf16 %v2161_v61, %v2066_v35  ;;  %v1972_v17 = vsel %vm1959_vm4, %v5639_v5, %v5640_v52 }
 0x233   : > { %v2409_v50 = vpop.permute.xlu1 %2408  ;;  %2790 = vmatprep.subr.mxu0 %v2444_v46  ;;  %v5654_v54 = vunpack.i.l.bf16 %v7149_v11 }
 0x234   : > { %4939 = vmatprep.subr.bf16.mxu1 %v4938_v45  ;;  %v2446_v22 = vsel %vm2434_vm9, %v2409_v50, %v7039_v57  ;;  %v2445_v33 = vsel %vm2434_vm9, %v6882_v31, %v2409_v50 }
 0x235   : > { %4941 = vmatpush1.bf16.msra.mxu1 %v4940_v38  ;;  %v2256_v51 = vsel %vm2244_vm7, %v5620_v6, %v5654_v54  ;;  %v4952_v38 = vpack.c.bf16 %v1972_v17, %v1877_v23 }
 0x236   : > { %2791 = vmatpush1.msra.mxu0 %v2443_v59  ;;  %v7158_v29 = vpop.permute.xlu0 %5657 }
 0x237   : > { %v5663_v15 = vpop.permute.xlu1 %5662  ;;  %v5659_v42 = vunpack.i.l.bf16 %v7158_v29  ;;  %4572 = vmatmul.mubr.msk.f32.vlgmr.msra.gmra.mrb[14].mxu0 %vm2488_vm10, %v6747_v8 }
 0x238   : > { %v5664_v27 = vunpack.i.l.bf16 %v5663_v15  ;;  %2978 = vmatprep.mubr.f32.mxu0 %v5886_v56  ;;  %v5665_v28 = vunpack.i.h.bf16 %v5663_v15 }
 0x239   : > { %v2351_v49 = vsel %vm2339_vm8, %v5625_v30, %v5659_v42  ;;  %v5650_v30 = vunpack.i.h.bf16 %v7133_v12 }
 0x23a   : > { %v7175_v18 = vpop.permute.xlu0 %2418  ;;  %v4942_v40 = vpack.c.bf16 %v2351_v49, %v2256_v51  ;;  %v1783_v47 = vsel %vm1769_vm2, %v5630_v25, %v5664_v27  ;;  %v1784_v53 = vsel %vm1769_vm2, %v5664_v27, %v5665_v28 }
 0x23b   : > { %v5668_v20 = vpop.permute.xlu1 %5667  ;;  %v4946_v39 = vpack.c.bf16 %v1783_v47, %v6584_v37  ;;  %v4964_v5 = vpack.c.bf16 %v1784_v53, %v6582_v36  ;;  %v5645_v36 = vunpack.i.h.bf16 %v7125_v24  ;;  %v2162_v27 = vsel %vm2149_vm6, %v5649_v55, %v5650_v30 }
 0x23c   : > { %4943 = vmatprep.subr.bf16.mxu1 %v4942_v40  ;;  %v5669_v9 = vunpack.i.l.bf16 %v5668_v20  ;;  %v5655_v24 = vunpack.i.h.bf16 %v7149_v11 }
 0x23d   : > { %4947 = vmatprep.subr.bf16.mxu0 %v4946_v39  ;;  %4945 = vmatpush1.bf16.msra.mxu1 %v4944_v41  ;;  %v2067_v12 = vsel %vm2054_vm5, %v5644_v14, %v5645_v36 }
 0x23e   : > { %4949 = vmatpush1.bf16.msra.mxu0 %v4948_v10  ;;  %v7183_v26 = vpop.permute.xlu0 %5697  ;;  %2860 = vmatprep.subr.mxu1 %v2446_v22  ;;  %v1878_v61 = vsel %vm1864_vm3, %v5635_v58, %v5669_v9  ;;  %v4956_v10 = vpack.c.bf16 %v2162_v27, %v2067_v12 }
 0x23f   : > { %v5673_v34 = vpop.permute.xlu1 %5672  ;;  %v5699_v37 = vunpack.i.l.bf16 %v7183_v26 }
 0x240   : > { %v5674_v19 = vunpack.i.l.bf16 %v5673_v34  ;;  %v5675_v50 = vunpack.i.h.bf16 %v5673_v34 }
 0x241   : > { %2861 = vmatpush1.msra.mxu1 %v2445_v33  ;;  %v1785_v1 = vsel %vm1769_vm2, %v5665_v28, %v5699_v37 }
 0x242   : > { %v7196_v35 = vpop.permute.xlu0 %5702  ;;  %4573 = vmatmul.mubr.msk.f32.vlgmr.msra.gmra.mrb[18].mxu1 %vm2488_vm10, %v6747_v8  ;;  %v1973_v31 = vsel %vm1959_vm4, %v5640_v52, %v5674_v19  ;;  %v4962_v21 = vpack.c.bf16 %v1785_v1, %v6610_v44  ;;  %v5670_v44 = vunpack.i.h.bf16 %v5668_v20  ;;  %v1974_v15 = vsel %vm1959_vm4, %v5674_v19, %v5675_v50 }
 0x243   : > { %v5678_v46 = vpop.permute.xlu1 %5677  ;;  %v4950_v45 = vpack.c.bf16 %v1973_v31, %v1878_v61  ;;  %3049 = vmatprep.mubr.f32.mxu1 %v5886_v56  ;;  %v5704_v25 = vunpack.i.l.bf16 %v7196_v35  ;;  %v5660_v52 = vunpack.i.h.bf16 %v7158_v29  ;;  %v2257_v29 = vsel %vm2244_vm7, %v5654_v54, %v5655_v24 }
 0x244   : > { %4963 = vmatprep.subr.bf16.mxu1 %v4962_v21  ;;  %v5679_v59 = vunpack.i.l.bf16 %v5678_v46  ;;  %v1879_v49 = vsel %vm1864_vm3, %v5669_v9, %v5670_v44  ;;  %v5680_v9 = vunpack.i.h.bf16 %v5678_v46 }
 0x245   : > { %4951 = vmatprep.subr.bf16.mxu0 %v4950_v45  ;;  %4965 = vmatpush1.bf16.msra.mxu1 %v4964_v5  ;;  %v1880_v4 = vsel %vm1864_vm3, %v5670_v44, %v5704_v25  ;;  %v4968_v55 = vpack.c.bf16 %v1974_v15, %v1879_v49  ;;  %v2352_v17 = vsel %vm2339_vm8, %v5659_v42, %v5660_v52 }
 0x246   : > { %4953 = vmatpush1.bf16.msra.mxu0 %v4952_v38  ;;  %v7210_v62 = vpop.permute.xlu0 %5707  ;;  %v2068_v40 = vsel %vm2054_vm5, %v5645_v36, %v5679_v59  ;;  %v2069_v31 = vsel %vm2054_vm5, %v5679_v59, %v5680_v9 }
 0x247   : > { %v5683_v32 = vpop.permute.xlu1 %5682  ;;  %v5709_v6 = vunpack.i.l.bf16 %v7210_v62 }
 0x248   : > { %v5684_v13 = vunpack.i.l.bf16 %v5683_v32  ;;  %v5685_v28 = vunpack.i.h.bf16 %v5683_v32 }
 0x249   : > { %v1975_v51 = vsel %vm1959_vm4, %v5675_v50, %v5709_v6  ;;  %v4960_v50 = vpack.c.bf16 %v2352_v17, %v2257_v29 }
 0x24a   : > { %v7225_v43 = vpop.permute.xlu0 %5712  ;;  %v2163_v47 = vsel %vm2149_vm6, %v5650_v30, %v5684_v13  ;;  %v4966_v41 = vpack.c.bf16 %v1975_v51, %v1880_v4  ;;  %v2164_v53 = vsel %vm2149_vm6, %v5684_v13, %v5685_v28 }
 0x24b   : > { %v5688_v20 = vpop.permute.xlu1 %5687  ;;  %v4954_v39 = vpack.c.bf16 %v2163_v47, %v2068_v40  ;;  %v5714_v22 = vunpack.i.l.bf16 %v7225_v43  ;;  %v4972_v42 = vpack.c.bf16 %v2164_v53, %v2069_v31  ;;  %v5705_v53 = vunpack.i.h.bf16 %v7196_v35 }
 0x24c   : > { %4967 = vmatprep.subr.bf16.mxu1 %v4966_v41  ;;  %v5689_v58 = vunpack.i.l.bf16 %v5688_v20  ;;  %v5690_v59 = vunpack.i.h.bf16 %v5688_v20 }
 0x24d   : > { %4955 = vmatprep.subr.bf16.mxu0 %v4954_v39  ;;  %4969 = vmatpush1.bf16.msra.mxu1 %v4968_v55  ;;  %v2070_v1 = vsel %vm2054_vm5, %v5680_v9, %v5714_v22  ;;  %v1881_v31 = vsel %vm1864_vm3, %v5704_v25, %v5705_v53  ;;  %v5715_v25 = vunpack.i.h.bf16 %v7225_v43 }
 0x24e   : > { %4957 = vmatpush1.bf16.msra.mxu0 %v4956_v10  ;;  %v7234_v34 = vpop.permute.xlu0 %5717  ;;  %v2258_v23 = vsel %vm2244_vm7, %v5655_v24, %v5689_v58  ;;  %v2259_v51 = vsel %vm2244_vm7, %v5689_v58, %v5690_v59 }
 0x24f   : > { %v5693_v14 = vpop.permute.xlu1 %5692  ;;  %v5719_v33 = vunpack.i.l.bf16 %v7234_v34 }
 0x250   : > { %v5694_v19 = vunpack.i.l.bf16 %v5693_v14  ;;  %v5695_v30 = vunpack.i.h.bf16 %v5693_v14  ;;  %v5710_v14 = vunpack.i.h.bf16 %v7210_v62  ;;  %v5720_v62 = vunpack.i.h.bf16 %v7234_v34 }
 0x251   : > { %v2165_v61 = vsel %vm2149_vm6, %v5685_v28, %v5719_v33 }
 0x252   : > { %v7249_v21 = vpop.permute.xlu0 %5722  ;;  %v2353_v5 = vsel %vm2339_vm8, %v5660_v52, %v5694_v19  ;;  %v4970_v46 = vpack.c.bf16 %v2165_v61, %v2070_v1  ;;  %v2354_v15 = vsel %vm2339_vm8, %v5694_v19, %v5695_v30 }
 0x253   : > { %v2413_v45 = vpop.permute.xlu1 %2412  ;;  %v4958_v38 = vpack.c.bf16 %v2353_v5, %v2258_v23  ;;  %v5724_v44 = vunpack.i.l.bf16 %v7249_v21  ;;  %v4976_v47 = vpack.c.bf16 %v2354_v15, %v2259_v51 }
 0x254   : > { %4971 = vmatprep.subr.bf16.mxu1 %v4970_v46  ;;  %v2448_v32 = vsel %vm2434_vm9, %v2413_v45, %v7053_v0  ;;  %v2447_v13 = vsel %vm2434_vm9, %v7039_v57, %v2413_v45  ;;  %v5700_v57 = vunpack.i.h.bf16 %v7183_v26 }
 0x255   : > { %4959 = vmatprep.subr.bf16.mxu0 %v4958_v38  ;;  %4973 = vmatpush1.bf16.msra.mxu1 %v4972_v42  ;;  %v2260_v27 = vsel %vm2244_vm7, %v5690_v59, %v5724_v44 }
 0x256   : > { %4961 = vmatpush1.bf16.msra.mxu0 %v4960_v50  ;;  %v7257_v36 = vpop.permute.xlu0 %5727  ;;  %v1786_v28 = vsel %vm1769_vm2, %v5699_v37, %v5700_v57 }
 0x257   : > { %v2417_v11 = vpop.permute.xlu1 %2416  ;;  %v5729_v54 = vunpack.i.l.bf16 %v7257_v36  ;;  %2930 = vmatprep.subr.mxu0 %v2448_v32 }
 0x258   : > { %v2450_v12 = vsel %vm2434_vm9, %v2417_v11, %v7175_v18  ;;  %v2449_v39 = vsel %vm2434_vm9, %v7053_v0, %v2417_v11  ;;  %v4980_v0 = vpack.c.bf16 %v1786_v28, %v6648_v2  ;;  %v2166_v11 = vsel %vm2149_vm6, %v5719_v33, %v5720_v62 }
 0x259   : > { %v2355_v4 = vsel %vm2339_vm8, %v5695_v30, %v5729_v54 }
 0x25a   : > { %2931 = vmatpush1.msra.mxu0 %v2447_v13  ;;  %v7272_v49 = vpop.permute.xlu0 %2420  ;;  %v4974_v40 = vpack.c.bf16 %v2355_v4, %v2260_v27 }
 0x25b   : > { %v7274_v41 = vpop.permute.xlu1 %2422  ;;  %4574 = vmatmul.mubr.msk.f32.vlgmr.msra.gmra.mrb[16].mxu0 %vm2488_vm10, %v6747_v8 }
 0x25c   : > { %4975 = vmatprep.subr.bf16.mxu1 %v4974_v40  ;;  %3119 = vmatprep.mubr.f32.mxu0 %v5886_v56 }
 0x25d   : > { %4977 = vmatpush1.bf16.msra.mxu1 %v4976_v47 }
 0x25e   : > { %v7282_v55 = vpop.permute.xlu0 %2141  ;;  %3001 = vmatprep.subr.mxu1 %v2450_v12  ;;  %v5730_v12 = vunpack.i.h.bf16 %v7257_v36 }
 0x25f   : > { %v5733_v20 = vpop.permute.xlu1 %5732 }
 0x260   : > { %v5734_v10 = vunpack.i.l.bf16 %v5733_v20 }
 0x261   : > { %3002 = vmatpush1.msra.mxu1 %v2449_v39 }
 0x262   : > { %v7289_v52 = vpop.permute.xlu0 %2236  ;;  %4575 = vmatmul.mubr.msk.f32.vlgmr.msra.gmra.mrb[20].mxu1 %vm2488_vm10, %v6747_v8  ;;  %v1787_v9 = vsel %vm1769_vm2, %v5700_v57, %v5734_v10  ;;  %v5735_v8 = vunpack.i.h.bf16 %v5733_v20 }
 0x263   : > { %v5738_v58 = vpop.permute.xlu1 %5737  ;;  %v4978_v24 = vpack.c.bf16 %v1787_v9, %v6650_v3  ;;  %3189 = vmatprep.mubr.f32.mxu1 %v5886_v56  ;;  %v1976_v3 = vsel %vm1959_vm4, %v5709_v6, %v5710_v14 }
 0x264   : > { %v5739_v26 = vunpack.i.l.bf16 %v5738_v58  ;;  %v4984_v29 = vpack.c.bf16 %v1976_v3, %v1881_v31  ;;  %v1788_v42 = vsel %vm1769_vm2, %v5734_v10, %v5735_v8  ;;  %v5740_v13 = vunpack.i.h.bf16 %v5738_v58 }
 0x265   : > { %4979 = vmatprep.subr.bf16.mxu0 %v4978_v24  ;;  %v4996_v50 = vpack.c.bf16 %v1788_v42, %v6786_v7  ;;  %v2071_v7 = vsel %vm2054_vm5, %v5714_v22, %v5715_v25  ;;  %v5725_v58 = vunpack.i.h.bf16 %v7249_v21 }
 0x266   : > { %4981 = vmatpush1.bf16.msra.mxu0 %v4980_v0  ;;  %v7298_v37 = vpop.permute.xlu0 %2331  ;;  %v1882_v2 = vsel %vm1864_vm3, %v5705_v53, %v5739_v26  ;;  %v4988_v47 = vpack.c.bf16 %v2166_v11, %v2071_v7  ;;  %v1883_v22 = vsel %vm1864_vm3, %v5739_v26, %v5740_v13  ;;  %v2356_v26 = vsel %vm2339_vm8, %v5729_v54, %v5730_v12 }
 0x267   : > { %v5743_v19 = vpop.permute.xlu1 %5742  ;;  %v2261_v54 = vsel %vm2244_vm7, %v5724_v44, %v5725_v58 }
 0x268   : > { %v5744_v17 = vunpack.i.l.bf16 %v5743_v19  ;;  %v5745_v59 = vunpack.i.h.bf16 %v5743_v19 }
 0x26a   : > { %v7304_v1 = vpop.permute.xlu0 %5767  ;;  %v1977_v61 = vsel %vm1959_vm4, %v5710_v14, %v5744_v17  ;;  %v1978_v33 = vsel %vm1959_vm4, %v5744_v17, %v5745_v59 }
 0x26b   : > { %v5748_v23 = vpop.permute.xlu1 %5747  ;;  %v5769_v5 = vunpack.i.l.bf16 %v7304_v1  ;;  %v4982_v46 = vpack.c.bf16 %v1977_v61, %v1882_v2  ;;  %v5000_v24 = vpack.c.bf16 %v1978_v33, %v1883_v22 }
 0x26c   : > { %v5749_v45 = vunpack.i.l.bf16 %v5748_v23  ;;  %v5750_v20 = vunpack.i.h.bf16 %v5748_v23 }
 0x26d   : > { %4983 = vmatprep.subr.bf16.mxu0 %v4982_v46  ;;  %v1789_v6 = vsel %vm1769_vm2, %v5735_v8, %v5769_v5 }
 0x26e   : > { %4985 = vmatpush1.bf16.msra.mxu0 %v4984_v29  ;;  %v7317_v38 = vpop.permute.xlu0 %5772  ;;  %v4994_v35 = vpack.c.bf16 %v1789_v6, %v6788_v48  ;;  %v2072_v48 = vsel %vm2054_vm5, %v5715_v25, %v5749_v45  ;;  %v2073_v3 = vsel %vm2054_vm5, %v5749_v45, %v5750_v20 }
 0x26f   : > { %v5753_v30 = vpop.permute.xlu1 %5752  ;;  %v5774_v15 = vunpack.i.l.bf16 %v7317_v38 }
 0x270   : > { %v5754_v32 = vunpack.i.l.bf16 %v5753_v30  ;;  %4995 = vmatprep.subr.bf16.mxu1 %v4994_v35  ;;  %v5755_v57 = vunpack.i.h.bf16 %v5753_v30  ;;  %v4992_v35 = vpack.c.bf16 %v2356_v26, %v2261_v54  ;;  %v5770_v30 = vunpack.i.h.bf16 %v7304_v1  ;;  %v7389_v1 = vld [vmem:[%s8642_s3] sm:$0xff] }
 0x271   : > { %4997 = vmatpush1.bf16.msra.mxu1 %v4996_v50  ;;  %v1884_v39 = vsel %vm1864_vm3, %v5740_v13, %v5774_v15 }
 0x272   : > { %v7326_v27 = vpop.permute.xlu0 %5777  ;;  %v2167_v4 = vsel %vm2149_vm6, %v5720_v62, %v5754_v32  ;;  %v2168_v19 = vsel %vm2149_vm6, %v5754_v32, %v5755_v57  ;;  %v2169_v61 = vsel %vm2149_vm6, %v5755_v57, %v7282_v55  ;;  %v1790_v7 = vsel %vm1769_vm2, %v5769_v5, %v5770_v30 }
 0x273   : > { %v5758_v51 = vpop.permute.xlu1 %5757  ;;  %v5779_v40 = vunpack.i.l.bf16 %v7326_v27  ;;  %v4986_v34 = vpack.c.bf16 %v2167_v4, %v2072_v48  ;;  %v5004_v42 = vpack.c.bf16 %v2168_v19, %v2073_v3  ;;  %v2451_v4 = vsel %vm2434_vm9, %v7175_v18, %v7272_v49 }
 0x274   : > { %v5759_v10 = vunpack.i.l.bf16 %v5758_v51  ;;  %v5760_v0 = vunpack.i.h.bf16 %v5758_v51  ;;  %v5780_v51 = vunpack.i.h.bf16 %v7326_v27  ;;  %v5896_v19 = vmov 0.0|0.0  }
 0x275   : > { %4987 = vmatprep.subr.bf16.mxu0 %v4986_v34  ;;  %v1979_v43 = vsel %vm1959_vm4, %v5745_v59, %v5779_v40  ;;  %v2452_v59 = vsel %vm2434_vm9, %v7272_v49, %v7274_v41 }
 0x276   : > { %4989 = vmatpush1.bf16.msra.mxu0 %v4988_v47  ;;  %v7343_v28 = vpop.permute.xlu0 %5782  ;;  %v4998_v9 = vpack.c.bf16 %v1979_v43, %v1884_v39  ;;  %v2262_v23 = vsel %vm2244_vm7, %v5725_v58, %v5759_v10  ;;  %v2264_v45 = vsel %vm2244_vm7, %v5760_v0, %v7289_v52  ;;  %v2263_v21 = vsel %vm2244_vm7, %v5759_v10, %v5760_v0 }
 0x277   : > { %v5763_v14 = vpop.permute.xlu1 %5762  ;;  %v5784_v53 = vunpack.i.l.bf16 %v7343_v28  ;;  %v1980_v10 = vsel %vm1959_vm4, %v5779_v40, %v5780_v51 }
 0x278   : > { %v5765_v8 = vunpack.i.h.bf16 %v5763_v14  ;;  %v5764_v17 = vunpack.i.l.bf16 %v5763_v14  ;;  %4999 = vmatprep.subr.bf16.mxu1 %v4998_v9  ;;  %v5785_v9 = vunpack.i.h.bf16 %v7343_v28 }
 0x279   : > { %5001 = vmatpush1.bf16.msra.mxu1 %v5000_v24  ;;  %v2074_v2 = vsel %vm2054_vm5, %v5750_v20, %v5784_v53  ;;  %v5012_v20 = vpack.c.bf16 %v1790_v7, %v6812_v60 }
 0x27a   : > { %v2425_v31 = vpop.permute.xlu0 %2424  ;;  %v2357_v46 = vsel %vm2339_vm8, %v5730_v12, %v5764_v17  ;;  %v5002_v29 = vpack.c.bf16 %v2169_v61, %v2074_v2  ;;  %v2359_v36 = vsel %vm2339_vm8, %v5765_v8, %v7298_v37  ;;  %v2358_v25 = vsel %vm2339_vm8, %v5764_v17, %v5765_v8 }
 0x27b   : > { %v7364_v62 = vpop.permute.xlu1 %2426  ;;  %v4990_v6 = vpack.c.bf16 %v2357_v46, %v2262_v23  ;;  %v5006_v50 = vpack.c.bf16 %v2359_v36, %v2264_v45  ;;  %v5008_v32 = vpack.c.bf16 %v2358_v25, %v2263_v21  ;;  %v5775_v12 = vunpack.i.h.bf16 %v7317_v38 }
 0x27c   : > { %5003 = vmatprep.subr.bf16.mxu1 %v5002_v29  ;;  %v2454_v34 = vsel %vm2434_vm9, %v2425_v31, %v7364_v62  ;;  %v2453_v39 = vsel %vm2434_vm9, %v7274_v41, %v2425_v31  ;;  %v2075_v38 = vsel %vm2054_vm5, %v5784_v53, %v5785_v9 }
 0x27d   : > { %4991 = vmatprep.subr.bf16.mxu0 %v4990_v6  ;;  %5005 = vmatpush1.bf16.msra.mxu1 %v5004_v42  ;;  %v1885_v27 = vsel %vm1864_vm3, %v5774_v15, %v5775_v12 }
 0x27e   : > { %4993 = vmatpush1.bf16.msra.mxu0 %v4992_v35  ;;  %v5793_v44 = vpop.permute.xlu0 %5792  ;;  %5007 = vmatprep.subr.bf16.mxu1 %v5006_v50  ;;  %v5016_v8 = vpack.c.bf16 %v1980_v10, %v1885_v27  ;;  %v3382_v10 = vld [vmem:[%s8644_s5 + $0xf0] sm:$0xff] }
 0x27f   : > { %v5788_v11 = vpop.permute.xlu1 %5787  ;;  %3071 = vmatprep.subr.mxu0 %v2452_v59  ;;  %v5794_v47 = vunpack.i.l.bf16 %v5793_v44  ;;  %v5795_v58 = vunpack.i.h.bf16 %v5793_v44  ;;  %v3398_v27 = vld [vmem:[%s8644_s5 + $0x170] sm:$0xff] }
 0x280   : > { %v5790_v13 = vunpack.i.h.bf16 %v5788_v11  ;;  %v5789_v48 = vunpack.i.l.bf16 %v5788_v11 }
 0x281   : > { %5009 = vmatpush1.bf16.msra.mxu1 %v5008_v32  ;;  %v1886_v41 = vsel %vm1864_vm3, %v5775_v12, %v5794_v47  ;;  %v1887_v15 = vsel %vm1864_vm3, %v5794_v47, %v5795_v58  ;;  %v3371_v12 = vld [vmem:[%s8644_s5 + $0x98] sm:$0xff]  ;;  %v3370_v58 = vld [vmem:[%s8644_s5 + $0x90] sm:$0xff] }
 0x282   : > { %3072 = vmatpush1.msra.mxu0 %v2451_v4  ;;  %v5803_v33 = vpop.permute.xlu0 %5802  ;;  %3141 = vmatprep.subr.mxu1 %v2454_v34  ;;  %v1791_v57 = vsel %vm1769_vm2, %v5770_v30, %v5789_v48  ;;  %v1792_v18 = vsel %vm1769_vm2, %v5789_v48, %v5790_v13  ;;  %v3362_v4 = vld [vmem:[%s8644_s5 + $0x50] sm:$0xff]  ;;  %v3361_v34 = vld [vmem:[%s8644_s5 + $0x48] sm:$0xff] }
 0x283   : > { %v5798_v49 = vpop.permute.xlu1 %5797  ;;  %4576 = vmatmul.mubr.msk.f32.vlgmr.msra.gmra.mrb[18].mxu0 %vm2488_vm10, %v7389_v1  ;;  %v5010_v5 = vpack.c.bf16 %v1791_v57, %v6867_v63  ;;  %v5027_v63 = vpack.c.bf16 %v1792_v18, %v6954_v16  ;;  %v5804_v24 = vunpack.i.l.bf16 %v5803_v33  ;;  %v5805_v3 = vunpack.i.h.bf16 %v5803_v33  ;;  %v3355_v33 = vld [vmem:[%s8644_s5 + $0x18] sm:$0xff]  ;;  %v3364_v57 = vld [vmem:[%s8644_s5 + $0x60] sm:$0xff] }
 0x284   : > { %v5800_v43 = vunpack.i.h.bf16 %v5798_v49  ;;  %v5799_v22 = vunpack.i.l.bf16 %v5798_v49  ;;  %3260 = vmatprep.mubr.f32.mxu0 %v5886_v56 }
 0x285   : > { %5011 = vmatprep.subr.bf16.mxu0 %v5010_v5  ;;  %3142 = vmatpush1.msra.mxu1 %v2453_v39  ;;  %v2076_v23 = vsel %vm2054_vm5, %v5785_v9, %v5804_v24  ;;  %v2077_v35 = vsel %vm2054_vm5, %v5804_v24, %v5805_v3  ;;  %v3354_v39 = vld [vmem:[%s8644_s5 + $0x10] sm:$0xff]  ;;  %v5102_v9 = vpack.c.bf16 %v3364_v57, %v3355_v33  ;;  %v3388_v3 = vld [vmem:[%s8644_s5 + $0x120] sm:$0xff] }
 0x286   : > { %5013 = vmatpush1.bf16.msra.mxu0 %v5012_v20  ;;  %v2148_v60 = vpop.permute.xlu0 %2147  ;;  %4577 = vmatmul.mubr.msk.f32.vlgmr.msra.gmra.mrb[22].mxu1 %vm2488_vm10, %v7389_v1  ;;  %v1981_v0 = vsel %vm1959_vm4, %v5780_v51, %v5799_v22  ;;  %v1982_v40 = vsel %vm1959_vm4, %v5799_v22, %v5800_v43  ;;  %v3352_v51 = vld [vmem:[%s8644_s5] sm:$0xff]  ;;  %v3363_v43 = vld [vmem:[%s8644_s5 + $0x58] sm:$0xff]  ;;  %v3373_v22 = vld [vmem:[%s8644_s5 + $0xa8] sm:$0xff] }
 0x287   : > { %v5808_v14 = vpop.permute.xlu1 %5807  ;;  %5026 = vmatprep.subr.bf16.mxu1 %v5896_v19  ;;  %v5014_v16 = vpack.c.bf16 %v1981_v0, %v1886_v41  ;;  %4697 = vmatprep.mubr.msk.f32.mxu1 %vm5897_vm11, %v5886_v56  ;;  %v5030_v2 = vpack.c.bf16 %v1982_v40, %v1887_v15  ;;  %v3380_v20 = vld [vmem:[%s8644_s5 + $0xe0] sm:$0xff]  ;;  %v5104_v41 = vpack.c.bf16 %v3363_v43, %v3354_v39  ;;  %v3389_v0 = vld [vmem:[%s8644_s5 + $0x128] sm:$0xff]  ;;  %v3454_v33 = vld [vmem:[%s8644_s5 + $0x330] sm:$0xff] }
 0x288   : > { %v5810_v17 = vunpack.i.h.bf16 %v5808_v14  ;;  %v5809_v26 = vunpack.i.l.bf16 %v5808_v14  ;;  %5028 = vmatpush3.bf16.msra.mxu1 %v5027_v63  ;;  %v3379_v63 = vld [vmem:[%s8644_s5 + $0xd8] sm:$0xff]  ;;  %v5106_v14 = vpack.c.bf16 %v3382_v10, %v3373_v22  ;;  %v5046_v15 = vpack.c.bf16 %v3398_v27, %v3389_v0  ;;  %v3444_v43 = vld [vmem:[%s8644_s5 + $0x2e0] sm:$0xff] }
 0x289   : > { %5015 = vmatprep.subr.bf16.mxu0 %v5014_v16  ;;  %5029 = vmatprep.subr.bf16.mxu1 %v5896_v19  ;;  %v3372_v16 = vld [vmem:[%s8644_s5 + $0xa0] sm:$0xff]  ;;  %v3463_v10 = vld [vmem:[%s8644_s5 + $0x378] sm:$0xff] }
 0x28a   : > { %v2170_v61 = vsel %vm2149_vm6, %v7282_v55, %v5809_v26  ;;  %5017 = vmatpush1.bf16.msra.mxu0 %v5016_v8  ;;  %v5818_v31 = vpop.permute.xlu0 %5817  ;;  %v2171_v46 = vsel %vm2149_vm6, %v5809_v26, %v5810_v17  ;;  %v2172_v28 = vsel %vm2149_vm6, %v5810_v17, %v2148_v60  ;;  %v5042_v60 = vpack.c.bf16 %v3380_v20, %v3371_v12  ;;  %v3381_v8 = vld [vmem:[%s8644_s5 + $0xe8] sm:$0xff]  ;;  %v3391_v26 = vld [vmem:[%s8644_s5 + $0x138] sm:$0xff]  ;;  %v3442_v12 = vld [vmem:[%s8644_s5 + $0x2d0] sm:$0xff] }
 0x28b   : > { %v5020_v29 = vpack.c.bf16 %v2170_v61, %v2075_v38  ;;  %v5813_v53 = vpop.permute.xlu1 %5812  ;;  %v5820_v36 = vunpack.i.h.bf16 %v5818_v31  ;;  %v5819_v54 = vunpack.i.l.bf16 %v5818_v31  ;;  %v5018_v45 = vpack.c.bf16 %v2171_v46, %v2076_v23  ;;  %v3400_v38 = vld [vmem:[%s8644_s5 + $0x180] sm:$0xff]  ;;  %v3407_v31 = vld [vmem:[%s8644_s5 + $0x1b8] sm:$0xff]  ;;  %v3390_v46 = vld [vmem:[%s8644_s5 + $0x130] sm:$0xff] }
 0x28c   : > { %v5815_v42 = vunpack.i.h.bf16 %v5813_v53  ;;  %v5814_v6 = vunpack.i.l.bf16 %v5813_v53  ;;  %5031 = vmatpush3.bf16.msra.mxu1 %v5030_v2  ;;  %v5033_v50 = vpack.c.bf16 %v2172_v28, %v2077_v35  ;;  %v5044_v17 = vpack.c.bf16 %v3379_v63, %v3370_v58  ;;  %v3397_v2 = vld [vmem:[%s8644_s5 + $0x168] sm:$0xff]  ;;  %v3470_v20 = vld [vmem:[%s8644_s5 + $0x3b0] sm:$0xff]  ;;  %v3460_v63 = vld [vmem:[%s8644_s5 + $0x360] sm:$0xff] }
 0x28d   : > { %v2360_v55 = vsel %vm2339_vm8, %v7298_v37, %v5819_v54  ;;  %5032 = vmatprep.subr.bf16.mxu1 %v5896_v19  ;;  %v2361_v25 = vsel %vm2339_vm8, %v5819_v54, %v5820_v36  ;;  %5019 = vmatprep.subr.bf16.mxu0 %v5018_v45  ;;  %v5108_v61 = vpack.c.bf16 %v3381_v8, %v3372_v16  ;;  %v3409_v53 = vld [vmem:[%s8644_s5 + $0x1c8] sm:$0xff]  ;;  %v3488_v0 = vld [vmem:[%s8644_s5 + $0x440] sm:$0xff] }
 0x28e   : > { %v2265_v30 = vsel %vm2244_vm7, %v7289_v52, %v5814_v6  ;;  %v2338_v21 = vpop.permute.xlu0 %2337  ;;  %v2266_v44 = vsel %vm2244_vm7, %v5814_v6, %v5815_v42  ;;  %5021 = vmatpush1.bf16.msra.mxu0 %v5020_v29  ;;  %v3353_v52 = vld [vmem:[%s8644_s5 + $0x8] sm:$0xff]  ;;  %v5110_v23 = vpack.c.bf16 %v3400_v38, %v3391_v26  ;;  %v3399_v29 = vld [vmem:[%s8644_s5 + $0x178] sm:$0xff]  ;;  %v5048_v28 = vpack.c.bf16 %v3397_v2, %v3388_v3  ;;  %v3478_v38 = vld [vmem:[%s8644_s5 + $0x3f0] sm:$0xff] }
 0x28f   : > { %v5024_v59 = vpack.c.bf16 %v2360_v55, %v2265_v30  ;;  %v2243_v32 = vpop.permute.xlu1 %2242  ;;  %v2362_v11 = vsel %vm2339_vm8, %v5820_v36, %v2338_v21  ;;  %v5022_v13 = vpack.c.bf16 %v2361_v25, %v2266_v44  ;;  %v5038_v5 = vpack.c.bf16 %v3362_v4, %v3353_v52  ;;  %v3418_v36 = vld [vmem:[%s8644_s5 + $0x210] sm:$0xff]  ;;  %v3415_v6 = vld [vmem:[%s8644_s5 + $0x1f8] sm:$0xff]  ;;  %v3425_v35 = vld [vmem:[%s8644_s5 + $0x248] sm:$0xff] }
 0x290   : > { %v2267_v37 = vsel %vm2244_vm7, %v5815_v42, %v2243_v32  ;;  %5034 = vmatpush3.bf16.msra.mxu1 %v5033_v50  ;;  %v3406_v42 = vld [vmem:[%s8644_s5 + $0x1b0] sm:$0xff]  ;;  %v5112_v45 = vpack.c.bf16 %v3399_v29, %v3390_v46  ;;  %v5114_v25 = vpack.c.bf16 %v3418_v36, %v3409_v53  ;;  %v3408_v50 = vld [vmem:[%s8644_s5 + $0x1c0] sm:$0xff]  ;;  %v3417_v30 = vld [vmem:[%s8644_s5 + $0x208] sm:$0xff] }
 0x291   : > { %v5036_v48 = vpack.c.bf16 %v2362_v11, %v2267_v37  ;;  %5023 = vmatprep.subr.bf16.mxu0 %v5022_v13  ;;  %5035 = vmatprep.subr.bf16.mxu1 %v5896_v19  ;;  %v3434_v55 = vld [vmem:[%s8644_s5 + $0x290] sm:$0xff]  ;;  %v5052_v21 = vpack.c.bf16 %v3415_v6, %v3406_v42  ;;  %v3427_v44 = vld [vmem:[%s8644_s5 + $0x258] sm:$0xff]  ;;  %v3424_v11 = vld [vmem:[%s8644_s5 + $0x240] sm:$0xff]  ;;  %v5116_v37 = vpack.c.bf16 %v3417_v30, %v3408_v50 }
 0x292   : > { %v2431_v7 = vpop.permute.xlu0 %2430  ;;  %5025 = vmatpush1.bf16.msra.mxu0 %v5024_v59  ;;  %v3436_v59 = vld [vmem:[%s8644_s5 + $0x2a0] sm:$0xff]  ;;  %v5054_v32 = vpack.c.bf16 %v3434_v55, %v3425_v35  ;;  %v3433_v13 = vld [vmem:[%s8644_s5 + $0x288] sm:$0xff]  ;;  %v3499_v29 = vld [vmem:[%s8644_s5 + $0x498] sm:$0xff] }
 0x293   : > { %v2429_v47 = vpop.permute.xlu1 %2428  ;;  %v3452_v52 = vld [vmem:[%s8644_s5 + $0x320] sm:$0xff]  ;;  %v5118_v4 = vpack.c.bf16 %v3436_v59, %v3427_v44  ;;  %v3481_v8 = vld [vmem:[%s8644_s5 + $0x408] sm:$0xff]  ;;  %v3515_v6 = vld [vmem:[%s8644_s5 + $0x518] sm:$0xff] }
 0x294   : > { %v2455_v18 = vsel %vm2434_vm9, %v7364_v62, %v2429_v47  ;;  %5037 = vmatpush3.bf16.msra.mxu1 %v5036_v48  ;;  %v2456_v49 = vsel %vm2434_vm9, %v2429_v47, %v2431_v7  ;;  %v5040_v62 = vpack.c.bf16 %v3361_v34, %v3352_v51  ;;  %v3443_v48 = vld [vmem:[%s8644_s5 + $0x2d8] sm:$0xff]  ;;  %v5056_v34 = vpack.c.bf16 %v3433_v13, %v3424_v11  ;;  %v3445_v47 = vld [vmem:[%s8644_s5 + $0x2e8] sm:$0xff]  ;;  %v3496_v36 = vld [vmem:[%s8644_s5 + $0x480] sm:$0xff] }
 0x295   : > { %3212 = vmatprep.subr.mxu0 %v2456_v49  ;;  %4695 = vmatprep.subr.mxu1 %v5886_v56  ;;  %v3435_v51 = vld [vmem:[%s8644_s5 + $0x298] sm:$0xff]  ;;  %v5058_v57 = vpack.c.bf16 %v3452_v52, %v3443_v48  ;;  %v5122_v39 = vpack.c.bf16 %v3454_v33, %v3445_v47  ;;  %v3497_v2 = vld [vmem:[%s8644_s5 + $0x488] sm:$0xff]  ;;  %v3498_v55 = vld [vmem:[%s8644_s5 + $0x490] sm:$0xff] }
 0x296   : > { %3213 = vmatpush1.msra.mxu0 %v2455_v18  ;;  %v3451_v18 = vld [vmem:[%s8644_s5 + $0x318] sm:$0xff]  ;;  %v3526_v44 = vld [vmem:[%s8644_s5 + $0x570] sm:$0xff]  ;;  %v3525_v47 = vld [vmem:[%s8644_s5 + $0x568] sm:$0xff] }
 0x297   : > { %v2433_v24 = vpop.permute.xlu1 %2432  ;;  %4578 = vmatmul.mubr.msk.f32.vlgmr.msra.gmra.mrb[20].mxu0 %vm2488_vm10, %v7389_v1  ;;  %5039 = vmatprep.subr.bf16.mxu0 %v5038_v5  ;;  %v3461_v5 = vld [vmem:[%s8644_s5 + $0x368] sm:$0xff]  ;;  %v5060_v22 = vpack.c.bf16 %v3451_v18, %v3442_v12  ;;  %v3514_v13 = vld [vmem:[%s8644_s5 + $0x510] sm:$0xff]  ;;  %v3535_v12 = vld [vmem:[%s8644_s5 + $0x5b8] sm:$0xff] }
 0x298   : > { %v2457_v40 = vsel %vm2434_vm9, %v2431_v7, %v2433_v24  ;;  %5041 = vmatpush1.bf16.msra.mxu0 %v5040_v62  ;;  %v3426_v7 = vld [vmem:[%s8644_s5 + $0x250] sm:$0xff]  ;;  %v3453_v62 = vld [vmem:[%s8644_s5 + $0x328] sm:$0xff]  ;;  %v5062_v58 = vpack.c.bf16 %v3470_v20, %v3461_v5  ;;  %v3544_v18 = vld [vmem:[%s8644_s5 + $0x600] sm:$0xff] }
 0x299   : > { %4696 = vmatpush3.msra.mxu1 %v2457_v40  ;;  %5043 = vmatprep.subr.bf16.mxu0 %v5042_v60  ;;  %v5120_v49 = vpack.c.bf16 %v3435_v51, %v3426_v7  ;;  %v3469_v24 = vld [vmem:[%s8644_s5 + $0x3a8] sm:$0xff]  ;;  %v5124_v60 = vpack.c.bf16 %v3453_v62, %v3444_v43  ;;  %v3462_v40 = vld [vmem:[%s8644_s5 + $0x370] sm:$0xff]  ;;  %v3532_v5 = vld [vmem:[%s8644_s5 + $0x5a0] sm:$0xff] }
 0x29a   : > { %4698 = vmatmul.mubr.msk.f32.vlgmr.msra.gmra.mrb[24].mxu1 %vm2488_vm10, %v7389_v1  ;;  %5103 = vmatprep.subr.bf16.mxu1 %v5102_v9  ;;  %v3416_v1 = vld [vmem:[%s8644_s5 + $0x200] sm:$0xff]  ;;  %v5064_v16 = vpack.c.bf16 %v3469_v24, %v3460_v63  ;;  %v3542_v7 = vld [vmem:[%s8644_s5 + $0x5f0] sm:$0xff]  ;;  %v3541_v20 = vld [vmem:[%s8644_s5 + $0x5e8] sm:$0xff] }
 0x29b   : > { %5105 = vmatpush1.bf16.msra.mxu1 %v5104_v41  ;;  %v5050_v54 = vpack.c.bf16 %v3416_v1, %v3407_v31  ;;  %v3472_v9 = vld [vmem:[%s8644_s5 + $0x3c0] sm:$0xff]  ;;  %v3479_v41 = vld [vmem:[%s8644_s5 + $0x3f8] sm:$0xff]  ;;  %v3553_v63 = vld [vmem:[%s8644_s5 + $0x648] sm:$0xff] }
 0x29c   : > { %5107 = vmatprep.subr.bf16.mxu1 %v5106_v14  ;;  %5045 = vmatpush1.bf16.msra.mxu0 %v5044_v17  ;;  %v5126_v27 = vpack.c.bf16 %v3472_v9, %v3463_v10  ;;  %v3471_v14 = vld [vmem:[%s8644_s5 + $0x3b8] sm:$0xff]  ;;  %v3490_v17 = vld [vmem:[%s8644_s5 + $0x450] sm:$0xff]  ;;  %v5066_v26 = vpack.c.bf16 %v3488_v0, %v3479_v41  ;;  %v3480_v1 = vld [vmem:[%s8644_s5 + $0x400] sm:$0xff] }
 0x29d   : > { %5047 = vmatprep.subr.bf16.mxu0 %v5046_v15  ;;  %v3487_v15 = vld [vmem:[%s8644_s5 + $0x438] sm:$0xff]  ;;  %v5128_v3 = vpack.c.bf16 %v3471_v14, %v3462_v40  ;;  %v5130_v31 = vpack.c.bf16 %v3490_v17, %v3481_v8  ;;  %v3560_v62 = vld [vmem:[%s8644_s5 + $0x680] sm:$0xff]  ;;  %v3534_v10 = vld [vmem:[%s8644_s5 + $0x5b0] sm:$0xff] }
 0x29e   : > { %v5068_v46 = vpack.c.bf16 %v3487_v15, %v3478_v38  ;;  %v3551_v43 = vld [vmem:[%s8644_s5 + $0x638] sm:$0xff]  ;;  %v3562_v24 = vld [vmem:[%s8644_s5 + $0x690] sm:$0xff]  ;;  %v3569_v40 = vld [vmem:[%s8644_s5 + $0x6c8] sm:$0xff] }
 0x29f   : > { %5109 = vmatpush1.bf16.msra.mxu1 %v5108_v61  ;;  %v3506_v61 = vld [vmem:[%s8644_s5 + $0x4d0] sm:$0xff]  ;;  %v3543_v9 = vld [vmem:[%s8644_s5 + $0x5f8] sm:$0xff]  ;;  %v3552_v8 = vld [vmem:[%s8644_s5 + $0x640] sm:$0xff] }
 0x2a0   : > { %5111 = vmatprep.subr.bf16.mxu1 %v5110_v23  ;;  %5049 = vmatpush1.bf16.msra.mxu0 %v5048_v28  ;;  %v3489_v23 = vld [vmem:[%s8644_s5 + $0x448] sm:$0xff]  ;;  %v3508_v28 = vld [vmem:[%s8644_s5 + $0x4e0] sm:$0xff]  ;;  %v5070_v53 = vpack.c.bf16 %v3506_v61, %v3497_v2  ;;  %v3550_v41 = vld [vmem:[%s8644_s5 + $0x630] sm:$0xff] }
 0x2a1   : > { %5051 = vmatprep.subr.bf16.mxu0 %v5050_v54  ;;  %v3505_v54 = vld [vmem:[%s8644_s5 + $0x4c8] sm:$0xff]  ;;  %v5132_v42 = vpack.c.bf16 %v3489_v23, %v3480_v1  ;;  %v5134_v35 = vpack.c.bf16 %v3508_v28, %v3499_v29  ;;  %v3559_v0 = vld [vmem:[%s8644_s5 + $0x678] sm:$0xff]  ;;  %v3578_v14 = vld [vmem:[%s8644_s5 + $0x710] sm:$0xff] }
 0x2a2   : > { %v5072_v30 = vpack.c.bf16 %v3505_v54, %v3496_v36  ;;  %v3561_v17 = vld [vmem:[%s8644_s5 + $0x688] sm:$0xff]  ;;  %v3571_v38 = vld [vmem:[%s8644_s5 + $0x6d8] sm:$0xff]  ;;  %v3580_v15 = vld [vmem:[%s8644_s5 + $0x720] sm:$0xff] }
 0x2a3   : > { %5113 = vmatpush1.bf16.msra.mxu1 %v5112_v45  ;;  %v3524_v45 = vld [vmem:[%s8644_s5 + $0x560] sm:$0xff]  ;;  %v7674_v59 = vpop.permute.xlu0 %2485  ;;  %v3577_v61 = vld [vmem:[%s8644_s5 + $0x708] sm:$0xff]  ;;  %v3587_v1 = vld [vmem:[%s8644_s5 + $0x758] sm:$0xff] }
 0x2a4   : > { %5115 = vmatprep.subr.bf16.mxu1 %v5114_v25  ;;  %5053 = vmatpush1.bf16.msra.mxu0 %v5052_v21  ;;  %v3507_v25 = vld [vmem:[%s8644_s5 + $0x4d8] sm:$0xff]  ;;  %v3517_v21 = vld [vmem:[%s8644_s5 + $0x528] sm:$0xff]  ;;  %v5074_v11 = vpack.c.bf16 %v3524_v45, %v3515_v6  ;;  %v3568_v2 = vld [vmem:[%s8644_s5 + $0x6c0] sm:$0xff] }
 0x2a5   : > { %5055 = vmatprep.subr.bf16.mxu0 %v5054_v32  ;;  %v5136_v52 = vpack.c.bf16 %v3507_v25, %v3498_v55  ;;  %v5138_v51 = vpack.c.bf16 %v3526_v44, %v3517_v21  ;;  %v3596_v23 = vld [vmem:[%s8644_s5 + $0x7a0] sm:$0xff]  ;;  %v3570_v29 = vld [vmem:[%s8644_s5 + $0x6d0] sm:$0xff]  ;;  %v3579_v28 = vld [vmem:[%s8644_s5 + $0x718] sm:$0xff] }
 0x2a6   : > { %v3589_v36 = vld [vmem:[%s8644_s5 + $0x768] sm:$0xff]  ;;  %v3598_v54 = vld [vmem:[%s8644_s5 + $0x7b0] sm:$0xff]  ;;  %v3595_v45 = vld [vmem:[%s8644_s5 + $0x798] sm:$0xff] }
 0x2a7   : > { %5117 = vmatpush1.bf16.msra.mxu1 %v5116_v37  ;;  %v3523_v37 = vld [vmem:[%s8644_s5 + $0x558] sm:$0xff]  ;;  %v3586_v6 = vld [vmem:[%s8644_s5 + $0x750] sm:$0xff]  ;;  %v3605_v55 = vld [vmem:[%s8644_s5 + $0x7e8] sm:$0xff] }
 0x2a8   : > { %5119 = vmatprep.subr.bf16.mxu1 %v5118_v4  ;;  %5057 = vmatpush1.bf16.msra.mxu0 %v5056_v34  ;;  %v3533_v4 = vld [vmem:[%s8644_s5 + $0x5a8] sm:$0xff]  ;;  %v3516_v34 = vld [vmem:[%s8644_s5 + $0x520] sm:$0xff]  ;;  %v3614_v25 = vld [vmem:[%s8644_s5 + $0x830] sm:$0xff] }
 0x2a9   : > { %5059 = vmatprep.subr.bf16.mxu0 %v5058_v57  ;;  %v5076_v57 = vpack.c.bf16 %v3523_v37, %v3514_v13  ;;  %v3588_v21 = vld [vmem:[%s8644_s5 + $0x760] sm:$0xff]  ;;  %v3597_v44 = vld [vmem:[%s8644_s5 + $0x7a8] sm:$0xff]  ;;  %v5094_v37 = vpack.c.bf16 %v3614_v25, %v3605_v55 }
 0x2aa   : > { %v3616_v13 = vld [vmem:[%s8644_s5 + $0x840] sm:$0xff] }
 0x2ab   : > { %5121 = vmatpush1.bf16.msra.mxu1 %v5120_v49  ;;  %v5078_v49 = vpack.c.bf16 %v3542_v7, %v3533_v4  ;;  %v5156_v4 = vpack.c.bf16 %v3597_v44, %v3588_v21  ;;  %v3623_v7 = vld [vmem:[%s8644_s5 + $0x878] sm:$0xff]  ;;  %v3392_v25 = vld [vmem:[%s8644_s5 + $0x140] sm:$0xff] }
 0x2ac   : > { %5123 = vmatprep.subr.bf16.mxu1 %v5122_v39  ;;  %5061 = vmatpush1.bf16.msra.mxu0 %v5060_v22  ;;  %v5140_v39 = vpack.c.bf16 %v3525_v47, %v3516_v34  ;;  %v5142_v22 = vpack.c.bf16 %v3544_v18, %v3535_v12  ;;  %v3606_v47 = vld [vmem:[%s8644_s5 + $0x7f0] sm:$0xff]  ;;  %v3625_v18 = vld [vmem:[%s8644_s5 + $0x888] sm:$0xff]  ;;  %v3411_v44 = vld [vmem:[%s8644_s5 + $0x1d8] sm:$0xff] }
 0x2ad   : > { %5063 = vmatprep.subr.bf16.mxu0 %v5062_v58  ;;  %v5080_v58 = vpack.c.bf16 %v3541_v20, %v3532_v5 }
 0x2af   : > { %5125 = vmatpush1.bf16.msra.mxu1 %v5124_v60  ;;  %v5082_v60 = vpack.c.bf16 %v3560_v62, %v3551_v43  ;;  %v3631_v43 = vld [vmem:[%s8644_s5 + $0x8b8] sm:$0xff] }
 0x2b0   : > { %5127 = vmatprep.subr.bf16.mxu1 %v5126_v27  ;;  %5065 = vmatpush1.bf16.msra.mxu0 %v5064_v16  ;;  %v5144_v27 = vpack.c.bf16 %v3543_v9, %v3534_v10  ;;  %v5146_v16 = vpack.c.bf16 %v3562_v24, %v3553_v63  ;;  %v3357_v10 = vld [vmem:[%s8644_s5 + $0x28] sm:$0xff]  ;;  %v3366_v9 = vld [vmem:[%s8644_s5 + $0x70] sm:$0xff]  ;;  %v3624_v63 = vld [vmem:[%s8644_s5 + $0x880] sm:$0xff] }
 0x2b1   : > { %5067 = vmatprep.subr.bf16.mxu0 %v5066_v26  ;;  %v5084_v26 = vpack.c.bf16 %v3559_v0, %v3550_v41  ;;  %v3633_v24 = vld [vmem:[%s8644_s5 + $0x8c8] sm:$0xff]  ;;  %v3359_v41 = vld [vmem:[%s8644_s5 + $0x38] sm:$0xff]  ;;  %v3368_v0 = vld [vmem:[%s8644_s5 + $0x80] sm:$0xff] }
 0x2b3   : > { %5129 = vmatpush1.bf16.msra.mxu1 %v5128_v3  ;;  %v5086_v3 = vpack.c.bf16 %v3578_v14, %v3569_v40  ;;  %v5166_v40 = vpack.c.bf16 %v3366_v9, %v3357_v10  ;;  %v3356_v14 = vld [vmem:[%s8644_s5 + $0x20] sm:$0xff]  ;;  %v3437_v9 = vld [vmem:[%s8644_s5 + $0x2a8] sm:$0xff] }
 0x2b4   : > { %5131 = vmatprep.subr.bf16.mxu1 %v5130_v31  ;;  %5069 = vmatpush1.bf16.msra.mxu0 %v5068_v46  ;;  %v5148_v31 = vpack.c.bf16 %v3561_v17, %v3552_v8  ;;  %v5150_v46 = vpack.c.bf16 %v3580_v15, %v3571_v38  ;;  %v5164_v8 = vpack.c.bf16 %v3633_v24, %v3624_v63  ;;  %v3375_v17 = vld [vmem:[%s8644_s5 + $0xb8] sm:$0xff]  ;;  %v3358_v38 = vld [vmem:[%s8644_s5 + $0x30] sm:$0xff]  ;;  %v3428_v10 = vld [vmem:[%s8644_s5 + $0x260] sm:$0xff] }
 0x2b5   : > { %v7666_v50 = vpop.f32.mrb[12].mxu1  ;;  %5071 = vmatprep.subr.bf16.mxu0 %v5070_v53  ;;  %v5088_v53 = vpack.c.bf16 %v3577_v61, %v3568_v2  ;;  %v3367_v15 = vld [vmem:[%s8644_s5 + $0x78] sm:$0xff]  ;;  %v3377_v2 = vld [vmem:[%s8644_s5 + $0xc8] sm:$0xff]  ;;  %v3386_v61 = vld [vmem:[%s8644_s5 + $0x110] sm:$0xff] }
 0x2b6   : > { %v2560_v32 = vpop.f32.mrb[13].mxu1  ;;  %v3447_v63 = vld [vmem:[%s8644_s5 + $0x2f8] sm:$0xff]  ;;  %v3456_v24 = vld [vmem:[%s8644_s5 + $0x340] sm:$0xff] }
 0x2b7   : > { %v2561_v48 = vadd.f32 %v2560_v32, %v7674_v59  ;;  %5133 = vmatpush1.bf16.msra.mxu1 %v5132_v42  ;;  %v5090_v42 = vpack.c.bf16 %v3596_v23, %v3587_v1  ;;  %v5092_v32 = vpack.c.bf16 %v3595_v45, %v3586_v6  ;;  %v3374_v23 = vld [vmem:[%s8644_s5 + $0xb0] sm:$0xff]  ;;  %v3395_v45 = vld [vmem:[%s8644_s5 + $0x158] sm:$0xff] }
 0x2b8   : > { %5135 = vmatprep.subr.bf16.mxu1 %v5134_v35  ;;  %5073 = vmatpush1.bf16.msra.mxu0 %v5072_v30  ;;  %v5152_v35 = vpack.c.bf16 %v3579_v28, %v3570_v29  ;;  %v5154_v30 = vpack.c.bf16 %v3598_v54, %v3589_v36  ;;  %v5232_v29 = vpack.c.bf16 %v3367_v15, %v3358_v38  ;;  %v3393_v28 = vld [vmem:[%s8644_s5 + $0x148] sm:$0xff]  ;;  %v3376_v54 = vld [vmem:[%s8644_s5 + $0xc0] sm:$0xff] }
 0x2b9   : > { %v7695_v33 = vmax.f32 %v2561_v48, 0.0  ;;  %5075 = vmatprep.subr.bf16.mxu0 %v5074_v11  ;;  %v3607_v11 = vld [vmem:[%s8644_s5 + $0x7f8] sm:$0xff]  ;;  %v3604_v48 = vld [vmem:[%s8644_s5 + $0x7e0] sm:$0xff]  ;;  %v5234_v36 = vpack.c.bf16 %v3386_v61, %v3377_v2  ;;  %v3465_v15 = vld [vmem:[%s8644_s5 + $0x388] sm:$0xff] }
 0x2ba   : > { %v5158_v34 = vpack.c.bf16 %v3616_v13, %v3607_v11  ;;  %v3394_v13 = vld [vmem:[%s8644_s5 + $0x150] sm:$0xff] }
 0x2bb   : > { %3704 = vmatprep.mubr.f32.mxu0 %v7695_v33  ;;  %5137 = vmatpush1.bf16.msra.mxu1 %v5136_v52  ;;  %v3613_v52 = vld [vmem:[%s8644_s5 + $0x828] sm:$0xff] }
 0x2bc   : > { %3817 = vmatprep.mubr.f32.mxu1 %v7695_v33  ;;  %5139 = vmatprep.subr.bf16.mxu1 %v5138_v51  ;;  %v3632_v51 = vld [vmem:[%s8644_s5 + $0x8c0] sm:$0xff]  ;;  %v5096_v12 = vpack.c.bf16 %v3613_v52, %v3604_v48  ;;  %v3413_v52 = vld [vmem:[%s8644_s5 + $0x1e8] sm:$0xff] }
 0x2bd   : > { %5077 = vmatpush1.bf16.msra.mxu0 %v5076_v57  ;;  %v3615_v57 = vld [vmem:[%s8644_s5 + $0x838] sm:$0xff]  ;;  %v5098_v20 = vpack.c.bf16 %v3632_v51, %v3623_v7  ;;  %v3410_v51 = vld [vmem:[%s8644_s5 + $0x1d0] sm:$0xff] }
 0x2be   : > { %5079 = vmatprep.subr.bf16.mxu0 %v5078_v49  ;;  %v3634_v49 = vld [vmem:[%s8644_s5 + $0x8d0] sm:$0xff] }
 0x2bf   : > { %5141 = vmatpush1.bf16.msra.mxu1 %v5140_v39  ;;  %v3622_v39 = vld [vmem:[%s8644_s5 + $0x870] sm:$0xff] }
 0x2c0   : > { %5143 = vmatprep.subr.bf16.mxu1 %v5142_v22  ;;  %v5160_v22 = vpack.c.bf16 %v3615_v57, %v3606_v47  ;;  %v3429_v57 = vld [vmem:[%s8644_s5 + $0x268] sm:$0xff] }
 0x2c1   : > { %5081 = vmatpush1.bf16.msra.mxu0 %v5080_v58  ;;  %v5162_v58 = vpack.c.bf16 %v3634_v49, %v3625_v18  ;;  %v3412_v49 = vld [vmem:[%s8644_s5 + $0x1e0] sm:$0xff] }
 0x2c2   : > { %5083 = vmatprep.subr.bf16.mxu0 %v5082_v60  ;;  %v5100_v60 = vpack.c.bf16 %v3631_v43, %v3622_v39  ;;  %v3431_v39 = vld [vmem:[%s8644_s5 + $0x278] sm:$0xff]  ;;  %v3440_v43 = vld [vmem:[%s8644_s5 + $0x2c0] sm:$0xff] }
 0x2c3   : > { %5145 = vmatpush1.bf16.msra.mxu1 %v5144_v27  ;;  %v2559_v27 = vadd.f32 %v7666_v50, %v7674_v59  ;;  %v3384_v50 = vld [vmem:[%s8644_s5 + $0x100] sm:$0xff] }
 0x2c4   : > { %5147 = vmatprep.subr.bf16.mxu1 %v5146_v16  ;;  %v3365_v16 = vld [vmem:[%s8644_s5 + $0x68] sm:$0xff]  ;;  %v5170_v1 = vpack.c.bf16 %v3384_v50, %v3375_v17  ;;  %v3446_v17 = vld [vmem:[%s8644_s5 + $0x2f0] sm:$0xff]  ;;  %v3455_v50 = vld [vmem:[%s8644_s5 + $0x338] sm:$0xff] }
 0x2c5   : > { %5085 = vmatpush1.bf16.msra.mxu0 %v5084_v26  ;;  %v5230_v26 = vpack.c.bf16 %v3368_v0, %v3359_v41  ;;  %v5184_v41 = vpack.c.bf16 %v3437_v9, %v3428_v10  ;;  %v3430_v0 = vld [vmem:[%s8644_s5 + $0x270] sm:$0xff]  ;;  %v3512_v10 = vld [vmem:[%s8644_s5 + $0x500] sm:$0xff]  ;;  %v3519_v9 = vld [vmem:[%s8644_s5 + $0x538] sm:$0xff] }
 0x2c6   : > { %5087 = vmatprep.subr.bf16.mxu0 %v5086_v3  ;;  %v5168_v3 = vpack.c.bf16 %v3365_v16, %v3356_v14  ;;  %v5186_v16 = vpack.c.bf16 %v3456_v24, %v3447_v63 }
 0x2c7   : > { %5149 = vmatpush1.bf16.msra.mxu1 %v5148_v31  ;;  %v7877_v31 = vmax.f32 %v2559_v27, 0.0  ;;  %v3439_v27 = vld [vmem:[%s8644_s5 + $0x2b8] sm:$0xff] }
 0x2c8   : > { %5151 = vmatprep.subr.bf16.mxu1 %v5150_v46  ;;  %v3383_v46 = vld [vmem:[%s8644_s5 + $0xf8] sm:$0xff]  ;;  %v5248_v61 = vpack.c.bf16 %v3439_v27, %v3430_v0 }
 0x2c9   : > { %5089 = vmatpush1.bf16.msra.mxu0 %v5088_v53  ;;  %v3402_v53 = vld [vmem:[%s8644_s5 + $0x190] sm:$0xff]  ;;  %v5172_v6 = vpack.c.bf16 %v3383_v46, %v3374_v23  ;;  %v3448_v23 = vld [vmem:[%s8644_s5 + $0x300] sm:$0xff]  ;;  %v3457_v46 = vld [vmem:[%s8644_s5 + $0x348] sm:$0xff] }
 0x2ca   : > { %5091 = vmatprep.subr.bf16.mxu0 %v5090_v42  ;;  %v3385_v42 = vld [vmem:[%s8644_s5 + $0x108] sm:$0xff]  ;;  %v5174_v55 = vpack.c.bf16 %v3402_v53, %v3393_v28  ;;  %v3511_v0 = vld [vmem:[%s8644_s5 + $0x4f8] sm:$0xff] }
 0x2cb   : > { %5153 = vmatpush1.bf16.msra.mxu1 %v5152_v35  ;;  %v3404_v35 = vld [vmem:[%s8644_s5 + $0x1a0] sm:$0xff]  ;;  %v5236_v21 = vpack.c.bf16 %v3385_v42, %v3376_v54  ;;  %v3473_v42 = vld [vmem:[%s8644_s5 + $0x3c8] sm:$0xff] }
 0x2cc   : > { %5155 = vmatprep.subr.bf16.mxu1 %v5154_v30  ;;  %v3401_v30 = vld [vmem:[%s8644_s5 + $0x188] sm:$0xff]  ;;  %v5238_v11 = vpack.c.bf16 %v3404_v35, %v3395_v45  ;;  %v3464_v54 = vld [vmem:[%s8644_s5 + $0x380] sm:$0xff]  ;;  %v3483_v45 = vld [vmem:[%s8644_s5 + $0x418] sm:$0xff] }
 0x2cd   : > { %5093 = vmatpush1.bf16.msra.mxu0 %v5092_v32  ;;  %v3420_v32 = vld [vmem:[%s8644_s5 + $0x220] sm:$0xff]  ;;  %v5176_v48 = vpack.c.bf16 %v3401_v30, %v3392_v25  ;;  %v5192_v25 = vpack.c.bf16 %v3473_v42, %v3464_v54  ;;  %v3466_v30 = vld [vmem:[%s8644_s5 + $0x390] sm:$0xff]  ;;  %v3555_v54 = vld [vmem:[%s8644_s5 + $0x658] sm:$0xff] }
 0x2ce   : > { %v2629_v5 = vpop.f32.mrb[14].mxu1  ;;  %5095 = vmatprep.subr.bf16.mxu0 %v5094_v37  ;;  %v3403_v37 = vld [vmem:[%s8644_s5 + $0x198] sm:$0xff]  ;;  %v5178_v7 = vpack.c.bf16 %v3420_v32, %v3411_v44  ;;  %v3492_v35 = vld [vmem:[%s8644_s5 + $0x460] sm:$0xff] }
 0x2cf   : > { %v7831_v62 = vpop.f32.mrb[15].mxu1  ;;  %5157 = vmatpush1.bf16.msra.mxu1 %v5156_v4  ;;  %v3422_v4 = vld [vmem:[%s8644_s5 + $0x230] sm:$0xff]  ;;  %v5240_v47 = vpack.c.bf16 %v3403_v37, %v3394_v13  ;;  %v3421_v5 = vld [vmem:[%s8644_s5 + $0x228] sm:$0xff]  ;;  %v5194_v32 = vpack.c.bf16 %v3492_v35, %v3483_v45  ;;  %v3491_v37 = vld [vmem:[%s8644_s5 + $0x458] sm:$0xff] }
 0x2d0   : > { %5159 = vmatprep.subr.bf16.mxu1 %v5158_v34  ;;  %v3419_v34 = vld [vmem:[%s8644_s5 + $0x218] sm:$0xff]  ;;  %v5242_v18 = vpack.c.bf16 %v3422_v4, %v3413_v52  ;;  %v3482_v13 = vld [vmem:[%s8644_s5 + $0x410] sm:$0xff]  ;;  %v3501_v52 = vld [vmem:[%s8644_s5 + $0x4a8] sm:$0xff] }
 0x2d1   : > { %5097 = vmatpush1.bf16.msra.mxu0 %v5096_v12  ;;  %v3438_v12 = vld [vmem:[%s8644_s5 + $0x2b0] sm:$0xff]  ;;  %v3564_v42 = vld [vmem:[%s8644_s5 + $0x6a0] sm:$0xff] }
 0x2d2   : > { %5099 = vmatprep.subr.bf16.mxu0 %v5098_v20  ;;  %v5180_v20 = vpack.c.bf16 %v3419_v34, %v3410_v51  ;;  %v3510_v4 = vld [vmem:[%s8644_s5 + $0x4f0] sm:$0xff]  ;;  %v5196_v51 = vpack.c.bf16 %v3491_v37, %v3482_v13  ;;  %v3573_v13 = vld [vmem:[%s8644_s5 + $0x6e8] sm:$0xff] }
 0x2d3   : > { %5161 = vmatpush1.bf16.msra.mxu1 %v5160_v22  ;;  %v5182_v22 = vpack.c.bf16 %v3438_v12, %v3429_v57  ;;  %v3484_v57 = vld [vmem:[%s8644_s5 + $0x420] sm:$0xff]  ;;  %v3493_v12 = vld [vmem:[%s8644_s5 + $0x468] sm:$0xff]  ;;  %v3538_v35 = vld [vmem:[%s8644_s5 + $0x5d0] sm:$0xff] }
 0x2d4   : > { %5163 = vmatprep.subr.bf16.mxu1 %v5162_v58  ;;  %v5244_v58 = vpack.c.bf16 %v3421_v5, %v3412_v49  ;;  %v5260_v24 = vpack.c.bf16 %v3493_v12, %v3484_v57  ;;  %v3582_v37 = vld [vmem:[%s8644_s5 + $0x730] sm:$0xff]  ;;  %v3572_v57 = vld [vmem:[%s8644_s5 + $0x6e0] sm:$0xff]  ;;  %v3581_v12 = vld [vmem:[%s8644_s5 + $0x728] sm:$0xff] }
 0x2d5   : > { %5101 = vmatpush1.bf16.msra.mxu0 %v5100_v60  ;;  %v5246_v60 = vpack.c.bf16 %v3440_v43, %v3431_v39  ;;  %v3500_v39 = vld [vmem:[%s8644_s5 + $0x4a0] sm:$0xff]  ;;  %v3509_v43 = vld [vmem:[%s8644_s5 + $0x4e8] sm:$0xff] }
 0x2d6   : > { %5167 = vmatprep.subr.bf16.mxu0 %v5166_v40  ;;  %v2631_v40 = vadd.f32 %v7831_v62, %v7674_v59  ;;  %v3458_v62 = vld [vmem:[%s8644_s5 + $0x350] sm:$0xff] }
 0x2d7   : > { %5165 = vmatpush1.bf16.msra.mxu1 %v5164_v8  ;;  %v3449_v8 = vld [vmem:[%s8644_s5 + $0x308] sm:$0xff] }
 0x2d8   : > { %3705 = vmatmul.mubr.f32.vlgmr.msra.gmra.mrb[22].mxu0 %v7877_v31  ;;  %5231 = vmatprep.subr.bf16.mxu1 %v5230_v26  ;;  %v5250_v28 = vpack.c.bf16 %v3458_v62, %v3449_v8  ;;  %v3518_v8 = vld [vmem:[%s8644_s5 + $0x530] sm:$0xff] }
 0x2d9   : > { %5169 = vmatpush1.bf16.msra.mxu0 %v5168_v3  ;;  %v3474_v3 = vld [vmem:[%s8644_s5 + $0x3d0] sm:$0xff] }
 0x2da   : > { %3818 = vmatmul.mubr.f32.vlgmr.msra.gmra.mrb[26].mxu1 %v7877_v31  ;;  %5171 = vmatprep.subr.bf16.mxu0 %v5170_v1  ;;  %v5188_v1 = vpack.c.bf16 %v3455_v50, %v3446_v17  ;;  %v5190_v53 = vpack.c.bf16 %v3474_v3, %v3465_v15  ;;  %v3527_v17 = vld [vmem:[%s8644_s5 + $0x578] sm:$0xff]  ;;  %v3530_v50 = vld [vmem:[%s8644_s5 + $0x590] sm:$0xff]  ;;  %v3520_v3 = vld [vmem:[%s8644_s5 + $0x540] sm:$0xff] }
 0x2db   : > { %5233 = vmatpush1.bf16.msra.mxu1 %v5232_v29  ;;  %v8000_v29 = vmax.f32 %v2631_v40, 0.0  ;;  %v5204_v15 = vpack.c.bf16 %v3527_v17, %v3518_v8  ;;  %v3592_v17 = vld [vmem:[%s8644_s5 + $0x780] sm:$0xff] }
 0x2dc   : > { %5235 = vmatprep.subr.bf16.mxu1 %v5234_v36  ;;  %v3467_v36 = vld [vmem:[%s8644_s5 + $0x398] sm:$0xff] }
 0x2dd   : > { %5173 = vmatpush1.bf16.msra.mxu0 %v5172_v6  ;;  %v3476_v6 = vld [vmem:[%s8644_s5 + $0x3e0] sm:$0xff] }
 0x2de   : > { %5175 = vmatprep.subr.bf16.mxu0 %v5174_v55  ;;  %v5252_v55 = vpack.c.bf16 %v3457_v46, %v3448_v23  ;;  %v5254_v44 = vpack.c.bf16 %v3476_v6, %v3467_v36  ;;  %v3539_v46 = vld [vmem:[%s8644_s5 + $0x5d8] sm:$0xff]  ;;  %v3548_v36 = vld [vmem:[%s8644_s5 + $0x620] sm:$0xff] }
 0x2df   : > { %5237 = vmatpush1.bf16.msra.mxu1 %v5236_v21  ;;  %v3475_v21 = vld [vmem:[%s8644_s5 + $0x3d8] sm:$0xff] }
 0x2e0   : > { %5239 = vmatprep.subr.bf16.mxu1 %v5238_v11  ;;  %v3485_v11 = vld [vmem:[%s8644_s5 + $0x428] sm:$0xff] }
 0x2e1   : > { %5177 = vmatpush1.bf16.msra.mxu0 %v5176_v48  ;;  %v3494_v48 = vld [vmem:[%s8644_s5 + $0x470] sm:$0xff] }
 0x2e2   : > { %5179 = vmatprep.subr.bf16.mxu0 %v5178_v7  ;;  %v5256_v7 = vpack.c.bf16 %v3475_v21, %v3466_v30  ;;  %v5210_v30 = vpack.c.bf16 %v3564_v42, %v3555_v54  ;;  %v3557_v21 = vld [vmem:[%s8644_s5 + $0x668] sm:$0xff]  ;;  %v3619_v54 = vld [vmem:[%s8644_s5 + $0x858] sm:$0xff] }
 0x2e3   : > { %5241 = vmatpush1.bf16.msra.mxu1 %v5240_v47  ;;  %v5258_v47 = vpack.c.bf16 %v3494_v48, %v3485_v11  ;;  %v3566_v11 = vld [vmem:[%s8644_s5 + $0x6b0] sm:$0xff] }
 0x2e4   : > { %5243 = vmatprep.subr.bf16.mxu1 %v5242_v18  ;;  %v5198_v18 = vpack.c.bf16 %v3510_v4, %v3501_v52  ;;  %v3556_v4 = vld [vmem:[%s8644_s5 + $0x660] sm:$0xff] }
 0x2e5   : > { %5181 = vmatpush1.bf16.msra.mxu0 %v5180_v20  ;;  %v3503_v20 = vld [vmem:[%s8644_s5 + $0x4b8] sm:$0xff] }
 0x2e6   : > { %v2699_v14 = vpop.f32.mrb[12].mxu0  ;;  %5183 = vmatprep.subr.bf16.mxu0 %v5182_v22  ;;  %v5262_v40 = vpack.c.bf16 %v3512_v10, %v3503_v20 }
 0x2e7   : > { %v2700_v26 = vadd.f32 %v2699_v14, %v7674_v59  ;;  %v2701_v38 = vpop.f32.mrb[13].mxu0  ;;  %5245 = vmatpush1.bf16.msra.mxu1 %v5244_v58  ;;  %v3528_v58 = vld [vmem:[%s8644_s5 + $0x580] sm:$0xff] }
 0x2e8   : > { %5247 = vmatprep.subr.bf16.mxu1 %v5246_v60  ;;  %v5200_v60 = vpack.c.bf16 %v3509_v43, %v3500_v39  ;;  %v5202_v14 = vpack.c.bf16 %v3528_v58, %v3519_v9  ;;  %v3546_v38 = vld [vmem:[%s8644_s5 + $0x610] sm:$0xff]  ;;  %v5216_v39 = vpack.c.bf16 %v3581_v12, %v3572_v57  ;;  %v3593_v58 = vld [vmem:[%s8644_s5 + $0x788] sm:$0xff] }
 0x2e9   : > { %v7992_v2 = vmax.f32 %v2700_v26, 0.0  ;;  %5185 = vmatpush1.bf16.msra.mxu0 %v5184_v41  ;;  %v3502_v41 = vld [vmem:[%s8644_s5 + $0x4b0] sm:$0xff]  ;;  %v3537_v26 = vld [vmem:[%s8644_s5 + $0x5c8] sm:$0xff] }
 0x2ea   : > { %5187 = vmatprep.subr.bf16.mxu0 %v5186_v16  ;;  %v3521_v16 = vld [vmem:[%s8644_s5 + $0x548] sm:$0xff]  ;;  %v5264_v62 = vpack.c.bf16 %v3511_v0, %v3502_v41  ;;  %v5206_v23 = vpack.c.bf16 %v3546_v38, %v3537_v26  ;;  %v3574_v43 = vld [vmem:[%s8644_s5 + $0x6f0] sm:$0xff] }
 0x2eb   : > { %3710 = vmatprep.mubr.f32.mxu0 %v7992_v2  ;;  %3823 = vmatprep.mubr.f32.mxu1 %v7992_v2  ;;  %v3602_v41 = vld [vmem:[%s8644_s5 + $0x7d0] sm:$0xff]  ;;  %v3609_v0 = vld [vmem:[%s8644_s5 + $0x808] sm:$0xff] }
 0x2ec   : > { %3711 = vmatmul.mubr.f32.gmra.mrb[24].mxu0 %v8000_v29  ;;  %3824 = vmatmul.mubr.f32.gmra.mrb[28].mxu1 %v8000_v29  ;;  %v5282_v38 = vpack.c.bf16 %v3602_v41, %v3593_v58 }
 0x2ed   : > { %5249 = vmatpush1.bf16.msra.mxu1 %v5248_v61  ;;  %5189 = vmatpush1.bf16.msra.mxu0 %v5188_v1  ;;  %v3529_v61 = vld [vmem:[%s8644_s5 + $0x588] sm:$0xff]  ;;  %v5266_v1 = vpack.c.bf16 %v3530_v50, %v3521_v16 }
 0x2ee   : > { %5251 = vmatprep.subr.bf16.mxu1 %v5250_v28  ;;  %5191 = vmatprep.subr.bf16.mxu0 %v5190_v53  ;;  %v3536_v28 = vld [vmem:[%s8644_s5 + $0x5c0] sm:$0xff]  ;;  %v3545_v53 = vld [vmem:[%s8644_s5 + $0x608] sm:$0xff]  ;;  %v5268_v6 = vpack.c.bf16 %v3529_v61, %v3520_v3 }
 0x2ef   : > { %v5208_v45 = vpack.c.bf16 %v3545_v53, %v3536_v28  ;;  %v3601_v50 = vld [vmem:[%s8644_s5 + $0x7c8] sm:$0xff]  ;;  %v3608_v3 = vld [vmem:[%s8644_s5 + $0x800] sm:$0xff] }
 0x2f0   : > { %v3617_v61 = vld [vmem:[%s8644_s5 + $0x848] sm:$0xff]  ;;  %v5284_v28 = vpack.c.bf16 %v3601_v50, %v3592_v17 }
 0x2f1   : > { %5253 = vmatpush1.bf16.msra.mxu1 %v5252_v55  ;;  %5193 = vmatpush1.bf16.msra.mxu0 %v5192_v25  ;;  %v3547_v55 = vld [vmem:[%s8644_s5 + $0x618] sm:$0xff]  ;;  %v5270_v25 = vpack.c.bf16 %v3548_v36, %v3539_v46  ;;  %v3636_v46 = vld [vmem:[%s8644_s5 + $0x8e0] sm:$0xff]  ;;  %v5224_v53 = vpack.c.bf16 %v3617_v61, %v3608_v3  ;;  %v3610_v36 = vld [vmem:[%s8644_s5 + $0x810] sm:$0xff] }
 0x2f2   : > { %v2769_v34 = vpop.f32.mrb[16].mxu1  ;;  %5255 = vmatprep.subr.bf16.mxu1 %v5254_v44  ;;  %5195 = vmatprep.subr.bf16.mxu0 %v5194_v32  ;;  %v3554_v44 = vld [vmem:[%s8644_s5 + $0x650] sm:$0xff]  ;;  %v3563_v32 = vld [vmem:[%s8644_s5 + $0x698] sm:$0xff]  ;;  %v5272_v48 = vpack.c.bf16 %v3547_v55, %v3538_v35 }
 0x2f3   : > { %v2770_v49 = vadd.f32 %v2769_v34, %v7674_v59  ;;  %v2771_v5 = vpop.f32.mrb[17].mxu1  ;;  %v5212_v52 = vpack.c.bf16 %v3563_v32, %v3554_v44  ;;  %v5214_v34 = vpack.c.bf16 %v3582_v37, %v3573_v13  ;;  %v3626_v35 = vld [vmem:[%s8644_s5 + $0x890] sm:$0xff]  ;;  %v3635_v55 = vld [vmem:[%s8644_s5 + $0x8d8] sm:$0xff]  ;;  %v5288_v44 = vpack.c.bf16 %v3619_v54, %v3610_v36 }
 0x2f4   : > { %v2772_v22 = vadd.f32 %v2771_v5, %v7674_v59  ;;  %v3600_v5 = vld [vmem:[%s8644_s5 + $0x7c0] sm:$0xff]  ;;  %v5228_v32 = vpack.c.bf16 %v3635_v55, %v3626_v35  ;;  %v3378_v54 = vld [vmem:[%s8644_s5 + $0xd0] sm:$0xff] }
 0x2f5   : > { %5257 = vmatpush1.bf16.msra.mxu1 %v5256_v7  ;;  %5197 = vmatpush1.bf16.msra.mxu0 %v5196_v51  ;;  %v8082_v27 = vmax.f32 %v2770_v49, 0.0  ;;  %v3565_v7 = vld [vmem:[%s8644_s5 + $0x6a8] sm:$0xff]  ;;  %v5274_v51 = vpack.c.bf16 %v3566_v11, %v3557_v21  ;;  %v3591_v49 = vld [vmem:[%s8644_s5 + $0x778] sm:$0xff] }
 0x2f6   : > { %v8074_v63 = vmax.f32 %v2772_v22, 0.0  ;;  %5259 = vmatprep.subr.bf16.mxu1 %v5258_v47  ;;  %5199 = vmatprep.subr.bf16.mxu0 %v5198_v18  ;;  %v3575_v47 = vld [vmem:[%s8644_s5 + $0x6f8] sm:$0xff]  ;;  %v3584_v18 = vld [vmem:[%s8644_s5 + $0x740] sm:$0xff]  ;;  %v5276_v20 = vpack.c.bf16 %v3565_v7, %v3556_v4  ;;  %v5218_v9 = vpack.c.bf16 %v3600_v5, %v3591_v49  ;;  %v3513_v21 = vld [vmem:[%s8644_s5 + $0x508] sm:$0xff] }
 0x2f7   : > { %v3583_v22 = vld [vmem:[%s8644_s5 + $0x738] sm:$0xff]  ;;  %v5278_v10 = vpack.c.bf16 %v3584_v18, %v3575_v47  ;;  %v3637_v4 = vld [vmem:[%s8644_s5 + $0x8e8] sm:$0xff] }
 0x2f8   : > { %3716 = vmatprep.mubr.f32.mxu0 %v8074_v63  ;;  %3829 = vmatprep.mubr.f32.mxu1 %v8074_v63  ;;  %v5280_v16 = vpack.c.bf16 %v3583_v22, %v3574_v43 }
 0x2f9   : > { %3717 = vmatmul.mubr.f32.gmra.mrb[26].mxu0 %v8082_v27  ;;  %3830 = vmatmul.mubr.f32.gmra.mrb[30].mxu1 %v8082_v27 }
 0x2fa   : > { %5261 = vmatpush1.bf16.msra.mxu1 %v5260_v24  ;;  %5201 = vmatpush1.bf16.msra.mxu0 %v5200_v60  ;;  %v3590_v24 = vld [vmem:[%s8644_s5 + $0x770] sm:$0xff]  ;;  %v3599_v60 = vld [vmem:[%s8644_s5 + $0x7b8] sm:$0xff] }
 0x2fb   : > { %5263 = vmatprep.subr.bf16.mxu1 %v5262_v40  ;;  %5203 = vmatprep.subr.bf16.mxu0 %v5202_v14  ;;  %v3618_v40 = vld [vmem:[%s8644_s5 + $0x850] sm:$0xff]  ;;  %v5220_v8 = vpack.c.bf16 %v3599_v60, %v3590_v24 }
 0x2fe   : > { %5265 = vmatpush1.bf16.msra.mxu1 %v5264_v62  ;;  %5205 = vmatpush1.bf16.msra.mxu0 %v5204_v15  ;;  %v5222_v62 = vpack.c.bf16 %v3618_v40, %v3609_v0  ;;  %v3611_v15 = vld [vmem:[%s8644_s5 + $0x818] sm:$0xff] }
 0x2ff   : > { %5267 = vmatprep.subr.bf16.mxu1 %v5266_v1  ;;  %5207 = vmatprep.subr.bf16.mxu0 %v5206_v23  ;;  %v3620_v1 = vld [vmem:[%s8644_s5 + $0x860] sm:$0xff]  ;;  %v3627_v23 = vld [vmem:[%s8644_s5 + $0x898] sm:$0xff] }
 0x300   : > { %v5286_v42 = vpack.c.bf16 %v3620_v1, %v3611_v15 }
 0x302   : > { %5269 = vmatpush1.bf16.msra.mxu1 %v5268_v6  ;;  %5209 = vmatpush1.bf16.msra.mxu0 %v5208_v45  ;;  %v5226_v6 = vpack.c.bf16 %v3636_v46, %v3627_v23  ;;  %v3629_v45 = vld [vmem:[%s8644_s5 + $0x8a8] sm:$0xff]  ;;  %v3360_v23 = vld [vmem:[%s8644_s5 + $0x40] sm:$0xff] }
 0x303   : > { %5271 = vmatprep.subr.bf16.mxu1 %v5270_v25  ;;  %5211 = vmatprep.subr.bf16.mxu0 %v5210_v30  ;;  %v3638_v25 = vld [vmem:[%s8644_s5 + $0x8f0] sm:$0xff]  ;;  %v3504_v30 = vld [vmem:[%s8644_s5 + $0x4c0] sm:$0xff]  ;;  %v3369_v46 = vld [vmem:[%s8644_s5 + $0x88] sm:$0xff] }
 0x304   : > { %v5290_v11 = vpack.c.bf16 %v3638_v25, %v3629_v45  ;;  %v5294_v13 = vpack.c.bf16 %v3513_v21, %v3504_v30  ;;  %v3549_v45 = vld [vmem:[%s8644_s5 + $0x628] sm:$0xff]  ;;  %v3396_v25 = vld [vmem:[%s8644_s5 + $0x160] sm:$0xff]  ;;  %v3558_v21 = vld [vmem:[%s8644_s5 + $0x670] sm:$0xff] }
 0x305   : > { %v3405_v30 = vld [vmem:[%s8644_s5 + $0x1a8] sm:$0xff] }
 0x306   : > { %5273 = vmatpush1.bf16.msra.mxu1 %v5272_v48  ;;  %5213 = vmatpush1.bf16.msra.mxu0 %v5212_v52  ;;  %v3628_v52 = vld [vmem:[%s8644_s5 + $0x8a0] sm:$0xff] }
 0x307   : > { %5275 = vmatprep.subr.bf16.mxu1 %v5274_v51  ;;  %5215 = vmatprep.subr.bf16.mxu0 %v5214_v34  ;;  %v5292_v47 = vpack.c.bf16 %v3637_v4, %v3628_v52  ;;  %v3585_v52 = vld [vmem:[%s8644_s5 + $0x748] sm:$0xff] }
 0x30a   : > { %v2840_v14 = vpop.f32.mrb[14].mxu0  ;;  %5277 = vmatpush1.bf16.msra.mxu1 %v5276_v20  ;;  %5217 = vmatpush1.bf16.msra.mxu0 %v5216_v39 }
 0x30b   : > { %v2841_v26 = vpop.f32.mrb[15].mxu0  ;;  %5279 = vmatprep.subr.bf16.mxu1 %v5278_v10  ;;  %5219 = vmatprep.subr.bf16.mxu0 %v5218_v9 }
 0x30c   : > { %v2842_v37 = vadd.f32 %v2841_v26, %v7674_v59 }
 0x30e   : > { %5281 = vmatpush1.bf16.msra.mxu1 %v5280_v16  ;;  %5221 = vmatpush1.bf16.msra.mxu0 %v5220_v8  ;;  %v8260_v57 = vmax.f32 %v2842_v37, 0.0  ;;  %v3423_v37 = vld [vmem:[%s8644_s5 + $0x238] sm:$0xff] }
 0x30f   : > { %5283 = vmatprep.subr.bf16.mxu1 %v5282_v38  ;;  %5223 = vmatprep.subr.bf16.mxu0 %v5222_v62 }
 0x312   : > { %5285 = vmatpush1.bf16.msra.mxu1 %v5284_v28  ;;  %5225 = vmatpush1.bf16.msra.mxu0 %v5224_v53  ;;  %v3531_v28 = vld [vmem:[%s8644_s5 + $0x598] sm:$0xff]  ;;  %v5296_v53 = vpack.c.bf16 %v3369_v46, %v3360_v23 }
 0x313   : > { %5287 = vmatprep.subr.bf16.mxu1 %v5286_v42  ;;  %5227 = vmatprep.subr.bf16.mxu0 %v5226_v6  ;;  %v3387_v42 = vld [vmem:[%s8644_s5 + $0x118] sm:$0xff]  ;;  %v3540_v6 = vld [vmem:[%s8644_s5 + $0x5e0] sm:$0xff] }
 0x314   : > { %v5300_v35 = vpack.c.bf16 %v3387_v42, %v3378_v54  ;;  %v5302_v55 = vpack.c.bf16 %v3549_v45, %v3540_v6 }
 0x315   : > { %v2910_v48 = vpop.f32.mrb[18].mxu1 }
 0x316   : > { %v2911_v7 = vadd.f32 %v2910_v48, %v7674_v59  ;;  %v2912_v51 = vpop.f32.mrb[19].mxu1  ;;  %5289 = vmatpush1.bf16.msra.mxu1 %v5288_v44  ;;  %5229 = vmatpush1.bf16.msra.mxu0 %v5228_v32  ;;  %v3567_v44 = vld [vmem:[%s8644_s5 + $0x6b8] sm:$0xff]  ;;  %v5304_v32 = vpack.c.bf16 %v3405_v30, %v3396_v25  ;;  %v3576_v48 = vld [vmem:[%s8644_s5 + $0x700] sm:$0xff] }
 0x317   : > { %5291 = vmatprep.subr.bf16.mxu1 %v5290_v11  ;;  %5295 = vmatprep.subr.bf16.mxu0 %v5294_v13  ;;  %v5306_v11 = vpack.c.bf16 %v3567_v44, %v3558_v21  ;;  %v3414_v13 = vld [vmem:[%s8644_s5 + $0x1f0] sm:$0xff]  ;;  %v3432_v51 = vld [vmem:[%s8644_s5 + $0x280] sm:$0xff] }
 0x318   : > { %v8258_v34 = vmax.f32 %v2911_v7, 0.0  ;;  %v5308_v4 = vpack.c.bf16 %v3423_v37, %v3414_v13  ;;  %v5310_v7 = vpack.c.bf16 %v3585_v52, %v3576_v48  ;;  %v4353_v13 = vld [vmem:[%s8647_s8 + $0x8] sm:$0xff]  ;;  %v4354_v37 = vld [vmem:[%s8647_s8 + $0x10] sm:$0xff]  ;;  %v4355_v52 = vld [vmem:[%s8647_s8 + $0x18] sm:$0xff] }
 0x31a   : > { %3722 = vmatprep.mubr.f32.mxu0 %v8258_v34  ;;  %3835 = vmatprep.mubr.f32.mxu1 %v8258_v34 }
 0x31b   : > { %3723 = vmatmul.mubr.f32.gmra.mrb[28].mxu0 %v8260_v57  ;;  %3836 = vmatmul.mubr.f32.gmra.mrb[32].mxu1 %v8260_v57 }
 0x31c   : > { %5293 = vmatpush1.bf16.msra.mxu1 %v5292_v47  ;;  %v3441_v47 = vld [vmem:[%s8644_s5 + $0x2c8] sm:$0xff] }
 0x31d   : > { %5326 = vmatprep.subr.bf16.mxu1 %v5896_v19 }
 0x32e   : > { %v2980_v12 = vpop.f32.mrb[16].mxu0 }
 0x32f   : > { %v2981_v18 = vadd.f32 %v2980_v12, %v7674_v59  ;;  %v2982_v49 = vpop.f32.mrb[17].mxu0  ;;  %v3594_v12 = vld [vmem:[%s8644_s5 + $0x790] sm:$0xff] }
 0x330   : > { %v2983_v5 = vadd.f32 %v2982_v49, %v7674_v59  ;;  %v5312_v49 = vpack.c.bf16 %v3441_v47, %v3432_v51  ;;  %v4357_v51 = vld [vmem:[%s8647_s8 + $0x28] sm:$0xff] }
 0x331   : > { %v8271_v39 = vmax.f32 %v2981_v18, 0.0  ;;  %v3603_v18 = vld [vmem:[%s8644_s5 + $0x7d8] sm:$0xff] }
 0x332   : > { %v8269_v20 = vmax.f32 %v2983_v5, 0.0  ;;  %v5314_v5 = vpack.c.bf16 %v3603_v18, %v3594_v12  ;;  %v4358_v12 = vld [vmem:[%s8647_s8 + $0x30] sm:$0xff]  ;;  %v4359_v18 = vld [vmem:[%s8647_s8 + $0x38] sm:$0xff] }
 0x334   : > { %3728 = vmatprep.mubr.f32.mxu0 %v8269_v20  ;;  %3841 = vmatprep.mubr.f32.mxu1 %v8269_v20 }
 0x335   : > { %3729 = vmatmul.mubr.f32.gmra.mrb[30].mxu0 %v8271_v39  ;;  %3842 = vmatmul.mubr.f32.gmra.mrb[34].mxu1 %v8271_v39  ;;  %v3051_v43 = vpop.f32.mrb[20].mxu1 }
 0x336   : > { %v3052_v22 = vpop.f32.mrb[21].mxu1  ;;  %v3450_v43 = vld [vmem:[%s8644_s5 + $0x310] sm:$0xff] }
 0x337   : > { %v3053_v10 = vadd.f32 %v3052_v22, %v7674_v59  ;;  %v3459_v22 = vld [vmem:[%s8644_s5 + $0x358] sm:$0xff] }
 0x339   : > { %v8281_v0 = vmax.f32 %v3053_v10, 0.0  ;;  %v3612_v10 = vld [vmem:[%s8644_s5 + $0x820] sm:$0xff] }
 0x356   : > { %v3121_v9 = vpop.f32.mrb[18].mxu0 }
 0x357   : > { %v3122_v58 = vadd.f32 %v3121_v9, %v7674_v59  ;;  %v3123_v24 = vpop.f32.mrb[19].mxu0  ;;  %v3621_v9 = vld [vmem:[%s8644_s5 + $0x868] sm:$0xff] }
 0x358   : > { %v5318_v24 = vpack.c.bf16 %v3621_v9, %v3612_v10  ;;  %v4362_v10 = vld [vmem:[%s8647_s8 + $0x50] sm:$0xff]  ;;  %v4363_v9 = vld [vmem:[%s8647_s8 + $0x58] sm:$0xff] }
 0x359   : > { %v8279_v60 = vmax.f32 %v3122_v58, 0.0  ;;  %v3191_v41 = vpop.f32.mrb[22].mxu1  ;;  %v5316_v58 = vpack.c.bf16 %v3459_v22, %v3450_v43  ;;  %v4361_v43 = vld [vmem:[%s8647_s8 + $0x48] sm:$0xff] }
 0x35a   : > { %v3192_v40 = vadd.f32 %v3191_v41, %v7674_v59  ;;  %v3193_v14 = vpop.f32.mrb[23].mxu1  ;;  %v3468_v41 = vld [vmem:[%s8644_s5 + $0x3a0] sm:$0xff] }
 0x35b   : > { %v3194_v16 = vadd.f32 %v3193_v14, %v7674_v59  ;;  %3734 = vmatprep.mubr.f32.mxu0 %v8279_v60  ;;  %3847 = vmatprep.mubr.f32.mxu1 %v8279_v60  ;;  %v3630_v14 = vld [vmem:[%s8644_s5 + $0x8b0] sm:$0xff] }
 0x35c   : > { %3735 = vmatmul.mubr.f32.gmra.mrb[32].mxu0 %v8281_v0  ;;  %3848 = vmatmul.mubr.f32.gmra.mrb[36].mxu1 %v8281_v0  ;;  %v8291_v17 = vmax.f32 %v3192_v40, 0.0  ;;  %v3477_v40 = vld [vmem:[%s8644_s5 + $0x3e8] sm:$0xff] }
 0x35d   : > { %v8289_v8 = vmax.f32 %v3194_v16, 0.0  ;;  %v3639_v16 = vld [vmem:[%s8644_s5 + $0x8f8] sm:$0xff] }
 0x35f   : > { %3740 = vmatprep.mubr.f32.mxu0 %v8289_v8  ;;  %3853 = vmatprep.mubr.f32.mxu1 %v8289_v8 }
 0x360   : > { %3741 = vmatmul.mubr.f32.gmra.mrb[34].mxu0 %v8291_v17  ;;  %3854 = vmatmul.mubr.f32.gmra.mrb[38].mxu1 %v8291_v17 }
 0x36a   : > { %v3262_v50 = vpop.f32.mrb[20].mxu0 }
 0x36b   : > { %v3263_v26 = vpop.f32.mrb[21].mxu0  ;;  %v5320_v50 = vpack.c.bf16 %v3477_v40, %v3468_v41  ;;  %v4365_v41 = vld [vmem:[%s8647_s8 + $0x68] sm:$0xff] }
 0x36c   : > { %v3264_v38 = vadd.f32 %v3263_v26, %v7674_v59  ;;  %v5322_v26 = vpack.c.bf16 %v3639_v16, %v3630_v14  ;;  %v4366_v14 = vld [vmem:[%s8647_s8 + $0x70] sm:$0xff]  ;;  %v4367_v16 = vld [vmem:[%s8647_s8 + $0x78] sm:$0xff] }
 0x36d   : > { %v3332_v62 = vpop.f32.mrb[24].mxu1 }
 0x36e   : > { %v3333_v15 = vadd.f32 %v3332_v62, %v7674_v59  ;;  %v4699_v3 = vpop.f32.mrb[25].mxu1  ;;  %v8301_v1 = vmax.f32 %v3264_v38, 0.0  ;;  %v3522_v59 = vld [vmem:[%s8644_s5 + $0x550] sm:$0xff]  ;;  %v3495_v62 = vld [vmem:[%s8644_s5 + $0x478] sm:$0xff] }
 0x36f   : > { %v5298_v36 = vpack.c.bf16 %v3531_v28, %v3522_v59  ;;  %v3486_v38 = vld [vmem:[%s8644_s5 + $0x430] sm:$0xff] }
 0x370   : > { %v8299_v61 = vmax.f32 %v3333_v15, 0.0  ;;  %v5324_v15 = vpack.c.bf16 %v3495_v62, %v3486_v38  ;;  %v5360_v38 = vpack.c.bf16 %v4367_v16, %v4366_v14 }
 0x372   : > { %3746 = vmatprep.mubr.f32.mxu0 %v8299_v61  ;;  %3859 = vmatprep.mubr.f32.mxu1 %v8299_v61 }
 0x373   : > { %3747 = vmatmul.mubr.f32.gmra.mrb[36].mxu0 %v8301_v1  ;;  %3860 = vmatmul.mubr.f32.gmra.mrb[40].mxu1 %v8301_v1 }
 0x374   : > { %3930 = vmatprep.mubr.f32.mxu0 %v7695_v33  ;;  %4043 = vmatprep.mubr.f32.mxu1 %v7695_v33 }
 0x377   : > { %3931 = vmatmul.mubr.f32.vlgmr.msra.gmra.mrb[38].mxu0 %v7877_v31  ;;  %4044 = vmatmul.mubr.f32.vlgmr.msra.gmra.mrb[42].mxu1 %v7877_v31 }
 0x378   : > { %3936 = vmatprep.mubr.f32.mxu0 %v7992_v2  ;;  %4049 = vmatprep.mubr.f32.mxu1 %v7992_v2 }
 0x379   : > { %5297 = vmatpush3.bf16.msra.mxu0 %v5296_v53 }
 0x37a   : > { %5299 = vmatprep.subr.bf16.mxu0 %v5298_v36 }
 0x37b   : > { %3937 = vmatmul.mubr.f32.gmra.mrb[40].mxu0 %v8000_v29  ;;  %4050 = vmatmul.mubr.f32.gmra.mrb[44].mxu1 %v8000_v29 }
 0x37c   : > { %3942 = vmatprep.mubr.f32.mxu0 %v8074_v63  ;;  %4055 = vmatprep.mubr.f32.mxu1 %v8074_v63 }
 0x37d   : > { %5301 = vmatpush3.bf16.msra.mxu0 %v5300_v35 }
 0x37e   : > { %5303 = vmatprep.subr.bf16.mxu0 %v5302_v55 }
 0x37f   : > { %3943 = vmatmul.mubr.f32.gmra.mrb[42].mxu0 %v8082_v27  ;;  %4056 = vmatmul.mubr.f32.gmra.mrb[46].mxu1 %v8082_v27 }
 0x380   : > { %3948 = vmatprep.mubr.f32.mxu0 %v8258_v34  ;;  %4061 = vmatprep.mubr.f32.mxu1 %v8258_v34 }
 0x381   : > { %5305 = vmatpush3.bf16.msra.mxu0 %v5304_v32 }
 0x382   : > { %5307 = vmatprep.subr.bf16.mxu0 %v5306_v11  ;;  %v4352_v11 = vld [vmem:[%s8647_s8] sm:$0xff] }
 0x383   : > { %3949 = vmatmul.mubr.f32.gmra.mrb[44].mxu0 %v8260_v57  ;;  %4062 = vmatmul.mubr.f32.gmra.mrb[48].mxu1 %v8260_v57  ;;  %v5339_v48 = vpack.c.bf16 %v4353_v13, %v4352_v11 }
 0x384   : > { %3954 = vmatprep.mubr.f32.mxu0 %v8269_v20  ;;  %4067 = vmatprep.mubr.f32.mxu1 %v8269_v20 }
 0x385   : > { %5309 = vmatpush3.bf16.msra.mxu0 %v5308_v4  ;;  %v5342_v4 = vpack.c.bf16 %v4355_v52, %v4354_v37 }
 0x386   : > { %5311 = vmatprep.subr.bf16.mxu0 %v5310_v7  ;;  %v4356_v7 = vld [vmem:[%s8647_s8 + $0x20] sm:$0xff] }
 0x387   : > { %3955 = vmatmul.mubr.f32.gmra.mrb[46].mxu0 %v8271_v39  ;;  %4068 = vmatmul.mubr.f32.gmra.mrb[50].mxu1 %v8271_v39  ;;  %v5345_v47 = vpack.c.bf16 %v4357_v51, %v4356_v7 }
 0x388   : > { %3960 = vmatprep.mubr.f32.mxu0 %v8279_v60  ;;  %4073 = vmatprep.mubr.f32.mxu1 %v8279_v60 }
 0x389   : > { %5313 = vmatpush3.bf16.msra.mxu0 %v5312_v49  ;;  %v5348_v49 = vpack.c.bf16 %v4359_v18, %v4358_v12 }
 0x38a   : > { %5315 = vmatprep.subr.bf16.mxu0 %v5314_v5  ;;  %v4360_v5 = vld [vmem:[%s8647_s8 + $0x40] sm:$0xff] }
 0x38b   : > { %3961 = vmatmul.mubr.f32.gmra.mrb[48].mxu0 %v8281_v0  ;;  %4074 = vmatmul.mubr.f32.gmra.mrb[52].mxu1 %v8281_v0  ;;  %v5351_v22 = vpack.c.bf16 %v4361_v43, %v4360_v5 }
 0x38c   : > { %3966 = vmatprep.mubr.f32.mxu0 %v8289_v8  ;;  %4079 = vmatprep.mubr.f32.mxu1 %v8289_v8 }
 0x38d   : > { %5317 = vmatpush3.bf16.msra.mxu0 %v5316_v58  ;;  %v5354_v58 = vpack.c.bf16 %v4363_v9, %v4362_v10 }
 0x38e   : > { %5319 = vmatprep.subr.bf16.mxu0 %v5318_v24  ;;  %v4364_v24 = vld [vmem:[%s8647_s8 + $0x60] sm:$0xff] }
 0x38f   : > { %3967 = vmatmul.mubr.f32.gmra.mrb[50].mxu0 %v8291_v17  ;;  %4080 = vmatmul.mubr.f32.gmra.mrb[54].mxu1 %v8291_v17  ;;  %v5357_v40 = vpack.c.bf16 %v4365_v41, %v4364_v24 }
 0x390   : > { %3972 = vmatprep.mubr.f32.mxu0 %v8299_v61  ;;  %4085 = vmatprep.mubr.f32.mxu1 %v8299_v61 }
 0x391   : > { %5321 = vmatpush3.bf16.msra.mxu0 %v5320_v50 }
 0x392   : > { %5323 = vmatprep.subr.bf16.mxu0 %v5322_v26 }
 0x393   : > { %3973 = vmatmul.mubr.f32.gmra.mrb[52].mxu0 %v8301_v1  ;;  %4086 = vmatmul.mubr.f32.gmra.mrb[56].mxu1 %v8301_v1 }
 0x394   : > { %4156 = vmatprep.mubr.f32.mxu0 %v7695_v33  ;;  %4716 = vmatprep.mubr.msk.f32.mxu1 %vm5897_vm11, %v5886_v56 }
 0x395   : > { %5325 = vmatpush3.bf16.msra.mxu0 %v5324_v15 }
 0x396   : > { %5338 = vmatprep.subr.bf16.mxu0 %v5896_v19 }
 0x398   : > { %4157 = vmatmul.mubr.f32.vlgmr.msra.gmra.mrb[54].mxu0 %v7877_v31 }
 0x399   : > { %4161 = vmatprep.mubr.f32.mxu0 %v7992_v2  ;;  %5340 = vmatpush3.bf16.msra.mxu0 %v5339_v48 }
 0x39a   : > { %5341 = vmatprep.subr.bf16.mxu0 %v5896_v19 }
 0x39c   : > { %4162 = vmatmul.mubr.f32.gmra.mrb[56].mxu0 %v8000_v29 }
 0x39d   : > { %4166 = vmatprep.mubr.f32.mxu0 %v8074_v63  ;;  %5343 = vmatpush3.bf16.msra.mxu0 %v5342_v4 }
 0x39e   : > { %5344 = vmatprep.subr.bf16.mxu0 %v5896_v19 }
 0x3a0   : > { %4167 = vmatmul.mubr.f32.gmra.mrb[58].mxu0 %v8082_v27 }
 0x3a1   : > { %4171 = vmatprep.mubr.f32.mxu0 %v8258_v34  ;;  %5346 = vmatpush3.bf16.msra.mxu0 %v5345_v47 }
 0x3a2   : > { %5347 = vmatprep.subr.bf16.mxu0 %v5896_v19 }
 0x3a4   : > { %4172 = vmatmul.mubr.f32.gmra.mrb[60].mxu0 %v8260_v57 }
 0x3a5   : > { %4176 = vmatprep.mubr.f32.mxu0 %v8269_v20  ;;  %5349 = vmatpush3.bf16.msra.mxu0 %v5348_v49 }
 0x3a6   : > { %5350 = vmatprep.subr.bf16.mxu0 %v5896_v19 }
 0x3a8   : > { %4177 = vmatmul.mubr.f32.gmra.mrb[62].mxu0 %v8271_v39 }
 0x3a9   : > { %4181 = vmatprep.mubr.f32.mxu0 %v8279_v60  ;;  %5352 = vmatpush3.bf16.msra.mxu0 %v5351_v22 }
 0x3aa   : > { %5353 = vmatprep.subr.bf16.mxu0 %v5896_v19 }
 0x3ab   : > { %v3706_v33 = vpop.f32.mrb[22].mxu0 }
 0x3ac   : > { %v3708_v31 = vpop.f32.mrb[23].mxu0  ;;  %4182 = vmatmul.mubr.f32.gmra.mrb[64].mxu0 %v8281_v0 }
 0x3ad   : > { %v4197_v2 = vmax.f32 %v3706_v33, %v3708_v31  ;;  %4186 = vmatprep.mubr.f32.mxu0 %v8289_v8  ;;  %v3819_v29 = vpop.f32.mrb[26].mxu1  ;;  %5355 = vmatpush3.bf16.msra.mxu0 %v5354_v58 }
 0x3ae   : > { %v8445_v63 = vpop.f32.mrb[27].mxu1  ;;  %5356 = vmatprep.subr.bf16.mxu0 %v5896_v19 }
 0x3af   : > { %v8447_v27 = vmax.f32 %v4197_v2, %v3819_v29 }
 0x3b0   : > { %4187 = vmatmul.mubr.f32.gmra.mrb[66].mxu0 %v8291_v17 }
 0x3b1   : > { %v4213_v34 = vmax.f32 %v8447_v27, %v8445_v63  ;;  %4191 = vmatprep.mubr.f32.mxu0 %v8299_v61  ;;  %5358 = vmatpush3.bf16.msra.mxu0 %v5357_v40 }
 0x3b2   : > { %5359 = vmatprep.subr.bf16.mxu0 %v5896_v19 }
 0x3b4   : > { %4192 = vmatmul.mubr.f32.gmra.mrb[68].mxu0 %v8301_v1 }
 0x3b5   : > { %4751 = vmatprep.mubr.msk.f32.mxu0 %vm5897_vm11, %v5886_v56  ;;  %5361 = vmatpush3.bf16.msra.mxu0 %v5360_v38 }
 0x3bf   : > { %v3712_v57 = vpop.f32.mrb[24].mxu0  ;;  %v3825_v20 = vpop.f32.mrb[28].mxu1 }
 0x3c0   : > { %v3714_v39 = vpop.f32.mrb[25].mxu0  ;;  %v8456_v60 = vpop.f32.mrb[29].mxu1 }
 0x3c1   : > { %v4198_v0 = vmax.f32 %v3712_v57, %v3714_v39 }
 0x3c3   : > { %v8458_v8 = vmax.f32 %v4198_v0, %v3825_v20 }
 0x3c5   : > { %v4214_v17 = vmax.f32 %v8458_v8, %v8456_v60 }
 0x3cc   : > { %v3718_v3 = vpop.f32.mrb[26].mxu0  ;;  %v3831_v23 = vpop.f32.mrb[30].mxu1 }
 0x3cd   : > { %v3720_v46 = vpop.f32.mrb[27].mxu0  ;;  %v8462_v61 = vpop.f32.mrb[31].mxu1 }
 0x3ce   : > { %v4199_v1 = vmax.f32 %v3718_v3, %v3720_v46 }
 0x3d0   : > { %v8464_v59 = vmax.f32 %v4199_v1, %v3831_v23 }
 0x3d2   : > { %v4215_v56 = vmax.f32 %v8464_v59, %v8462_v61 }
 0x3ee   : > { %v3724_v28 = vpop.f32.mrb[28].mxu0  ;;  %v3837_v53 = vpop.f32.mrb[32].mxu1 }
 0x3ef   : > { %v3726_v36 = vpop.f32.mrb[29].mxu0  ;;  %v8468_v54 = vpop.f32.mrb[33].mxu1 }
 0x3f0   : > { %v4200_v42 = vmax.f32 %v3724_v28, %v3726_v36 }
 0x3f2   : > { %v8470_v6 = vmax.f32 %v4200_v42, %v3837_v53 }
 0x3f4   : > { %v4216_v45 = vmax.f32 %v8470_v6, %v8468_v54 }
 0x408   : > { %v3730_v35 = vpop.f32.mrb[30].mxu0  ;;  %v3843_v55 = vpop.f32.mrb[34].mxu1 }
 0x409   : > { %v3732_v25 = vpop.f32.mrb[31].mxu0  ;;  %v8474_v30 = vpop.f32.mrb[35].mxu1 }
 0x40a   : > { %v4201_v21 = vmax.f32 %v3730_v35, %v3732_v25 }
 0x40c   : > { %v8476_v44 = vmax.f32 %v4201_v21, %v3843_v55 }
 0x40e   : > { %v4217_v32 = vmax.f32 %v8476_v44, %v8474_v30 }
 0x42f   : > { %v3736_v50 = vpop.f32.mrb[32].mxu0  ;;  %v3849_v26 = vpop.f32.mrb[36].mxu1 }
 0x430   : > { %v3738_v62 = vpop.f32.mrb[33].mxu0  ;;  %v3851_v15 = vpop.f32.mrb[37].mxu1 }
 0x431   : > { %v4202_v33 = vmax.f32 %v3736_v50, %v3738_v62 }
 0x433   : > { %v4210_v31 = vmax.f32 %v4202_v33, %v3849_v26  ;;  %v3742_v2 = vpop.f32.mrb[34].mxu0  ;;  %v3855_v29 = vpop.f32.mrb[38].mxu1 }
 0x434   : > { %v3744_v57 = vpop.f32.mrb[35].mxu0  ;;  %v3857_v20 = vpop.f32.mrb[39].mxu1 }
 0x435   : > { %v4218_v39 = vmax.f32 %v4210_v31, %v3851_v15  ;;  %v4203_v0 = vmax.f32 %v3742_v2, %v3744_v57 }
 0x437   : > { %v4211_v3 = vmax.f32 %v4203_v0, %v3855_v29 }
 0x439   : > { %v4219_v23 = vmax.f32 %v4211_v3, %v3857_v20 }
 0x446   : > { %v3748_v46 = vpop.f32.mrb[36].mxu0  ;;  %v3861_v1 = vpop.f32.mrb[40].mxu1 }
 0x447   : > { %v3750_v28 = vpop.f32.mrb[37].mxu0  ;;  %v3863_v53 = vpop.f32.mrb[41].mxu1 }
 0x448   : > { %v4204_v36 = vmax.f32 %v3748_v46, %v3750_v28 }
 0x44a   : > { %v4212_v42 = vmax.f32 %v4204_v36, %v3861_v1  ;;  %v3932_v35 = vpop.f32.mrb[38].mxu0  ;;  %v4045_v55 = vpop.f32.mrb[42].mxu1 }
 0x44b   : > { %v4221_v25 = vmax.f32 %v4213_v34, %v3932_v35  ;;  %v3934_v21 = vpop.f32.mrb[39].mxu0  ;;  %v8538_v11 = vpop.f32.mrb[43].mxu1 }
 0x44c   : > { %v4220_v13 = vmax.f32 %v4212_v42, %v3863_v53 }
 0x44d   : > { %v4229_v37 = vmax.f32 %v4221_v25, %v3934_v21 }
 0x44e   : > { %v3938_v48 = vpop.f32.mrb[40].mxu0  ;;  %v4051_v52 = vpop.f32.mrb[44].mxu1 }
 0x44f   : > { %v4237_v4 = vmax.f32 %v4229_v37, %v4045_v55  ;;  %v4222_v7 = vmax.f32 %v4214_v17, %v3938_v48  ;;  %v3940_v51 = vpop.f32.mrb[41].mxu0  ;;  %v8543_v47 = vpop.f32.mrb[45].mxu1 }
 0x451   : > { %v4245_v12 = vmax.f32 %v4237_v4, %v8538_v11  ;;  %v4230_v18 = vmax.f32 %v4222_v7, %v3940_v51  ;;  %v4262_v7 = vld [vmem:[%s8645_s6] sm:$0xff] }
 0x452   : > { %v3944_v63 = vpop.f32.mrb[42].mxu0  ;;  %v4057_v27 = vpop.f32.mrb[46].mxu1 }
 0x453   : > { %v4238_v34 = vmax.f32 %v4230_v18, %v4051_v52  ;;  %v4223_v49 = vmax.f32 %v4215_v56, %v3944_v63  ;;  %v3946_v5 = vpop.f32.mrb[43].mxu0  ;;  %v4059_v43 = vpop.f32.mrb[47].mxu1 }
 0x455   : > { %v4246_v22 = vmax.f32 %v4238_v34, %v8543_v47  ;;  %v4231_v10 = vmax.f32 %v4223_v49, %v3946_v5 }
 0x456   : > { %v3950_v60 = vpop.f32.mrb[44].mxu0  ;;  %v4063_v8 = vpop.f32.mrb[48].mxu1 }
 0x457   : > { %v4239_v17 = vmax.f32 %v4231_v10, %v4057_v27  ;;  %v4224_v9 = vmax.f32 %v4216_v45, %v3950_v60  ;;  %v3952_v58 = vpop.f32.mrb[45].mxu0  ;;  %v4065_v24 = vpop.f32.mrb[49].mxu1  ;;  %v4264_v60 = vld [vmem:[%s8645_s6 + $0x10] sm:$0xff] }
 0x459   : > { %v4247_v41 = vmax.f32 %v4239_v17, %v4059_v43  ;;  %v4232_v40 = vmax.f32 %v4224_v9, %v3952_v58 }
 0x45a   : > { %v3956_v14 = vpop.f32.mrb[46].mxu0  ;;  %v4069_v16 = vpop.f32.mrb[50].mxu1 }
 0x45b   : > { %v4240_v61 = vmax.f32 %v4232_v40, %v4063_v8  ;;  %v4225_v59 = vmax.f32 %v4217_v32, %v3956_v14  ;;  %v3958_v56 = vpop.f32.mrb[47].mxu0  ;;  %v4071_v50 = vpop.f32.mrb[51].mxu1  ;;  %v4265_v8 = vld [vmem:[%s8645_s6 + $0x18] sm:$0xff] }
 0x45d   : > { %v4248_v26 = vmax.f32 %v4240_v61, %v4065_v24  ;;  %v4233_v38 = vmax.f32 %v4225_v59, %v3958_v56  ;;  %v4266_v56 = vld [vmem:[%s8645_s6 + $0x20] sm:$0xff] }
 0x45e   : > { %v3962_v62 = vpop.f32.mrb[48].mxu0  ;;  %v4075_v15 = vpop.f32.mrb[52].mxu1 }
 0x45f   : > { %v4241_v33 = vmax.f32 %v4233_v38, %v4069_v16  ;;  %v4226_v54 = vmax.f32 %v4218_v39, %v3962_v62  ;;  %v3964_v6 = vpop.f32.mrb[49].mxu0  ;;  %v4077_v45 = vpop.f32.mrb[53].mxu1 }
 0x461   : > { %v4249_v31 = vmax.f32 %v4241_v33, %v4071_v50  ;;  %v4234_v2 = vmax.f32 %v4226_v54, %v3964_v6  ;;  %v4267_v50 = vld [vmem:[%s8645_s6 + $0x28] sm:$0xff] }
 0x462   : > { %v3968_v29 = vpop.f32.mrb[50].mxu0  ;;  %v4081_v57 = vpop.f32.mrb[54].mxu1 }
 0x463   : > { %v4242_v20 = vmax.f32 %v4234_v2, %v4075_v15  ;;  %v4227_v0 = vmax.f32 %v4219_v23, %v3968_v29  ;;  %v3970_v3 = vpop.f32.mrb[51].mxu0  ;;  %v4083_v46 = vpop.f32.mrb[55].mxu1 }
 0x465   : > { %v4250_v30 = vmax.f32 %v4242_v20, %v4077_v45  ;;  %v4235_v44 = vmax.f32 %v4227_v0, %v3970_v3  ;;  %v4269_v20 = vld [vmem:[%s8645_s6 + $0x38] sm:$0xff] }
 0x466   : > { %v3974_v32 = vpop.f32.mrb[52].mxu0  ;;  %v4087_v1 = vpop.f32.mrb[56].mxu1 }
 0x467   : > { %v4243_v28 = vmax.f32 %v4235_v44, %v4081_v57  ;;  %v4228_v53 = vmax.f32 %v4220_v13, %v3974_v32  ;;  %v3976_v36 = vpop.f32.mrb[53].mxu0  ;;  %v4089_v42 = vpop.f32.mrb[57].mxu1  ;;  %v4263_v13 = vld [vmem:[%s8645_s6 + $0x8] sm:$0xff]  ;;  %v4268_v57 = vld [vmem:[%s8645_s6 + $0x30] sm:$0xff]  ;;  %v4261_v44 = vld [vmem:[%s8646_s7] sm:$0xff] }
 0x469   : > { %v4251_v35 = vmax.f32 %v4243_v28, %v4083_v46  ;;  %v4236_v39 = vmax.f32 %v4228_v53, %v3976_v36 }
 0x46b   : > { %v4244_v55 = vmax.f32 %v4236_v39, %v4087_v1  ;;  %v4629_v25 = vpop.f32.mrb[54].mxu0 }
 0x46c   : > { %v4630_v21 = vpop.f32.mrb[55].mxu0 }
 0x46d   : > { %v4252_v11 = vmax.f32 %v4244_v55, %v4089_v42  ;;  %v4631_v37 = vadd.f32 %v4630_v21, %v4629_v25 }
 0x46f   : > { %v4253_v48 = vmax.f32 %v4245_v12, %v4631_v37  ;;  %v4632_v52 = vpop.f32.mrb[56].mxu0 }
 0x470   : > { %v4633_v23 = vpop.f32.mrb[57].mxu0 }
 0x471   : > { %v4634_v4 = vadd.f32 %v4633_v23, %v4632_v52  ;;  %v4270_v63 = vmul.f32 %v4262_v7, %v4253_v48 }
 0x473   : > { %v4254_v51 = vmax.f32 %v4246_v22, %v4634_v4  ;;  %v4635_v47 = vpop.f32.mrb[58].mxu0 }
 0x474   : > { %v4636_v18 = vpop.f32.mrb[59].mxu0 }
 0x475   : > { %v4271_v27 = vmul.f32 %v4263_v13, %v4254_v51  ;;  %v4637_v34 = vadd.f32 %v4636_v18, %v4635_v47 }
 0x477   : > { %v5327_v49 = vpack.c.bf16 %v4271_v27, %v4270_v63  ;;  %v4255_v5 = vmax.f32 %v4247_v41, %v4637_v34  ;;  %v4638_v12 = vpop.f32.mrb[60].mxu0 }
 0x478   : > { %v4639_v43 = vpop.f32.mrb[61].mxu0 }
 0x479   : > { %v4640_v10 = vadd.f32 %v4639_v43, %v4638_v12  ;;  %5328 = vmatpush3.bf16.msra.mxu1 %v5327_v49  ;;  %v4272_v58 = vmul.f32 %v4264_v60, %v4255_v5 }
 0x47a   : > { %5329 = vmatprep.subr.bf16.mxu1 %v5896_v19 }
 0x47b   : > { %v4256_v22 = vmax.f32 %v4248_v26, %v4640_v10  ;;  %v4641_v17 = vpop.f32.mrb[62].mxu0 }
 0x47c   : > { %v4642_v9 = vpop.f32.mrb[63].mxu0 }
 0x47d   : > { %v4273_v24 = vmul.f32 %v4265_v8, %v4256_v22  ;;  %v4643_v41 = vadd.f32 %v4642_v9, %v4641_v17 }
 0x47f   : > { %v5330_v40 = vpack.c.bf16 %v4273_v24, %v4272_v58  ;;  %v4257_v14 = vmax.f32 %v4249_v31, %v4643_v41  ;;  %v4644_v16 = vpop.f32.mrb[64].mxu0 }
 0x480   : > { %v4645_v61 = vpop.f32.mrb[65].mxu0 }
 0x481   : > { %v4646_v59 = vadd.f32 %v4645_v61, %v4644_v16  ;;  %5331 = vmatpush3.bf16.msra.mxu1 %v5330_v40  ;;  %v4274_v15 = vmul.f32 %v4266_v56, %v4257_v14 }
 0x482   : > { %5332 = vmatprep.subr.bf16.mxu1 %v5896_v19 }
 0x483   : > { %v4258_v26 = vmax.f32 %v4250_v30, %v4646_v59  ;;  %v4647_v38 = vpop.f32.mrb[66].mxu0 }
 0x484   : > { %v4648_v62 = vpop.f32.mrb[67].mxu0 }
 0x485   : > { %v4275_v33 = vmul.f32 %v4267_v50, %v4258_v26  ;;  %v4649_v54 = vadd.f32 %v4648_v62, %v4647_v38 }
 0x487   : > { %v5333_v6 = vpack.c.bf16 %v4275_v33, %v4274_v15  ;;  %v4259_v45 = vmax.f32 %v4251_v35, %v4649_v54  ;;  %v4650_v31 = vpop.f32.mrb[68].mxu0 }
 0x488   : > { %v4651_v2 = vpop.f32.mrb[69].mxu0 }
 0x489   : > { %v4652_v29 = vadd.f32 %v4651_v2, %v4650_v31  ;;  %5334 = vmatpush3.bf16.msra.mxu1 %v5333_v6  ;;  %v4276_v3 = vmul.f32 %v4268_v57, %v4259_v45 }
 0x48a   : > { %5335 = vmatprep.subr.bf16.mxu1 %v5896_v19  ;;  %v4581_v19 = vld [vmem:[%s8648_s9] ss:$0 sm:$0xff] }
 0x48b   : > { %v4260_v0 = vmax.f32 %v4252_v11, %v4652_v29 }
 0x48d   : > { %v4277_v46 = vmul.f32 %v4269_v20, %v4260_v0 }
 0x48f   : > { %v5336_v30 = vpack.c.bf16 %v4277_v46, %v4276_v3 }
 0x491   : > { %5337 = vmatpush3.bf16.msra.mxu1 %v5336_v30 }
 0x494   : > { %4717 = vmatmul.mubr.msk.f32.vlgmr.msra.gmra.mrb[58].mxu1 %vm4278_vm12, %v4261_v44 }
 0x567   : > { %v4348_v32 = vpop.f32.mrb[58].mxu1 }
 0x568   : > { %v4718_v1 = vpop.f32.mrb[59].mxu1  ;;  %4752 = vmatmul.mubr.f32.vlgmr.msra.gmra.mrb[70].mxu0 %v4348_v32 }
 0x63b   : > { %v4441_v28 = vpop.f32.mrb[70].mxu0 }
 0x63c   : > { %v4442_v53 = vadd.f32 %v4581_v19, %v4441_v28  ;;  %v4753_v36 = vpop.f32.mrb[71].mxu0 }
 0x63e   : > { %4446 = vst.msk [vmem:[%s615_s30] sm:$0xff] %vm4445_vm13, %v4442_v53 }
 0x63f   : > { %5835 = shalt.err (!%p5832_p5)
}
 0x640   : > { %s5836_s12 = scalar_lea.hbm %s8595_s20, 128  ;;  %s5840_s30 = scalar_lea.hbm %s8649_s10, 256 }
 0x641   : > { %p5837_p7 = scmp.ne.s32.totalorder %s8595_s20, %s5836_s12  ;;  %p5841_p12 = scmp.lt.u32.totalorder %s8595_s20, %s8649_s10 }
 0x642   : > { %p5842_p13 = scmp.lt.u32.totalorder %s5840_s30, %s5836_s12  ;;  %p5844_p1 = scmp.lt.u32.totalorder %s5836_s12, %s8595_s20 }
 0x643   : > { %p5838_p10 = pnand %p5837_p7, %p5992_p6 }
 0x644   : > { %p5843_p0 = por %p5842_p13, %p5841_p12 }
 0x645   : > { %p5839_p11 = pneg %p5838_p10 }
 0x646   : > { %p5845_p2 = por %p5844_p1, %p5843_p0 }
 0x648   : > { %p5846_p3 = pnand %p5845_p2, %p5839_p11 }
 0x64a   : > { %5849 = shalt.err (!%p5846_p3)
}
 0x64b   : > { %5364 = dma.vmem_to_hbm [thread:$0]  (%p5992_p6), %s8597_s28, 128, %s8595_s20, %s4448_s21  }
 0x64c PF: > { %s4473_s25 = sand.u32 1, %s5872_s13   ;;  %p5367_p4 = pnand %p4528_p9, %p5996_p8 }
 0x64d   : > { %s4474_s26 = scalar_lea.sflag [#allocation4], %s4473_s25 }
 0x64e   : > { %5867 = dma.done.wait (!%p5367_p4), %s4474_s26, 128  }
 0x64f   : > { %5869 = vsyncadd (!%p5367_p4), %s4474_s26, 4294967168  ;;  %p20_p5 = scmp.ge.s32.totalorder %s5977_s19, 4   ;;  %s8656_s13 = smov %s5876_s14 }
 0x650   : > { %s8657_s14 = smov %s5880_s15  ;;  %s8658_s15 = smov %s5990_s22 }
 0x651   : > { %s8659_s16 = smov %s5977_s19  ;;  %22 = sbr.rel (!%p20_p5) target bundleno = 5 (0x5), region = 123 }
 0x658   :  { %4479 = vsyncpa [#allocation4], 1 }
 0x659   :  { %4481 = vsyncpa [#allocation4 + $0x1], 1 }

</bundles_post_ra>
